<compile_context>
chip_gen: v7x
topology: tpu7x:2x2x1
jax: 0.10.0
libtpu: 0.0.40
codegen_flags: <defaults>
</compile_context>

<pallas_src>
import functools

import jax
import jax.numpy as jnp
from jax.experimental import pallas as pl
from jax.experimental.pallas import tpu as pltpu


_FMA_MAX_K = 8  # layers with true fan-in <= this use VPU FMAs instead of the MXU


def _layer_dims(layers):
    """(d_out, d_in) per Linear, in torch layout order, matching the PyTorch module."""
    n_hidden = len(layers) - 2
    dims = []
    for i in range(n_hidden):
        dims.append((layers[i + 1], layers[i]))
        dims.append((layers[i + 1], layers[i + 1]))
    dims.append((layers[-1], layers[-2]))
    return tuple(dims)


def _linear(w, b, x, d_in_true):
    """z = W_pad @ x + b_pad on transposed activations x: (D, tile_b).

    W_pad is zero-padded to (D, D) and b_pad to (D, 1), so padded rows of z are 0.
    For tiny true fan-in, use broadcast FMAs (VPU) instead of a near-empty MXU matmul.
    """
    if d_in_true <= _FMA_MAX_K:
        z = b                                        # (D, 1) broadcasts over lanes
        for k in range(d_in_true):
            z = z + w[:, k:k + 1] * x[k:k + 1, :]    # (D,1)*(1,tile_b) -> (D,tile_b)
        return z
    return jnp.dot(w, x, preferred_element_type=jnp.float32,
                   precision=jax.lax.Precision.HIGHEST) + b


def _net_kernel(dims, x_ref, w_ref, b_ref, o_ref):
    # x_ref: (layers[0], tile_b)   transposed input tile (batch on lanes)
    # w_ref: (L, D, D)             zero-padded weights, torch layout (out, in)
    # b_ref: (L, D, 1)             zero-padded biases
    # o_ref: (layers[-1], tile_b)  transposed, lane-dense output tile
    n_hidden = (len(dims) - 1) // 2
    D = w_ref.shape[1]

    x = x_ref[...].astype(jnp.float32)
    d0 = x.shape[0]
    if d0 < D:  # pad feature rows up to the common padded width D (pure layout work)
        x = jnp.concatenate(
            [x, jnp.zeros((D - d0, x.shape[1]), jnp.float32)], axis=0)

    width = dims[0][1]  # true feature width currently carried in x
    for i in range(n_hidden):
        _, d_in0 = dims[2 * i]
        d_out1, d_in1 = dims[2 * i + 1]
        h = jnp.sin(_linear(w_ref[2 * i], b_ref[2 * i], x, d_in0))
        h = jnp.sin(_linear(w_ref[2 * i + 1], b_ref[2 * i + 1], h, d_in1))
        # Residual: x <- h + x @ eye(width, d_out1)  ==  h + (pad | truncate)(x).
        if width > d_out1:  # truncate: zero the rows >= d_out1 (VPU select)
            rows = jax.lax.broadcasted_iota(jnp.int32, (D, 1), 0)
            x = jnp.where(rows < d_out1, x, 0.0)
        # pad case needs nothing: rows >= width of x are already zero.
        x = h + x
        width = d_out1

    d_out_last, d_in_last = dims[-1]
    z = _linear(w_ref[len(dims) - 1], b_ref[len(dims) - 1], x, d_in_last)
    o_ref[...] = z[:d_out_last, :].astype(o_ref.dtype)


def init_params(layers, key):
    """torch.nn.Linear-style init (uniform +-1/sqrt(fan_in)), torch layout:
    W: (out, in), b: (out,)."""
    params = []
    for (d_out, d_in) in _layer_dims(layers):
        key, kw, kb = jax.random.split(key, 3)
        bound = 1.0 / (d_in ** 0.5)
        w = jax.random.uniform(kw, (d_out, d_in), jnp.float32, -bound, bound)
        b = jax.random.uniform(kb, (d_out,), jnp.float32, -bound, bound)
        params += [w, b]
    return params


def pack_params(params, layers):
    """Zero-pad every Linear to (D, D) / (D, 1) and stack -> (L, D, D), (L, D, 1)."""
    dims = _layer_dims(layers)
    D = ((max(max(layers), 8) + 7) // 8) * 8      # pad width, multiple of 8 sublanes
    L = len(dims)
    wpack = jnp.zeros((L, D, D), jnp.float32)
    bpack = jnp.zeros((L, D, 1), jnp.float32)
    for l, (d_out, d_in) in enumerate(dims):
        w = params[2 * l].astype(jnp.float32)
        b = params[2 * l + 1].astype(jnp.float32)
        wpack = wpack.at[l, :d_out, :d_in].set(w)
        bpack = bpack.at[l, :d_out, 0].set(b)
    return wpack, bpack


def net_forward(x, params, layers, *, tile_b=None):
    n, d_in = x.shape
    assert d_in == layers[0]
    d_out = layers[-1]

    if tile_b is None:
        # Big tiles => few grid steps (~0.35us pipeline overhead each), but keep >= 2
        # steps when the batch allows so both TensorCores get work on v7x.
        tile_b = min(2048, max(128, (n // 2) // 128 * 128))
    tile_b = max(128, (tile_b // 128) * 128)

    n_pad = int(pl.cdiv(n, tile_b)) * tile_b
    if n_pad != n:
        x = jnp.pad(x, ((0, n_pad - n), (0, 0)))
    x_t = x.T.astype(jnp.float32)                 # (d_in, n_pad): batch on lanes

    wpack, bpack = pack_params(params, layers)
    dims = _layer_dims(layers)
    kernel = functools.partial(_net_kernel, dims)

    out_t = pl.pallas_call(
        kernel,
        out_shape=jax.ShapeDtypeStruct((d_out, n_pad), jnp.float32),
        grid_spec=pltpu.PrefetchScalarGridSpec(
            num_scalar_prefetch=0,
            grid=(n_pad // tile_b,),
            in_specs=[
                pl.BlockSpec((d_in, tile_b), lambda i: (0, i)),
                pl.BlockSpec(wpack.shape, lambda i: (0, 0, 0)),
                pl.BlockSpec(bpack.shape, lambda i: (0, 0, 0)),
            ],
            out_specs=pl.BlockSpec((d_out, tile_b), lambda i: (0, i)),
        ),
        compiler_params=pltpu.CompilerParams(
            dimension_semantics=("parallel",),
        ),
    )(x_t, wpack, bpack)

    return out_t.T[:n]                            # (n, d_out)


def net_reference(x, params, layers):
    """Pure-JAX reference matching the PyTorch forward (torch-layout params)."""
    n_hidden = len(layers) - 2
    hi = jax.lax.Precision.HIGHEST
    x = x.astype(jnp.float32)
    for i in range(n_hidden):
        w0, b0 = params[4 * i], params[4 * i + 1]
        w1, b1 = params[4 * i + 2], params[4 * i + 3]
        h = jnp.sin(jnp.dot(x, w0.T, precision=hi) + b0)
        h = jnp.sin(jnp.dot(h, w1.T, precision=hi) + b1)
        eye = jnp.eye(x.shape[-1], layers[i + 1], dtype=x.dtype)
        x = h + jnp.dot(x, eye, precision=hi)
    return jnp.dot(x, params[-2].T, precision=hi) + params[-1]


if __name__ == "__main__":
    # Poisson PINN-style config: 2-D input points, 2 hidden blocks of width 32, scalar output.
    layers = [2, 32, 32, 1]
    batch = 256

    key = jax.random.PRNGKey(0)
    key, kx = jax.random.split(key)
    x = jax.random.uniform(kx, (batch, layers[0]), jnp.float32, -1.0, 1.0)

    params = init_params(layers, key)

    out = net_forward(x, params, layers)
    out = jax.block_until_ready(out)

    ref = net_reference(x, params, layers)
    assert out.shape == (batch, layers[-1])
    assert jnp.allclose(out, ref, atol=1e-4, rtol=1e-4), (
        float(jnp.max(jnp.abs(out - ref)))
    )
    print("KERNEL_OK")
</pallas_src>

<mosaic_0001>
module attributes {stable_mosaic.version = 11 : i64} {
  func.func @_net_kernel(%arg0: i32, %arg1: memref<2x128xf32, #tpu.memory_space<vmem>>, %arg2: memref<5x32x32xf32, #tpu.memory_space<vmem>>, %arg3: memref<5x32x1xf32, #tpu.memory_space<vmem>>, %arg4: memref<1x128xf32, #tpu.memory_space<vmem>>) attributes {dimension_semantics = [#tpu.dimension_semantics<parallel>], iteration_bounds = array<i64: 2>, scalar_prefetch = 0 : i64, scratch_operands = 0 : i64, tpu.core_type = #tpu.core_type<tc>, window_params = [{transform_indices = @transform_0, window_bounds = array<i64: 2, 128>}, {pipeline_mode = #tpu.pipeline_mode<synchronous>, transform_indices = @transform_1, window_bounds = array<i64: 5, 32, 32>}, {pipeline_mode = #tpu.pipeline_mode<synchronous>, transform_indices = @transform_2, window_bounds = array<i64: 5, 32, 1>}, {transform_indices = @transform_3, window_bounds = array<i64: 1, 128>}]} {
    %c0 = arith.constant 0 : index
    %c0_0 = arith.constant 0 : index
    %0 = vector.load %arg1[%c0, %c0_0] : memref<2x128xf32, #tpu.memory_space<vmem>>, vector<2x128xf32>
    %cst = arith.constant 0.000000e+00 : f32
    %1 = vector.broadcast %cst : f32 to vector<30x128xf32>
    %2 = tpu.concatenate %0, %1 in 0 : vector<2x128xf32>, vector<30x128xf32> -> vector<32x128xf32>
    %c0_1 = arith.constant 0 : index
    %c0_2 = arith.constant 0 : index
    %c0_3 = arith.constant 0 : index
    %3 = vector.load %arg2[%c0_1, %c0_2, %c0_3] : memref<5x32x32xf32, #tpu.memory_space<vmem>>, vector<1x32x32xf32>
    %4 = vector.shape_cast %3 : vector<1x32x32xf32> to vector<32x32xf32>
    %c0_4 = arith.constant 0 : index
    %c0_5 = arith.constant 0 : index
    %c0_6 = arith.constant 0 : index
    %5 = vector.load %arg3[%c0_4, %c0_5, %c0_6] : memref<5x32x1xf32, #tpu.memory_space<vmem>>, vector<1x32x1xf32>
    %6 = vector.shape_cast %5 : vector<1x32x1xf32> to vector<32x1xf32>
    %7 = vector.extract_strided_slice %4 {offsets = [0, 0], sizes = [32, 1], strides = [1, 1]} : vector<32x32xf32> to vector<32x1xf32>
    %8 = vector.extract_strided_slice %2 {offsets = [0, 0], sizes = [1, 128], strides = [1, 1]} : vector<32x128xf32> to vector<1x128xf32>
    %9 = vector.broadcast %7 : vector<32x1xf32> to vector<32x128xf32>
    %10 = vector.broadcast %8 : vector<1x128xf32> to vector<32x128xf32>
    %11 = arith.mulf %9, %10 : vector<32x128xf32>
    %12 = vector.broadcast %6 : vector<32x1xf32> to vector<32x128xf32>
    %13 = arith.addf %12, %11 : vector<32x128xf32>
    %14 = vector.extract_strided_slice %4 {offsets = [0, 1], sizes = [32, 1], strides = [1, 1]} : vector<32x32xf32> to vector<32x1xf32>
    %15 = vector.extract_strided_slice %2 {offsets = [1, 0], sizes = [1, 128], strides = [1, 1]} : vector<32x128xf32> to vector<1x128xf32>
    %16 = vector.broadcast %14 : vector<32x1xf32> to vector<32x128xf32>
    %17 = vector.broadcast %15 : vector<1x128xf32> to vector<32x128xf32>
    %18 = arith.mulf %16, %17 : vector<32x128xf32>
    %19 = arith.addf %13, %18 : vector<32x128xf32>
    %20 = math.sin %19 : vector<32x128xf32>
    %c1 = arith.constant 1 : index
    %c0_7 = arith.constant 0 : index
    %c0_8 = arith.constant 0 : index
    %21 = vector.load %arg2[%c1, %c0_7, %c0_8] : memref<5x32x32xf32, #tpu.memory_space<vmem>>, vector<1x32x32xf32>
    %22 = vector.shape_cast %21 : vector<1x32x32xf32> to vector<32x32xf32>
    %c1_9 = arith.constant 1 : index
    %c0_10 = arith.constant 0 : index
    %c0_11 = arith.constant 0 : index
    %23 = vector.load %arg3[%c1_9, %c0_10, %c0_11] : memref<5x32x1xf32, #tpu.memory_space<vmem>>, vector<1x32x1xf32>
    %24 = vector.shape_cast %23 : vector<1x32x1xf32> to vector<32x1xf32>
    %cst_12 = arith.constant dense<0.000000e+00> : vector<32x128xf32>
    %25 = tpu.matmul %22, %20, %cst_12 {dimension_numbers = #tpu.dot_dimension_numbers<[1], [0], [0], [1], [0, 0, 1, 1], [], []>, precision = #tpu.contract_precision<fp32>} : vector<32x32xf32>, vector<32x128xf32>, vector<32x128xf32> -> vector<32x128xf32>
    %26 = vector.broadcast %24 : vector<32x1xf32> to vector<32x128xf32>
    %27 = arith.addf %25, %26 : vector<32x128xf32>
    %28 = math.sin %27 : vector<32x128xf32>
    %29 = arith.addf %28, %2 : vector<32x128xf32>
    %c2 = arith.constant 2 : index
    %c0_13 = arith.constant 0 : index
    %c0_14 = arith.constant 0 : index
    %30 = vector.load %arg2[%c2, %c0_13, %c0_14] : memref<5x32x32xf32, #tpu.memory_space<vmem>>, vector<1x32x32xf32>
    %31 = vector.shape_cast %30 : vector<1x32x32xf32> to vector<32x32xf32>
    %c2_15 = arith.constant 2 : index
    %c0_16 = arith.constant 0 : index
    %c0_17 = arith.constant 0 : index
    %32 = vector.load %arg3[%c2_15, %c0_16, %c0_17] : memref<5x32x1xf32, #tpu.memory_space<vmem>>, vector<1x32x1xf32>
    %33 = vector.shape_cast %32 : vector<1x32x1xf32> to vector<32x1xf32>
    %cst_18 = arith.constant dense<0.000000e+00> : vector<32x128xf32>
    %34 = tpu.matmul %31, %29, %cst_18 {dimension_numbers = #tpu.dot_dimension_numbers<[1], [0], [0], [1], [0, 0, 1, 1], [], []>, precision = #tpu.contract_precision<fp32>} : vector<32x32xf32>, vector<32x128xf32>, vector<32x128xf32> -> vector<32x128xf32>
    %35 = vector.broadcast %33 : vector<32x1xf32> to vector<32x128xf32>
    %36 = arith.addf %34, %35 : vector<32x128xf32>
    %37 = math.sin %36 : vector<32x128xf32>
    %c3 = arith.constant 3 : index
    %c0_19 = arith.constant 0 : index
    %c0_20 = arith.constant 0 : index
    %38 = vector.load %arg2[%c3, %c0_19, %c0_20] : memref<5x32x32xf32, #tpu.memory_space<vmem>>, vector<1x32x32xf32>
    %39 = vector.shape_cast %38 : vector<1x32x32xf32> to vector<32x32xf32>
    %c3_21 = arith.constant 3 : index
    %c0_22 = arith.constant 0 : index
    %c0_23 = arith.constant 0 : index
    %40 = vector.load %arg3[%c3_21, %c0_22, %c0_23] : memref<5x32x1xf32, #tpu.memory_space<vmem>>, vector<1x32x1xf32>
    %41 = vector.shape_cast %40 : vector<1x32x1xf32> to vector<32x1xf32>
    %cst_24 = arith.constant dense<0.000000e+00> : vector<32x128xf32>
    %42 = tpu.matmul %39, %37, %cst_24 {dimension_numbers = #tpu.dot_dimension_numbers<[1], [0], [0], [1], [0, 0, 1, 1], [], []>, precision = #tpu.contract_precision<fp32>} : vector<32x32xf32>, vector<32x128xf32>, vector<32x128xf32> -> vector<32x128xf32>
    %43 = vector.broadcast %41 : vector<32x1xf32> to vector<32x128xf32>
    %44 = arith.addf %42, %43 : vector<32x128xf32>
    %45 = math.sin %44 : vector<32x128xf32>
    %46 = arith.addf %45, %29 : vector<32x128xf32>
    %c4 = arith.constant 4 : index
    %c0_25 = arith.constant 0 : index
    %c0_26 = arith.constant 0 : index
    %47 = vector.load %arg2[%c4, %c0_25, %c0_26] : memref<5x32x32xf32, #tpu.memory_space<vmem>>, vector<1x32x32xf32>
    %48 = vector.shape_cast %47 : vector<1x32x32xf32> to vector<32x32xf32>
    %c4_27 = arith.constant 4 : index
    %c0_28 = arith.constant 0 : index
    %c0_29 = arith.constant 0 : index
    %49 = vector.load %arg3[%c4_27, %c0_28, %c0_29] : memref<5x32x1xf32, #tpu.memory_space<vmem>>, vector<1x32x1xf32>
    %50 = vector.shape_cast %49 : vector<1x32x1xf32> to vector<32x1xf32>
    %cst_30 = arith.constant dense<0.000000e+00> : vector<32x128xf32>
    %51 = tpu.matmul %48, %46, %cst_30 {dimension_numbers = #tpu.dot_dimension_numbers<[1], [0], [0], [1], [0, 0, 1, 1], [], []>, precision = #tpu.contract_precision<fp32>} : vector<32x32xf32>, vector<32x128xf32>, vector<32x128xf32> -> vector<32x128xf32>
    %52 = vector.broadcast %50 : vector<32x1xf32> to vector<32x128xf32>
    %53 = arith.addf %51, %52 : vector<32x128xf32>
    %54 = vector.extract_strided_slice %53 {offsets = [0, 0], sizes = [1, 128], strides = [1, 1]} : vector<32x128xf32> to vector<1x128xf32>
    %c0_31 = arith.constant 0 : index
    %c0_32 = arith.constant 0 : index
    %55 = vector.load %arg4[%c0_31, %c0_32] : memref<1x128xf32, #tpu.memory_space<vmem>>, vector<1x128xf32>
    tpu.vector_store %arg4[%c0_31, %c0_32], %54 {strides = array<i32>} : memref<1x128xf32, #tpu.memory_space<vmem>>, vector<1x128xf32>,
    return
  }
  func.func @transform_0(%arg0: i32) -> (i32, i32) {
    %c0_i32 = arith.constant 0 : i32
    %c0_i32_0 = arith.constant 0 : i32
    return %c0_i32, %arg0 : i32, i32
  }
  func.func @transform_1(%arg0: i32) -> (i32, i32, i32) {
    %c0_i32 = arith.constant 0 : i32
    %c0_i32_0 = arith.constant 0 : i32
    %c0_i32_1 = arith.constant 0 : i32
    %c0_i32_2 = arith.constant 0 : i32
    return %c0_i32, %c0_i32_0, %c0_i32_1 : i32, i32, i32
  }
  func.func @transform_2(%arg0: i32) -> (i32, i32, i32) {
    %c0_i32 = arith.constant 0 : i32
    %c0_i32_0 = arith.constant 0 : i32
    %c0_i32_1 = arith.constant 0 : i32
    %c0_i32_2 = arith.constant 0 : i32
    return %c0_i32, %c0_i32_0, %c0_i32_1 : i32, i32, i32
  }
  func.func @transform_3(%arg0: i32) -> (i32, i32) {
    %c0_i32 = arith.constant 0 : i32
    %c0_i32_0 = arith.constant 0 : i32
    return %c0_i32, %arg0 : i32, i32
  }
}

</mosaic_0001>

<bundles_post_ra>
// kernel: tpu_custom_call.1
= control target key start
LH: loop header
LB: loop body
LE: loop exit
PB: predicated region body
PF: predicated region fallthrough
CT: control target
= control target key end

     0   :  { %8 = vsyncpa [#allocation3], 0  ;;  %s7572_s0 = inlined_call_operand.vmem [shape: f32[2,256], index: 0, kind: input, shape index: {}]   ;;  %s7573_s1 = inlined_call_operand.vmem [shape: f32[5,32,32], index: 1, kind: input, shape index: {}]   ;;  %s7574_s2 = inlined_call_operand.vmem [shape: f32[5,32,1], index: 2, kind: input, shape index: {}]   ;;  %s7575_s3 = inlined_call_operand.hbm [shape: f32[1,256], index: 3, kind: output, shape index: {}]  }
   0x1   :  { %10 = vsyncpa [#allocation3 + $0x1], 0  ;;  %s5784_s12 = smov 0   ;;  %s5786_s13 = smov 0  }
   0x2   :  { %s5788_s14 = smov 0   ;;  %s5790_s15 = smov 0  }
   0x3 LB: > { %s5805_s16 = sadd.s32 4294967295, %s5753_s15   ;;  %s4601_s17 = sadd.s32 4294967294, %s5753_s15   ;;  %s5753_s15 = sphi %s5790_s15, %s7611_s15   ;;  %s5749_s14 = sphi %s5788_s14, %s7610_s14   ;;  %s5745_s13 = sphi %s5786_s13, %s7609_s13   ;;  %s5741_s12 = sphi %s5784_s12, %s7608_s12  }
   0x4   : > { %s5809_s18 = sadd.s32 1, %s5753_s15   ;;  %s91_s19 = sadd.s32 1, %s5749_s14 }
   0x5   : > { %s88_s20 = ssub.s32 %s5753_s15, %s5809_s18  ;;  %p101_p0 = scmp.ne.s32.totalorder %s5749_s14, %s5745_s13 }
   0x6   : > { %p89_p1 = scmp.eq.s32.totalorder %s88_s20, 0  ;;  %p102_p2 = scmp.eq.s32.totalorder %s5805_s16, 1 }
   0x7   : > { %p107_p3 = scmp.ne.s32.totalorder %s5745_s13, %s5741_s12  ;;  %p108_p4 = scmp.eq.s32.totalorder %s4601_s17, 1 }
   0x8   : > { %s5820_s21 = scalar_select %p89_p1, %s5749_s14, %s91_s19  }
   0x9   : > { %p5822_p5 = por %p102_p2, %p101_p0  ;;  %p5826_p6 = por %p108_p4, %p107_p3 }
   0xa   : > { %p4604_p7 = scmp.ge.s32.totalorder %s5753_s15, 1  ;;  %p139_p8 = scmp.lt.s32.totalorder %s5753_s15, 3 }
   0xc   : > { %p140_p9 = pnand %p4604_p7, %p139_p8 }
   0xd   : > { %v172_v0 = vld [vmem:[%s7574_s2] sm:$0xff] (!%p140_p9)  ;;  %v5755_v2 = vmov (!%p140_p9), 0   ;;  %v173_v3 = vld [vmem:[%s7574_s2 + $0x8] sm:$0xff] (!%p140_p9)  ;;  %v171_v5 = vld [vmem:[%s7573_s1 + $0x18] sm:$0xff] (!%p140_p9)  ;;  %v5756_v6 = vmov (!%p140_p9), 1   ;;  %p161_p10 = scmp.lt.s32.totalorder (!%p140_p9), %s5805_s16, 1  ;;  %v196_v10 = vlaneseq (!%p140_p9) }
   0xe   : > { %143 = sbr.rel (%p140_p9) target bundleno = 1783 (0x6f7), region = 32  ;;  %v168_v1 = vld [vmem:[%s7573_s1] sm:$0xff] (!%p140_p9)  ;;  %5620 = vset.pattern.permute.xlu1 (!%p140_p9), %v5755_v2  ;;  %5619 = vset.pattern.permute.xlu0 (!%p140_p9), %v5755_v2  ;;  %v169_v4 = vld [vmem:[%s7573_s1 + $0x8] sm:$0xff] (!%p140_p9)  ;;  %v170_v7 = vld [vmem:[%s7573_s1 + $0x10] sm:$0xff] (!%p140_p9)  ;;  %vm166_vm0 = vcmask (!%p140_p9), 1041408   ;;  %vm702_vm15 = vcmask (!%p140_p9), 261120  }
   0xf   : > { %206 = vperm.xlu1 (!%p140_p9), %5620, %v172_v0   ;;  %178 = vperm.xlu0 (!%p140_p9), %5619, %v168_v1   ;;  %v174_v8 = vld [vmem:[%s7574_s2 + $0x10] sm:$0xff] (!%p140_p9)  ;;  %v175_v9 = vld [vmem:[%s7574_s2 + $0x18] sm:$0xff] (!%p140_p9)  ;;  %v197_v11 = vshrl.u32 (!%p140_p9), %v196_v10, 7  ;;  %v5757_v58 = vmov (!%p140_p9), 683565275   ;;  %s159_s4 = sand.u32 (!%p140_p9), 1, %s5745_s13  }
  0x10   : > { %v5758_v60 = vmov (!%p140_p9), 2475754826   ;;  %v5759_v63 = vmov (!%p140_p9), 2131351028   ;;  %v5762_v10 = vmov (!%p140_p9), 1326507024  }
  0x11   : > { %v198_v14 = vsub.s32 (!%p140_p9), 0, %v197_v11  ;;  %v246_v17 = vsub.s32 (!%p140_p9), 1, %v197_v11  ;;  %s4702_s5 = sshll.u32 (!%p140_p9), %s5805_s16, 4  ;;  %s160_s6 = scalar_lea.vmem (!%p140_p9), [#allocation2], %s159_s4 }
  0x12   : > { %s4546_s7 = sshll.u32 (!%p140_p9), %s160_s6, 4  ;;  %s7530_s10 = scalar_lea.hbm (!%p140_p9), %s7575_s3, %s4702_s5  ;;  %s7532_s7 = int_to_ptr.vmem [resolvable:$true] %s4546_s7 }
  0x13   : > { %211 = vperm.xlu1 (!%p140_p9), %5620, %v173_v3   ;;  %183 = vperm.xlu0 (!%p140_p9), %5619, %v169_v4   ;;  %v5761_v3 = vmov (!%p140_p9), 920167782   ;;  %s5691_s11 = scalar_lea.vmem (!%p140_p9), %s7532_s7, 16  ;;  %s5763_s17 = smov (!%p140_p9), [#allocation2]  }
  0x14   : > { %p5692_p11 = scmp.ne.s32.totalorder (!%p140_p9), %s7532_s7, %s5691_s11 }
  0x15   : > { %s162_s19 = scalar_select %p161_p10, %s5805_s16, 1 }
  0x16   : > { %s4534_s16 = scalar_lea.sflag [#allocation3], %s159_s4  ;;  %p5693_p12 = pnand %p5692_p11, %p5822_p5 }
  0x17   : > { %5621 = vset.pattern.permute.xlu1 %v5756_v6  ;;  %193 = vperm.xlu0 %5619, %v171_v5   ;;  %s4605_s20 = sshll.u32 %s162_s19, 1  ;;  %s5695_s19 = sshll.u32 %s5763_s17, 4  ;;  %s5696_s19 = int_to_ptr.vmem [resolvable:$false] %s5695_s19 }
  0x18   : > { %233 = vperm.xlu1 %5621, %v169_v4   ;;  %s164_s26 = scalar_lea.vmem %s7572_s0, %s4605_s20  ;;  %p5694_p13 = pneg %p5693_p12 }
  0x19   : > { %v165_v12 = vld [vmem:[%s164_s26] sm:$0x3]  ;;  %s5697_s20 = scalar_lea.vmem %s5696_s19, 32  ;;  %p5698_p0 = scmp.lt.s32.totalorder %s7532_s7, %s5696_s19 }
  0x1a   : > { %v5861_v16 = vsel %vm166_vm0, %v165_v12, 0.0  ;;  %p5699_p1 = scmp.lt.s32.totalorder %s5697_s20, %s5691_s11 }
  0x1b   : > { %5623 = vset.pattern.permute.xlu0 %v5756_v6  ;;  %v5864_v18 = vrot.slane %v5861_v16, %v198_v14  ;;  %v5868_v22 = vrot.slane %v5861_v16, %v246_v17 }
  0x1c   : > { %5622 = vset.pattern.permute.xlu1 %v5755_v2  ;;  %229 = vperm.xlu0 %5623, %v168_v1   ;;  %v5760_v1 = vmov 2102212464   ;;  %p5700_p2 = por %p5699_p1, %p5698_p0 }
  0x1d   : > { %188 = vperm.xlu1 %5622, %v170_v7  }
  0x1e   : > { %p5701_p3 = pnand %p5700_p2, %p5694_p13 }
  0x20   : > { %237 = vperm.xlu0 %5623, %v170_v7  }
  0x21   : > { %216 = vperm.xlu1 %5622, %v174_v8  }
  0x24   : > { %5626 = vset.pattern.permute.xlu0 %v5755_v2 }
  0x25   : > { %221 = vperm.xlu1 %5622, %v175_v9  }
  0x29   : > { %5624 = vset.pattern.permute.xlu1 %v5756_v6 }
  0x2a   : > { %241 = vperm.xlu1 %5624, %v171_v5  }
  0x2e   : > { %5625 = vset.pattern.permute.xlu1 %v5755_v2 }
  0x8e   : > { %v207_v13 = vpop.permute.xlu1 %206  ;;  %v179_v15 = vpop.permute.xlu0 %178 }
  0x8f   : > { %v200_v27 = vmul.f32 %v5864_v18, %v179_v15 }
  0x91   : > { %v224_v33 = vadd.f32 %v207_v13, %v200_v27 }
  0x92   : > { %v212_v19 = vpop.permute.xlu1 %211  ;;  %v184_v20 = vpop.permute.xlu0 %183 }
  0x93   : > { %v201_v21 = vmul.f32 %v5864_v18, %v184_v20 }
  0x95   : > { %v225_v25 = vadd.f32 %v212_v19, %v201_v21 }
  0x96   : > { %v5870_v23 = vpop.permute.xlu0 %193 }
  0x97   : > { %v234_v24 = vpop.permute.xlu1 %233 }
  0x98   : > { %v249_v26 = vmul.f32 %v5868_v22, %v234_v24 }
  0x9a   : > { %v5874_v28 = vadd.f32 %v249_v26, %v225_v25 }
  0x9b   : > { %v230_v29 = vpop.permute.xlu0 %229 }
  0x9c   : > { %v360_v30 = vand.u32 2147483647, %v5874_v28  ;;  %v363_v31 = vand.u32 2139095040, %v5874_v28  ;;  %v189_v32 = vpop.permute.xlu1 %188  ;;  %v248_v34 = vmul.f32 %v5868_v22, %v230_v29  ;;  %vm362_vm14 = vcmp.lt.s32.totalorder %v5874_v28, 0 }
  0x9d   : > { %v202_v43 = vmul.f32 %v5864_v18, %v189_v32 }
  0x9e   : > { %v364_v35 = vshrl.u32 %v363_v31, 23  ;;  %v367_v36 = vand.u32 8388607, %v360_v30  ;;  %v5881_v37 = vadd.f32 %v248_v34, %v224_v33 }
  0x9f   : > { %v238_v40 = vpop.permute.xlu0 %237 }
  0xa0   : > { %v4610_v38 = vadd.s32 4294967169, %v364_v35  ;;  %v217_v39 = vpop.permute.xlu1 %216  ;;  %v256_v41 = vand.u32 2147483647, %v5881_v37  ;;  %v259_v42 = vand.u32 2139095040, %v5881_v37  ;;  %v368_v44 = vor.u32 8388608, %v367_v36 }
  0xa1   : > { %v226_v48 = vadd.f32 %v217_v39, %v202_v43  ;;  %v250_v49 = vmul.f32 %v5868_v22, %v238_v40 }
  0xa2   : > { %v370_v45 = vadd.s32 1, %v4610_v38  ;;  %v260_v46 = vshrl.u32 %v259_v42, 23  ;;  %v263_v47 = vand.u32 8388607, %v256_v41  ;;  %v5889_v54 = vshll.u32 %v368_v44, 8 }
  0xa3   : > { %v5891_v56 = vadd.f32 %v250_v49, %v226_v48 }
  0xa4   : > { %vm371_vm1 = vcmp.gt.s32.totalorder %v370_v45, 0  ;;  %v4606_v51 = vadd.s32 4294967169, %v260_v46  ;;  %v264_v55 = vor.u32 8388608, %v263_v47 }
  0xa5   : > { %v372_v50 = vsel %vm371_vm1, %v370_v45, 0  ;;  %v467_v47 = vand.u32 2139095040, %v5891_v56 }
  0xa6   : > { %v373_v52 = vshrl.u32 %v372_v50, 5  ;;  %v374_v53 = vand.u32 31, %v372_v50  ;;  %v266_v62 = vadd.s32 1, %v4606_v51  ;;  %v5913_v39 = vshll.u32 %v264_v55, 8 }
  0xa8   : > { %v375_v57 = vsub.s32 32, %v374_v53  ;;  %v377_v59 = vshll.u32 %v5757_v58, %v374_v53  ;;  %v380_v61 = vshll.u32 %v5758_v60, %v374_v53  ;;  %v383_v0 = vshll.u32 %v5759_v63, %v374_v53 }
  0xa9   : > { %v386_v2 = vshll.u32 %v5760_v1, %v374_v53  ;;  %v389_v4 = vshll.u32 %v5761_v3, %v374_v53  ;;  %vm392_vm2 = vcmp.lt.s32.totalorder %v373_v52, 1  ;;  %vm393_vm3 = vcmp.lt.s32.totalorder %v373_v52, 2 }
  0xaa   : > { %v378_v5 = vshrl.u32 %v5758_v60, %v375_v57  ;;  %v381_v6 = vshrl.u32 %v5759_v63, %v375_v57  ;;  %v384_v7 = vshrl.u32 %v5760_v1, %v375_v57  ;;  %v376_v8 = vshrl.u32 %v5757_v58, %v375_v57 }
  0xab   : > { %v387_v9 = vshrl.u32 %v5761_v3, %v375_v57  ;;  %v390_v11 = vshrl.u32 %v5762_v10, %v375_v57  ;;  %vm394_vm4 = vcmp.lt.s32.totalorder %v373_v52, 3  ;;  %vm267_vm5 = vcmp.gt.s32.totalorder %v266_v62, 0 }
  0xac   : > { %v379_v12 = vor.u32 %v378_v5, %v377_v59  ;;  %v382_v13 = vor.u32 %v381_v6, %v380_v61  ;;  %v385_v14 = vor.u32 %v384_v7, %v383_v0  ;;  %vm395_vm6 = vcmp.lt.s32.totalorder %v373_v52, 4 }
  0xad   : > { %v388_v15 = vor.u32 %v387_v9, %v386_v2  ;;  %v391_v17 = vor.u32 %v390_v11, %v389_v4  ;;  %v268_v19 = vsel %vm267_vm5, %v266_v62, 0  ;;  %v468_v6 = vshrl.u32 %v467_v47, 23 }
  0xae   : > { %v396_v20 = vsel %vm392_vm2, %v376_v8, %v379_v12  ;;  %v397_v21 = vsel %vm395_vm6, %v385_v14, 2102212464  ;;  %v400_v24 = vsel %vm392_vm2, %v379_v12, %v382_v13  ;;  %v404_v25 = vsel %vm392_vm2, %v382_v13, %v385_v14 }
  0xaf   : > { %v398_v26 = vsel %vm394_vm4, %v382_v13, %v397_v21  ;;  %v401_v27 = vsel %vm395_vm6, %v388_v15, 920167782  ;;  %v405_v29 = vsel %vm395_vm6, %v391_v17, 1326507024  ;;  %v269_v31 = vshrl.u32 %v268_v19, 5 }
  0xb0   : > { %v399_v32 = vsel %vm393_vm3, %v396_v20, %v398_v26  ;;  %v402_v33 = vsel %vm394_vm4, %v385_v14, %v401_v27  ;;  %v406_v34 = vsel %vm394_vm4, %v388_v15, %v405_v29  ;;  %v270_v35 = vand.u32 31, %v268_v19 }
  0xb1   : > { %v403_v36 = vsel %vm393_vm3, %v400_v24, %v402_v33  ;;  %v407_v38 = vsel %vm393_vm3, %v404_v25, %v406_v34  ;;  %v415_v45 = vmul.u32 %v5889_v54, %v399_v32  ;;  %vm288_vm7 = vcmp.lt.s32.totalorder %v269_v31, 1 }
  0xb2   : > { %v5916_v40 = vmul.u32.u64.low %v5889_v54, %v407_v38  ;;  %v5917_v42 = vmul.u32.u64.high %v5889_v54, %v407_v38, %v5916_v40  ;;  %v5920_v43 = vmul.u32.u64.low %v5889_v54, %v403_v36  ;;  %v5921_v44 = vmul.u32.u64.high %v5889_v54, %v403_v36, %v5920_v43  ;;  %v222_v38 = vpop.permute.xlu1 %221 }
  0xb3   : > { %v271_v46 = vsub.s32 32, %v270_v35  ;;  %v273_v48 = vshll.u32 %v5757_v58, %v270_v35  ;;  %v276_v49 = vshll.u32 %v5758_v60, %v270_v35  ;;  %v279_v50 = vshll.u32 %v5759_v63, %v270_v35 }
  0xb4   : > { %v282_v51 = vshll.u32 %v5760_v1, %v270_v35  ;;  %v285_v54 = vshll.u32 %v5761_v3, %v270_v35  ;;  %vm417_vm8 = vc.u32 %v5917_v42, %v5920_v43  ;;  %v418_v57 = vadd.s32 1, %v5921_v44 }
  0xb5   : > { %v274_v52 = vshrl.u32 %v5758_v60, %v271_v46  ;;  %v277_v53 = vshrl.u32 %v5759_v63, %v271_v46  ;;  %v280_v55 = vshrl.u32 %v5760_v1, %v271_v46  ;;  %v283_v59 = vshrl.u32 %v5761_v3, %v271_v46 }
  0xb6   : > { %vm289_vm9 = vcmp.lt.s32.totalorder %v269_v31, 2  ;;  %v286_v2 = vshrl.u32 %v5762_v10, %v271_v46  ;;  %v419_v4 = vsel %vm417_vm8, %v418_v57, %v5921_v44  ;;  %vm291_vm10 = vcmp.lt.s32.totalorder %v269_v31, 4 }
  0xb7   : > { %v275_v61 = vor.u32 %v274_v52, %v273_v48  ;;  %v278_v62 = vor.u32 %v277_v53, %v276_v49  ;;  %v281_v0 = vor.u32 %v280_v55, %v279_v50  ;;  %v284_v5 = vor.u32 %v283_v59, %v282_v51  ;;  %v242_v55 = vpop.permute.xlu1 %241 }
  0xb8   : > { %v420_v7 = vadd.s32 %v419_v4, %v415_v45  ;;  %v272_v8 = vshrl.u32 %v5757_v58, %v271_v46  ;;  %v287_v9 = vor.u32 %v286_v2, %v285_v54  ;;  %vm290_vm11 = vcmp.lt.s32.totalorder %v269_v31, 3 }
  0xb9   : > { %v293_v11 = vsel %vm291_vm10, %v281_v0, 2102212464  ;;  %v296_v12 = vsel %vm288_vm7, %v275_v61, %v278_v62  ;;  %v297_v13 = vsel %vm291_vm10, %v284_v5, 920167782  ;;  %v300_v14 = vsel %vm288_vm7, %v278_v62, %v281_v0 }
  0xba   : > { %v421_v15 = vadd.s32 536870912, %v420_v7  ;;  %v292_v17 = vsel %vm288_vm7, %v272_v8, %v275_v61  ;;  %v298_v19 = vsel %vm290_vm11, %v281_v0, %v297_v13  ;;  %v301_v20 = vsel %vm291_vm10, %v287_v9, 1326507024 }
  0xbb   : > { %v294_v21 = vsel %vm290_vm11, %v278_v62, %v293_v11  ;;  %v299_v24 = vsel %vm289_vm9, %v296_v12, %v298_v19  ;;  %v302_v25 = vsel %vm290_vm11, %v284_v5, %v301_v20  ;;  %v4614_v26 = vadd.s32 4294967169, %v468_v6 }
  0xbc   : > { %v5945_v27 = vshrl.u32 %v421_v15, 30  ;;  %v303_v29 = vsel %vm289_vm9, %v300_v14, %v302_v25  ;;  %v5949_v32 = vmul.u32.u64.low %v5913_v39, %v299_v24  ;;  %v5950_v33 = vmul.u32.u64.high %v5913_v39, %v299_v24, %v5949_v32 }
  0xbd   : > { %v5954_v34 = vmul.u32.u64.low %v5913_v39, %v303_v29  ;;  %v5955_v35 = vmul.u32.u64.high %v5913_v39, %v303_v29, %v5954_v34  ;;  %v474_v36 = vadd.s32 1, %v4614_v26  ;;  %v295_v44 = vsel %vm289_vm9, %v292_v17, %v294_v21 }
  0xbe   : > { %v423_v40 = vshll.u32 %v5945_v27, 30  ;;  %v314_v46 = vadd.s32 1, %v5950_v33  ;;  %v311_v48 = vmul.u32 %v5913_v39, %v295_v44  ;;  %v464_v49 = vand.u32 2147483647, %v5891_v56  ;;  %v4622_v44 = vld [vmem:[%s7573_s1 + $0x20] sm:$0xff] }
  0xbf   : > { %vm475_vm12 = vcmp.gt.s32.totalorder %v474_v36, 0  ;;  %vm313_vm13 = vc.u32 %v5955_v35, %v5949_v32  ;;  %v203_v31 = vmul.f32 %v5864_v18, %v5870_v23  ;;  %v416_v59 = vadd.s32 %v5920_v43, %v5917_v42 }
  0xc0   : > { %v424_v45 = vsub.s32 %v420_v7, %v423_v40  ;;  %v476_v47 = vsel %vm475_vm12, %v474_v36, 0  ;;  %v315_v51 = vsel %vm313_vm13, %v314_v46, %v5950_v33  ;;  %v471_v61 = vand.u32 8388607, %v464_v49 }
  0xc1   : > { %v478_v52 = vand.u32 31, %v476_v47  ;;  %v316_v53 = vadd.s32 %v315_v51, %v311_v48  ;;  %v5971_v62 = vadd.f32 %v222_v38, %v203_v31  ;;  %v446_v2 = vsub.s32 4, %v5945_v27 }
  0xc2   : > { %v426_v50 = vsub.s32 0, %v424_v45  ;;  %v5974_v4 = vshrl.u32 %v476_v47, 5  ;;  %v251_v18 = vmul.f32 %v5868_v22, %v242_v55  ;;  %v472_v22 = vor.u32 8388608, %v471_v61 }
  0xc3   : > { %v479_v57 = vsub.s32 32, %v478_v52  ;;  %v317_v39 = vadd.s32 536870912, %v316_v53  ;;  %v481_v5 = vshll.u32 %v5757_v58, %v478_v52  ;;  %v484_v7 = vshll.u32 %v5758_v60, %v478_v52 }
  0xc4   : > { %v4611_v54 = vmin.u32 %v426_v50, %v424_v45  ;;  %v490_v12 = vshll.u32 %v5760_v1, %v478_v52  ;;  %v487_v15 = vshll.u32 %v5759_v63, %v478_v52  ;;  %vm496_vm1 = vcmp.lt.s32.totalorder %v5974_v4, 1 }
  0xc5   : > { %v5977_v23 = vshrl.u32 %v317_v39, 30  ;;  %v482_v6 = vshrl.u32 %v5758_v60, %v479_v57  ;;  %v485_v42 = vshrl.u32 %v5759_v63, %v479_v57  ;;  %v488_v8 = vshrl.u32 %v5760_v1, %v479_v57 }
  0xc6   : > { %v428_v0 = vclz %v4611_v54  ;;  %v491_v9 = vshrl.u32 %v5761_v3, %v479_v57  ;;  %v494_v21 = vshrl.u32 %v5762_v10, %v479_v57  ;;  %v480_v33 = vshrl.u32 %v5757_v58, %v479_v57 }
  0xc7   : > { %v319_v11 = vshll.u32 %v5977_v23, 30  ;;  %v483_v13 = vor.u32 %v482_v6, %v481_v5  ;;  %v486_v14 = vor.u32 %v485_v42, %v484_v7  ;;  %v489_v26 = vor.u32 %v488_v8, %v487_v15 }
  0xc8   : > { %v4612_v43 = vadd.s32 4294967294, %v428_v0  ;;  %v492_v20 = vor.u32 %v491_v9, %v490_v12  ;;  %v493_v34 = vshll.u32 %v5761_v3, %v478_v52  ;;  %vm498_vm2 = vcmp.lt.s32.totalorder %v5974_v4, 3 }
  0xc9   : > { %v5989_v19 = vsub.s32 %v316_v53, %v319_v11  ;;  %vm499_vm3 = vcmp.lt.s32.totalorder %v5974_v4, 4  ;;  %v504_v48 = vsel %vm496_vm1, %v483_v13, %v486_v14  ;;  %v447_v53 = vsel %vm362_vm14, %v446_v2, %v5945_v27 }
  0xca   : > { %vm4613_vm0 = vcmp.lt.s32.totalorder %v4612_v43, 0  ;;  %v495_v47 = vor.u32 %v494_v21, %v493_v34  ;;  %v505_v50 = vsel %vm499_vm3, %v492_v20, 920167782  ;;  %vm497_vm4 = vcmp.lt.s32.totalorder %v5974_v4, 2 }
  0xcb   : > { %v431_v17 = vsel %vm4613_vm0, 0, %v4612_v43  ;;  %v322_v29 = vsub.s32 0, %v5989_v19  ;;  %v506_v31 = vsel %vm498_vm2, %v489_v26, %v505_v50  ;;  %v704_v54 = vsel %vm702_vm15, %v4622_v44, 0 }
  0xcc   : > { %v432_v24 = vsub.s32 32, %v431_v17  ;;  %v436_v25 = vsub.s32 4294967266, %v431_v17  ;;  %v433_v36 = vshll.u32 %v424_v45, %v431_v17  ;;  %v501_v45 = vsel %vm499_vm3, %v489_v26, 2102212464 }
  0xcd   : > { %v4607_v46 = vmin.u32 %v322_v29, %v5989_v19  ;;  %vm6017_vm5 = vcmp.le.f32.partialorder %v360_v30, 0.7853982  ;;  %v500_v39 = vsel %vm496_vm1, %v480_v33, %v483_v13  ;;  %v507_v61 = vsel %vm497_vm4, %v504_v48, %v506_v31 }
  0xce   : > { %v434_v38 = vshrl.u32 %v416_v59, %v432_v24  ;;  %v437_v40 = vadd.s32 127, %v436_v25  ;;  %v508_v27 = vsel %vm496_vm1, %v486_v14, %v489_v26  ;;  %v502_v2 = vsel %vm498_vm2, %v486_v14, %v501_v45 }
  0xcf   : > { %v324_v55 = vclz %v4607_v46  ;;  %v509_v30 = vsel %vm499_vm3, %v495_v47, 1326507024  ;;  %v512_v5 = vshll.u32 %v472_v22, 8  ;;  %v6034_v7 = vadd.f32 %v251_v18, %v5971_v62 }
  0xd0   : > { %v435_v51 = vor.u32 %v434_v38, %v433_v36  ;;  %v438_v52 = vshll.u32 %v437_v40, 23  ;;  %v510_v43 = vsel %vm498_vm2, %v492_v20, %v509_v30  ;;  %v312_v15 = vadd.s32 %v5949_v32, %v5955_v35 }
  0xd1   : > { %v4608_v0 = vadd.s32 4294967294, %v324_v55  ;;  %v511_v8 = vsel %vm497_vm4, %v508_v27, %v510_v43  ;;  %v6038_v9 = vmul.u32.u64.low %v512_v5, %v507_v61  ;;  %v6039_v11 = vmul.u32.u64.high %v512_v5, %v507_v61, %v6038_v9 }
  0xd2   : > { %v439_v59 = vor.u32 4788187, %v438_v52  ;;  %v442_v42 = vcvt.s32.f32 %v435_v51  ;;  %v6042_v14 = vmul.u32.u64.low %v512_v5, %v511_v8  ;;  %v6043_v22 = vmul.u32.u64.high %v512_v5, %v511_v8, %v6042_v14 }
  0xd3   : > { %vm4609_vm6 = vcmp.lt.s32.totalorder %v4608_v0, 0  ;;  %v503_v62 = vsel %vm497_vm4, %v500_v39, %v502_v2  ;;  %v342_v21 = vsub.s32 4, %v5977_v23  ;;  %v571_v24 = vand.u32 2139095040, %v6034_v7 }
  0xd4   : > { %v440_v6 = vand.u32 2147483647, %v439_v59  ;;  %v327_v13 = vsel %vm4609_vm6, 0, %v4608_v0  ;;  %v6051_v25 = vand.u32 4294901760, %v704_v54  ;;  %v522_v34 = vadd.s32 1, %v6039_v11 }
  0xd5   : > { %v328_v17 = vsub.s32 32, %v327_v13  ;;  %v332_v20 = vsub.s32 4294967266, %v327_v13  ;;  %v329_v26 = vshll.u32 %v5989_v19, %v327_v13  ;;  %vm258_vm7 = vcmp.lt.s32.totalorder %v5881_v37, 0 }
  0xd6   : > { %v443_v12 = vmul.f32 %v442_v42, %v440_v6  ;;  %v519_v35 = vmul.u32 %v512_v5, %v503_v62  ;;  %vm521_vm8 = vc.u32 %v6043_v22, %v6038_v9  ;;  %v449_v40 = vsel %vm6017_vm5, 0, %v447_v53 }
  0xd7   : > { %v330_v29 = vshrl.u32 %v312_v15, %v328_v17  ;;  %v333_v33 = vadd.s32 127, %v332_v20  ;;  %v523_v19 = vsel %vm521_vm8, %v522_v34, %v6039_v11  ;;  %v572_v46 = vshrl.u32 %v571_v24, 23 }
  0xd8   : > { %v444_v18 = vxor.u32 2147483648, %v443_v12  ;;  %v524_v44 = vadd.s32 %v523_v19, %v519_v35  ;;  %v343_v48 = vsel %vm258_vm7, %v342_v21, %v5977_v23  ;;  %v6070_v50 = vsub.f32 %v704_v54, %v6051_v25 }
  0xd9   : > { %v331_v36 = vor.u32 %v330_v29, %v329_v26  ;;  %v334_v38 = vshll.u32 %v333_v33, 23  ;;  %v4618_v52 = vadd.s32 4294967169, %v572_v46  ;;  %vm6074_vm9 = vcmp.le.f32.partialorder %v256_v41, 0.7853982  ;;  %v4627_v26 = vld [vmem:[%s7574_s2 + $0x28] sm:$0xff]  ;;  %v4628_v33 = vld [vmem:[%s7574_s2 + $0x30] sm:$0xff] }
  0xda   : > { %v445_v32 = vsel %vm362_vm14, %v444_v18, %v443_v12  ;;  %v525_v51 = vadd.s32 536870912, %v524_v44  ;;  %v786_v55 = vand.u32 4294901760, %v6070_v50  ;;  %v453_v57 = vadd.s32 3, %v449_v40  ;;  %v4626_v18 = vld [vmem:[%s7574_s2 + $0x20] sm:$0xff]  ;;  %689 = vperm.xlu0 %5626, %v4627_v26  }
  0xdb   : > { %v448_v4 = vsel %vm6017_vm5, %v5874_v28, %v445_v32  ;;  %v335_v47 = vor.u32 4788187, %v334_v38  ;;  %v338_v53 = vcvt.s32.f32 %v331_v36  ;;  %v345_v59 = vsel %vm6074_vm9, 0, %v343_v48  ;;  %684 = vperm.xlu1 %5625, %v4626_v18  }
  0xdc   : > { %5627 = vcosq.f32 %v448_v4  ;;  %v6081_v23 = vshrl.u32 %v525_v51, 30  ;;  %v578_v54 = vadd.s32 1, %v4618_v52  ;;  %v787_v61 = vsub.f32 %v6070_v50, %v786_v55 }
  0xdd   : > { %5629 = vsinq.f32 %v448_v4  ;;  %v336_v31 = vand.u32 2147483647, %v335_v47  ;;  %v568_v27 = vand.u32 2147483647, %v6034_v7  ;;  %v349_v2 = vadd.s32 3, %v345_v59  ;;  %v4650_v4 = vld [vmem:[%s7574_s2 + $0x40] sm:$0xff] }
  0xde   : > { %v527_v41 = vshll.u32 %v6081_v23, 30  ;;  %vm579_vm10 = vcmp.gt.s32.totalorder %v578_v54, 0  ;;  %v788_v5 = vand.u32 4294901760, %v787_v61  ;;  %v454_v6 = vand.u32 3, %v453_v57  ;;  %1761 = vperm.xlu0 %5626, %v4650_v4   ;;  %v4653_v4 = vld [vmem:[%s7574_s2 + $0x58] sm:$0xff] }
  0xdf   : > { %v339_v39 = vmul.f32 %v338_v53, %v336_v31  ;;  %v580_v30 = vsel %vm579_vm10, %v578_v54, 0  ;;  %v575_v14 = vand.u32 8388607, %v568_v27  ;;  %v6098_v20 = vand.u32 3, %v349_v2  ;;  %694 = vperm.xlu1 %5625, %v4628_v33   ;;  %v4629_v53 = vld [vmem:[%s7574_s2 + $0x38] sm:$0xff]  ;;  %v4652_v54 = vld [vmem:[%s7574_s2 + $0x50] sm:$0xff] }
  0xe0   : > { %v6088_v42 = vsub.s32 %v524_v44, %v527_v41  ;;  %v582_v43 = vand.u32 31, %v580_v30  ;;  %4905 = vmatprep.mubr.f32.mxu0 %v788_v5  ;;  %vm459_vm11 = vcmp.eq.s32.totalorder %v454_v6, 2  ;;  %vm452_vm12 = vweird.f32 %v5874_v28 }
  0xe1   : > { %v340_v0 = vxor.u32 2147483648, %v339_v39  ;;  %vm456_vm13 = vcmp.eq.s32.totalorder %v454_v6, 0  ;;  %vm455_vm14 = vcmp.lt.s32.totalorder %v454_v6, 2  ;;  %v576_v35 = vor.u32 8388608, %v575_v14 }
  0xe2   : > { %v530_v13 = vsub.s32 0, %v6088_v42  ;;  %v583_v62 = vsub.s32 32, %v582_v43  ;;  %vm355_vm0 = vcmp.eq.s32.totalorder %v6098_v20, 2  ;;  %v6115_v38 = vshrl.u32 %v580_v30, 5  ;;  %1771 = vperm.xlu0 %5626, %v4652_v54  }
  0xe3   : > { %v341_v8 = vsel %vm258_vm7, %v340_v0, %v339_v39  ;;  %vm352_vm1 = vcmp.eq.s32.totalorder %v6098_v20, 0  ;;  %v585_v46 = vshll.u32 %v5757_v58, %v582_v43  ;;  %v591_v47 = vshll.u32 %v5759_v63, %v582_v43  ;;  %699 = vperm.xlu1 %5625, %v4629_v53  }
  0xe4   : > { %v344_v12 = vsel %vm6074_vm9, %v5881_v37, %v341_v8  ;;  %v4615_v24 = vmin.u32 %v530_v13, %v6088_v42  ;;  %v586_v19 = vshrl.u32 %v5758_v60, %v583_v62  ;;  %v589_v40 = vshrl.u32 %v5759_v63, %v583_v62 }
  0xe5   : > { %5631 = vcosq.f32 %v344_v12  ;;  %v592_v48 = vshrl.u32 %v5760_v1, %v583_v62  ;;  %vm351_vm2 = vcmp.lt.s32.totalorder %v6098_v20, 2  ;;  %v588_v52 = vshll.u32 %v5758_v60, %v582_v43 }
  0xe6   : > { %v5628_v11 = vpop.eup %5627  ;;  %5633 = vsinq.f32 %v344_v12  ;;  %v532_v32 = vclz %v4615_v24  ;;  %v594_v45 = vshll.u32 %v5760_v1, %v582_v43  ;;  %v595_v31 = vshrl.u32 %v5761_v3, %v583_v62  ;;  %v4651_v12 = vld [vmem:[%s7574_s2 + $0x48] sm:$0xff] }
  0xe7   : > { %v5630_v15 = vpop.eup %5629  ;;  %v460_v17 = vxor.u32 2147483648, %v5628_v11  ;;  %vm348_vm3 = vweird.f32 %v5881_v37  ;;  %v593_v57 = vor.u32 %v592_v48, %v591_v47  ;;  %v597_v28 = vshll.u32 %v5761_v3, %v582_v43  ;;  %1766 = vperm.xlu1 %5625, %v4651_v12   ;;  %v4675_v37 = vld [vmem:[%s7574_s2 + $0x68] sm:$0xff] }
  0xe8   : > { %v457_v21 = vxor.u32 2147483648, %v5630_v15  ;;  %v4616_v44 = vadd.s32 4294967294, %v532_v32  ;;  %v598_v59 = vshrl.u32 %v5762_v10, %v583_v62  ;;  %v587_v61 = vor.u32 %v586_v19, %v585_v46  ;;  %v4676_v46 = vld [vmem:[%s7574_s2 + $0x70] sm:$0xff] }
  0xe9   : > { %v461_v29 = vsel %vm459_vm11, %v460_v17, %v5630_v15  ;;  %v590_v41 = vor.u32 %v589_v40, %v588_v52  ;;  %v596_v0 = vor.u32 %v595_v31, %v594_v45  ;;  %v520_v2 = vadd.s32 %v6038_v9, %v6043_v22  ;;  %v4674_v15 = vld [vmem:[%s7574_s2 + $0x60] sm:$0xff] }
  0xea   : > { %v458_v34 = vsel %vm456_vm13, %v5628_v11, %v457_v21  ;;  %vm4617_vm4 = vcmp.lt.s32.totalorder %v4616_v44, 0  ;;  %v599_v5 = vor.u32 %v598_v59, %v597_v28  ;;  %v616_v6 = vshll.u32 %v576_v35, 8  ;;  %2833 = vperm.xlu0 %5626, %v4674_v15  }
  0xeb   : > { %v462_v36 = vsel %vm455_vm14, %v458_v34, %v461_v29  ;;  %v535_v39 = vsel %vm4617_vm4, 0, %v4616_v44  ;;  %v584_v11 = vshrl.u32 %v5757_v58, %v583_v62  ;;  %vm600_vm5 = vcmp.lt.s32.totalorder %v6115_v38, 1  ;;  %1776 = vperm.xlu1 %5625, %v4653_v4  }
  0xec   : > { %v6125_v51 = vsel %vm452_vm12, nan, %v462_v36  ;;  %v540_v30 = vsub.s32 4294967266, %v535_v39  ;;  %vm603_vm6 = vcmp.lt.s32.totalorder %v6115_v38, 4  ;;  %vm601_vm7 = vcmp.lt.s32.totalorder %v6115_v38, 2 }
  0xed   : > { %v719_v43 = vand.u32 4294901760, %v6125_v51  ;;  %v605_v14 = vsel %vm603_vm6, %v593_v57, 2102212464  ;;  %v608_v62 = vsel %vm600_vm5, %v587_v61, %v590_v41  ;;  %v609_v18 = vsel %vm603_vm6, %v596_v0, 920167782 }
  0xee   : > { %v541_v22 = vadd.s32 127, %v540_v30  ;;  %v613_v21 = vsel %vm603_vm6, %v599_v5, 1326507024  ;;  %v536_v26 = vsub.s32 32, %v535_v39  ;;  %vm602_vm8 = vcmp.lt.s32.totalorder %v6115_v38, 3  ;;  %2843 = vperm.xlu0 %5626, %v4676_v46   ;;  %v4698_v38 = vld [vmem:[%s7574_s2 + $0x80] sm:$0xff] }
  0xef   : > { %v5632_v8 = vpop.eup %5631  ;;  %v612_v29 = vsel %vm600_vm5, %v590_v41, %v593_v57  ;;  %v604_v34 = vsel %vm600_vm5, %v584_v11, %v587_v61  ;;  %v610_v32 = vsel %vm602_vm8, %v593_v57, %v609_v18  ;;  %v614_v35 = vsel %vm602_vm8, %v596_v0, %v613_v21  ;;  %2838 = vperm.xlu1 %5625, %v4675_v37  }
  0xf0   : > { %v5634_v13 = vpop.eup %5633  ;;  %v356_v9 = vxor.u32 2147483648, %v5632_v8  ;;  %v542_v19 = vshll.u32 %v541_v22, 23  ;;  %v606_v40 = vsel %vm602_vm8, %v590_v41, %v605_v14  ;;  %v611_v44 = vsel %vm601_vm7, %v608_v62, %v610_v32 }
  0xf1   : > { %v353_v17 = vxor.u32 2147483648, %v5634_v13  ;;  %v615_v48 = vsel %vm601_vm7, %v612_v29, %v614_v35  ;;  %v6180_v52 = vmul.u32.u64.low %v616_v6, %v611_v44  ;;  %v6181_v45 = vmul.u32.u64.high %v616_v6, %v611_v44, %v6180_v52 }
  0xf2   : > { %v357_v24 = vsel %vm355_vm0, %v356_v9, %v5634_v13  ;;  %v538_v31 = vshrl.u32 %v520_v2, %v536_v26  ;;  %v6184_v53 = vmul.u32.u64.low %v616_v6, %v615_v48  ;;  %v6185_v57 = vmul.u32.u64.high %v616_v6, %v615_v48, %v6184_v53  ;;  %3909 = vperm.xlu0 %5626, %v4698_v38  }
  0xf3   : > { %v354_v33 = vsel %vm352_vm1, %v5632_v8, %v353_v17  ;;  %v607_v28 = vsel %vm601_vm7, %v604_v34, %v606_v40  ;;  %v537_v59 = vshll.u32 %v6088_v42, %v535_v39  ;;  %v543_v54 = vor.u32 4788187, %v542_v19  ;;  %v4677_v39 = vld [vmem:[%s7574_s2 + $0x78] sm:$0xff] }
  0xf4   : > { %v358_v36 = vsel %vm351_vm2, %v354_v33, %v357_v24  ;;  %v626_v41 = vadd.s32 1, %v6181_v45  ;;  %v623_v2 = vmul.u32 %v616_v6, %v607_v28  ;;  %vm625_vm9 = vc.u32 %v6185_v57, %v6180_v52  ;;  %2848 = vperm.xlu1 %5625, %v4677_v39  }
  0xf5   : > { %v6176_v47 = vsel %vm348_vm3, nan, %v358_v36  ;;  %v539_v0 = vor.u32 %v538_v31, %v537_v59  ;;  %v544_v30 = vand.u32 2147483647, %v543_v54  ;;  %vm466_vm10 = vcmp.lt.s32.totalorder %v5891_v56, 0 }
  0xf6   : > { %v716_v20 = vand.u32 4294901760, %v6176_v47  ;;  %v627_v42 = vsel %vm625_vm9, %v626_v41, %v6181_v45  ;;  %vm6213_vm11 = vcmp.le.f32.partialorder %v464_v49, 0.7853982  ;;  %v550_v26 = vsub.s32 4, %v6081_v23 }
  0xf7   : > { %v628_v5 = vadd.s32 %v627_v42, %v623_v2  ;;  %v546_v8 = vcvt.s32.f32 %v539_v0  ;;  %v624_v33 = vadd.s32 %v6180_v52, %v6185_v57  ;;  %vm570_vm13 = vcmp.lt.s32.totalorder %v6034_v7, 0  ;;  %v4623_v2 = vld [vmem:[%s7573_s1 + $0x28] sm:$0xff] }
  0xf8   : > { %v6197_v61 = vpack.c.bf16 %v719_v43, %v716_v20  ;;  %v551_v49 = vsel %vm466_vm10, %v550_v26, %v6081_v23  ;;  %vm6228_vm14 = vcmp.le.f32.partialorder %v568_v27, 0.7853982  ;;  %v4624_v27 = vld [vmem:[%s7573_s1 + $0x30] sm:$0xff]  ;;  %vm556_vm3 = vweird.f32 %v5891_v56 }
  0xf9   : > { %v629_v11 = vadd.s32 536870912, %v628_v5  ;;  %v547_v6 = vmul.f32 %v546_v8, %v544_v30  ;;  %v553_v19 = vsel %vm6213_vm11, 0, %v551_v49  ;;  %v707_v8 = vsel %vm702_vm15, %v4623_v2, 0 }
  0xfa   : > { %5234 = vmatprep.subr.bf16.mxu0 %v6197_v61  ;;  %v557_v48 = vadd.s32 3, %v553_v19  ;;  %v6262_v62 = vsub.f32 %v6125_v51, %v719_v43  ;;  %vm660_vm7 = vweird.f32 %v6034_v7 }
  0xfb   : > { %5236 = vmatpush3.bf16.msra.mxu0 %v6197_v61  ;;  %v630_v12 = vshrl.u32 %v629_v11, 30  ;;  %v548_v9 = vxor.u32 2147483648, %v547_v6  ;;  %v4625_v11 = vld [vmem:[%s7573_s1 + $0x38] sm:$0xff] }
  0xfc   : > { %v558_v57 = vand.u32 3, %v557_v48 }
  0xfd   : > { %v631_v13 = vshll.u32 %v630_v12, 30  ;;  %v549_v15 = vsel %vm466_vm10, %v548_v9, %v547_v6  ;;  %v654_v52 = vsub.s32 4, %v630_v12  ;;  %v6248_v9 = vand.u32 4294901760, %v707_v8 }
  0xfe   : > { %v552_v21 = vsel %vm6213_vm11, %v5891_v56, %v549_v15  ;;  %vm560_vm0 = vcmp.eq.s32.totalorder %v558_v57, 0  ;;  %vm563_vm1 = vcmp.eq.s32.totalorder %v558_v57, 2  ;;  %vm559_vm2 = vcmp.lt.s32.totalorder %v558_v57, 2 }
  0xff   : > { %v632_v22 = vsub.s32 %v628_v5, %v631_v13  ;;  %5635 = vcosq.f32 %v552_v21  ;;  %v655_v0 = vsel %vm570_vm13, %v654_v52, %v630_v12  ;;  %v710_v12 = vsel %vm702_vm15, %v4624_v27, 0 }
 0x100   : > { %5637 = vsinq.f32 %v552_v21  ;;  %v657_v5 = vsel %vm6228_vm14, 0, %v655_v0  ;;  %v6265_v21 = vsub.f32 %v707_v8, %v6248_v9 }
 0x101   : > { %v634_v14 = vsub.s32 0, %v632_v22  ;;  %v661_v13 = vadd.s32 3, %v657_v5 }
 0x102   : > { %v796_v51 = vand.u32 4294901760, %v6265_v21 }
 0x103   : > { %v4619_v17 = vmin.u32 %v634_v14, %v632_v22  ;;  %v713_v14 = vsel %vm702_vm15, %v4625_v11, 0 }
 0x104   : > { %v6267_v56 = vand.u32 4294901760, %v713_v14  ;;  %v797_v48 = vsub.f32 %v6265_v21, %v796_v51 }
 0x105   : > { %v636_v18 = vclz %v4619_v17  ;;  %v6257_v17 = vand.u32 4294901760, %v710_v12 }
 0x106   : > { %v6276_v43 = vsub.f32 %v713_v14, %v6267_v56 }
 0x107   : > { %v4620_v24 = vadd.s32 4294967294, %v636_v18  ;;  %v662_v18 = vand.u32 3, %v661_v13  ;;  %v6271_v26 = vsub.f32 %v710_v12, %v6257_v17 }
 0x109   : > { %vm4621_vm12 = vcmp.lt.s32.totalorder %v4620_v24, 0  ;;  %v5636_v45 = vpop.eup %5635  ;;  %vm667_vm4 = vcmp.eq.s32.totalorder %v662_v18, 2  ;;  %vm664_vm5 = vcmp.eq.s32.totalorder %v662_v18, 0  ;;  %vm663_vm6 = vcmp.lt.s32.totalorder %v662_v18, 2 }
 0x10a   : > { %v639_v29 = vsel %vm4621_vm12, 0, %v4620_v24  ;;  %v5638_v28 = vpop.eup %5637  ;;  %v564_v54 = vxor.u32 2147483648, %v5636_v45  ;;  %v806_v19 = vand.u32 4294901760, %v6271_v26 }
 0x10b   : > { %v640_v34 = vsub.s32 32, %v639_v29  ;;  %v644_v32 = vsub.s32 4294967266, %v639_v29  ;;  %v641_v35 = vshll.u32 %v632_v22, %v639_v29  ;;  %v561_v59 = vxor.u32 2147483648, %v5638_v28 }
 0x10c   : > { %v565_v30 = vsel %vm563_vm1, %v564_v54, %v5638_v28  ;;  %v6254_v22 = vsub.f32 %v6176_v47, %v716_v20  ;;  %v798_v54 = vand.u32 4294901760, %v797_v48 }
 0x10d   : > { %v642_v4 = vshrl.u32 %v624_v33, %v640_v34  ;;  %v645_v36 = vadd.s32 127, %v644_v32  ;;  %v562_v39 = vsel %vm560_vm0, %v5636_v45, %v561_v59  ;;  %v834_v34 = vand.u32 4294901760, %v6262_v62 }
 0x10e   : > { %v566_v6 = vsel %vm559_vm2, %v562_v39, %v565_v30  ;;  %v827_v47 = vand.u32 4294901760, %v6254_v22  ;;  %v5249_v5 = vpack.c.bf16 %v6262_v62, %v6254_v22 }
 0x10f   : > { %v643_v40 = vor.u32 %v642_v4, %v641_v35  ;;  %v646_v44 = vshll.u32 %v645_v36, 23  ;;  %v567_v15 = vsel %vm556_vm3, nan, %v566_v6 }
 0x110   : > { %v722_v24 = vand.u32 4294901760, %v567_v15  ;;  %v828_v35 = vsub.f32 %v6254_v22, %v827_v47  ;;  %v5265_v11 = vpack.c.bf16 %v834_v34, %v827_v47 }
 0x111   : > { %v647_v46 = vor.u32 4788187, %v646_v44  ;;  %v650_v53 = vcvt.s32.f32 %v643_v40  ;;  %v835_v44 = vsub.f32 %v6262_v62, %v834_v34 }
 0x112   : > { %v840_v4 = vsub.f32 %v567_v15, %v722_v24 }
 0x113   : > { %v648_v31 = vand.u32 2147483647, %v647_v46  ;;  %v836_v57 = vand.u32 4294901760, %v835_v44 }
 0x114   : > { %v841_v28 = vand.u32 4294901760, %v840_v4 }
 0x115   : > { %v651_v37 = vmul.f32 %v650_v53, %v648_v31  ;;  %v829_v31 = vand.u32 4294901760, %v828_v35  ;;  %v816_v53 = vand.u32 4294901760, %v6276_v43 }
 0x116   : > { %v842_v41 = vsub.f32 %v840_v4, %v841_v28 }
 0x117   : > { %v652_v23 = vxor.u32 2147483648, %v651_v37 }
 0x118   : > { %v843_v39 = vand.u32 4294901760, %v842_v41 }
 0x119   : > { %v653_v38 = vsel %vm570_vm13, %v652_v23, %v651_v37  ;;  %v807_v37 = vsub.f32 %v6271_v26, %v806_v19  ;;  %v5241_v23 = vpack.c.bf16 %v836_v57, %v829_v31 }
 0x11a   : > { %v656_v42 = vsel %vm6228_vm14, %v6034_v7, %v653_v38  ;;  %v817_v7 = vsub.f32 %v6276_v43, %v816_v53 }
 0x11b   : > { %5639 = vcosq.f32 %v656_v42  ;;  %v808_v0 = vand.u32 4294901760, %v807_v37 }
 0x11c   : > { %5641 = vsinq.f32 %v656_v42  ;;  %v818_v42 = vand.u32 4294901760, %v817_v7 }
 0x125   : > { %v5640_v20 = vpop.eup %5639 }
 0x126   : > { %v5642_v29 = vpop.eup %5641  ;;  %v668_v33 = vxor.u32 2147483648, %v5640_v20 }
 0x127   : > { %v665_v32 = vxor.u32 2147483648, %v5642_v29 }
 0x128   : > { %v669_v49 = vsel %vm667_vm4, %v668_v33, %v5642_v29 }
 0x129   : > { %v666_v36 = vsel %vm664_vm5, %v5640_v20, %v665_v32 }
 0x12a   : > { %v670_v40 = vsel %vm663_vm6, %v666_v36, %v669_v49 }
 0x12b   : > { %v671_v46 = vsel %vm660_vm7, nan, %v670_v40 }
 0x12c   : > { %v725_v45 = vand.u32 4294901760, %v671_v46 }
 0x12e   : > { %v5237_v52 = vpack.c.bf16 %v725_v45, %v722_v24  ;;  %v847_v59 = vsub.f32 %v671_v46, %v725_v45 }
 0x130   : > { %5238 = vmatprep.subr.bf16.mxu0 %v5237_v52  ;;  %v848_v38 = vand.u32 4294901760, %v847_v59  ;;  %v5253_v8 = vpack.c.bf16 %v847_v59, %v840_v4 }
 0x131   : > { %5240 = vmatpush3.bf16.msra.mxu0 %v5237_v52 }
 0x132   : > { %5242 = vmatprep.subr.bf16.mxu0 %v5241_v23  ;;  %v849_v2 = vsub.f32 %v847_v59, %v848_v38  ;;  %v5269_v6 = vpack.c.bf16 %v848_v38, %v841_v28 }
 0x134   : > { %4906 = vmatmul.mubr.f32.vlgmr.msra.gmra.mrb[0].mxu0 %v798_v54  ;;  %v850_v30 = vand.u32 4294901760, %v849_v2 }
 0x135   : > { %5244 = vmatpush3.bf16.msra.mxu0 %v5241_v23  ;;  %4908 = vmatprep.mubr.f32.mxu0 %v808_v0 }
 0x136   : > { %v5245_v27 = vpack.c.bf16 %v850_v30, %v843_v39 }
 0x138   : > { %4909 = vmatmul.mubr.f32.gmra.mrb[2].mxu0 %v818_v42  ;;  %5246 = vmatprep.subr.bf16.mxu0 %v5245_v27 }
 0x139   : > { %5248 = vmatpush3.bf16.msra.mxu0 %v5245_v27  ;;  %4919 = vmatprep.mubr.f32.mxu0 %v6051_v25 }
 0x13a   : > { %5250 = vmatprep.subr.bf16.mxu0 %v5249_v5 }
 0x13c   : > { %4920 = vmatmul.mubr.f32.vlgmr.msra.gmra.mrb[0].mxu0 %v6248_v9 }
 0x13d   : > { %5252 = vmatpush3.bf16.msra.mxu0 %v5249_v5  ;;  %4922 = vmatprep.mubr.f32.mxu0 %v6257_v17 }
 0x13e   : > { %5254 = vmatprep.subr.bf16.mxu0 %v5253_v8 }
 0x140   : > { %4923 = vmatmul.mubr.f32.gmra.mrb[2].mxu0 %v6267_v56 }
 0x141   : > { %5256 = vmatpush3.bf16.msra.mxu0 %v5253_v8  ;;  %4933 = vmatprep.mubr.f32.mxu0 %v6070_v50 }
 0x142   : > { %5258 = vmatprep.subr.bf16.mxu0 %v6197_v61 }
 0x144   : > { %4934 = vmatmul.mubr.f32.vlgmr.msra.gmra.mrb[0].mxu0 %v6265_v21 }
 0x145   : > { %5260 = vmatpush3.bf16.msra.mxu0 %v6197_v61  ;;  %4936 = vmatprep.mubr.f32.mxu0 %v6271_v26 }
 0x146   : > { %5262 = vmatprep.subr.bf16.mxu0 %v5237_v52 }
 0x148   : > { %4937 = vmatmul.mubr.f32.gmra.mrb[2].mxu0 %v6276_v43 }
 0x149   : > { %5264 = vmatpush3.bf16.msra.mxu0 %v5237_v52  ;;  %4947 = vmatprep.mubr.f32.mxu0 %v786_v55 }
 0x14a   : > { %5266 = vmatprep.subr.bf16.mxu0 %v5265_v11 }
 0x14c   : > { %4948 = vmatmul.mubr.f32.vlgmr.msra.gmra.mrb[0].mxu0 %v796_v51 }
 0x14d   : > { %5268 = vmatpush3.bf16.msra.mxu0 %v5265_v11  ;;  %4950 = vmatprep.mubr.f32.mxu0 %v806_v19 }
 0x14e   : > { %5270 = vmatprep.subr.bf16.mxu0 %v5269_v6 }
 0x150   : > { %4951 = vmatmul.mubr.f32.gmra.mrb[2].mxu0 %v816_v53 }
 0x151   : > { %5272 = vmatpush3.bf16.msra.mxu0 %v5269_v6  ;;  %4961 = vmatprep.mubr.f32.mxu0 %v6051_v25 }
 0x152   : > { %5274 = vmatprep.subr.bf16.mxu0 %v6197_v61 }
 0x154   : > { %4962 = vmatmul.mubr.f32.vlgmr.msra.gmra.mrb[0].mxu0 %v6248_v9 }
 0x155   : > { %5276 = vmatpush3.bf16.msra.mxu0 %v6197_v61  ;;  %4964 = vmatprep.mubr.f32.mxu0 %v6257_v17 }
 0x156   : > { %5278 = vmatprep.subr.bf16.mxu0 %v5237_v52 }
 0x158   : > { %4965 = vmatmul.mubr.f32.gmra.mrb[2].mxu0 %v6267_v56 }
 0x159   : > { %5280 = vmatpush3.bf16.msra.mxu0 %v5237_v52  ;;  %4975 = vmatprep.mubr.f32.mxu0 %v6051_v25  ;;  %v690_v12 = vpop.permute.xlu0 %689 }
 0x15a   : > { %v685_v50 = vpop.permute.xlu1 %684 }
 0x15c   : > { %4976 = vmatmul.mubr.f32.vlgmr.msra.gmra.mrb[0].mxu0 %v6248_v9 }
 0x15d   : > { %4978 = vmatprep.mubr.f32.mxu0 %v6257_v17 }
 0x15e   : > { %v695_v55 = vpop.permute.xlu1 %694 }
 0x160   : > { %4979 = vmatmul.mubr.f32.gmra.mrb[2].mxu0 %v6267_v56 }
 0x162   : > { %v700_v25 = vpop.permute.xlu1 %699 }
 0x22f   : > { %v4977_v13 = vpop.f32.mrb[0].mxu0 }
 0x230   : > { %v6314_v22 = vadd.f32 %v4977_v13, %v690_v12  ;;  %v1307_v61 = vpop.f32.mrb[1].mxu0 }
 0x231   : > { %v6316_v14 = vadd.f32 %v1307_v61, %v685_v50 }
 0x232   : > { %v1433_v15 = vand.u32 2147483647, %v6314_v22  ;;  %v1436_v62 = vand.u32 2139095040, %v6314_v22  ;;  %vm1435_vm6 = vcmp.lt.s32.totalorder %v6314_v22, 0 }
 0x233   : > { %v1329_v9 = vand.u32 2147483647, %v6316_v14  ;;  %v1332_v17 = vand.u32 2139095040, %v6316_v14  ;;  %v4980_v18 = vpop.f32.mrb[2].mxu0  ;;  %vm1331_vm7 = vcmp.lt.s32.totalorder %v6316_v14, 0 }
 0x234   : > { %v1437_v21 = vshrl.u32 %v1436_v62, 23  ;;  %v1440_v56 = vand.u32 8388607, %v1433_v15  ;;  %v6324_v24 = vadd.f32 %v4980_v18, %v700_v25  ;;  %v1319_v47 = vpop.f32.mrb[3].mxu0 }
 0x235   : > { %v1333_v20 = vshrl.u32 %v1332_v17, 23  ;;  %v1336_v26 = vand.u32 8388607, %v1329_v9  ;;  %v6330_v48 = vadd.f32 %v1319_v47, %v695_v55 }
 0x236   : > { %v4634_v29 = vadd.s32 4294967169, %v1437_v21  ;;  %v1644_v34 = vand.u32 2139095040, %v6324_v24  ;;  %v1441_v32 = vor.u32 8388608, %v1440_v56  ;;  %v1641_v35 = vand.u32 2147483647, %v6324_v24 }
 0x237   : > { %v4630_v33 = vadd.s32 4294967169, %v1333_v20  ;;  %v1337_v43 = vor.u32 8388608, %v1336_v26 }
 0x238   : > { %v1443_v51 = vadd.s32 1, %v4634_v29  ;;  %v1645_v4 = vshrl.u32 %v1644_v34, 23  ;;  %v6332_v45 = vshll.u32 %v1441_v32, 8  ;;  %v6340_v28 = vand.u32 8388607, %v1641_v35 }
 0x239   : > { %v1339_v49 = vadd.s32 1, %v4630_v33  ;;  %v6336_v53 = vshll.u32 %v1337_v43, 8 }
 0x23a   : > { %vm1444_vm8 = vcmp.gt.s32.totalorder %v1443_v51, 0  ;;  %v4642_v19 = vadd.s32 4294967169, %v1645_v4 }
 0x23b   : > { %v1445_v36 = vsel %vm1444_vm8, %v1443_v51, 0  ;;  %vm1340_vm9 = vcmp.gt.s32.totalorder %v1339_v49, 0 }
 0x23c   : > { %v1446_v40 = vshrl.u32 %v1445_v36, 5  ;;  %v1447_v44 = vand.u32 31, %v1445_v36  ;;  %v1341_v46 = vsel %vm1340_vm9, %v1339_v49, 0  ;;  %v6343_v59 = vadd.s32 1, %v4642_v19 }
 0x23d   : > { %v6334_v31 = vshrl.u32 %v1341_v46, 5  ;;  %v1343_v57 = vand.u32 31, %v1341_v46  ;;  %vm6441_vm9 = vcmp.le.f32.partialorder %v1433_v15, 0.7853982 }
 0x23e   : > { %v1448_v37 = vsub.s32 32, %v1447_v44  ;;  %v1450_v52 = vshll.u32 %v5757_v58, %v1447_v44  ;;  %v1453_v54 = vshll.u32 %v5758_v60, %v1447_v44  ;;  %v1456_v23 = vshll.u32 %v5759_v63, %v1447_v44 }
 0x23f   : > { %v1459_v7 = vshll.u32 %v5760_v1, %v1447_v44  ;;  %v1462_v41 = vshll.u32 %v5761_v3, %v1447_v44  ;;  %vm1465_vm10 = vcmp.lt.s32.totalorder %v1446_v40, 1  ;;  %vm1466_vm11 = vcmp.lt.s32.totalorder %v1446_v40, 2 }
 0x240   : > { %v1451_v38 = vshrl.u32 %v5758_v60, %v1448_v37  ;;  %v1454_v0 = vshrl.u32 %v5759_v63, %v1448_v37  ;;  %v1457_v2 = vshrl.u32 %v5760_v1, %v1448_v37  ;;  %v1449_v42 = vshrl.u32 %v5757_v58, %v1448_v37 }
 0x241   : > { %v1460_v39 = vshrl.u32 %v5761_v3, %v1448_v37  ;;  %v1463_v30 = vshrl.u32 %v5762_v10, %v1448_v37  ;;  %v1344_v11 = vsub.s32 32, %v1343_v57  ;;  %vm1467_vm12 = vcmp.lt.s32.totalorder %v1446_v40, 3 }
 0x242   : > { %v1452_v27 = vor.u32 %v1451_v38, %v1450_v52  ;;  %v1455_v5 = vor.u32 %v1454_v0, %v1453_v54  ;;  %v1458_v8 = vor.u32 %v1457_v2, %v1456_v23  ;;  %vm1468_vm13 = vcmp.lt.s32.totalorder %v1446_v40, 4 }
 0x243   : > { %v1461_v6 = vor.u32 %v1460_v39, %v1459_v7  ;;  %v1464_v50 = vor.u32 %v1463_v30, %v1462_v41  ;;  %v1346_v18 = vshll.u32 %v5757_v58, %v1343_v57  ;;  %v1347_v47 = vshrl.u32 %v5758_v60, %v1344_v11 }
 0x244   : > { %v1469_v55 = vsel %vm1465_vm10, %v1449_v42, %v1452_v27  ;;  %v1470_v12 = vsel %vm1468_vm13, %v1458_v8, 2102212464  ;;  %v1473_v13 = vsel %vm1465_vm10, %v1452_v27, %v1455_v5  ;;  %v1477_v61 = vsel %vm1465_vm10, %v1455_v5, %v1458_v8 }
 0x245   : > { %v1471_v62 = vsel %vm1467_vm12, %v1455_v5, %v1470_v12  ;;  %v1474_v25 = vsel %vm1468_vm13, %v1461_v6, 920167782  ;;  %v1478_v17 = vsel %vm1468_vm13, %v1464_v50, 1326507024  ;;  %v1349_v20 = vshll.u32 %v5758_v60, %v1343_v57 }
 0x246   : > { %v1475_v21 = vsel %vm1467_vm12, %v1458_v8, %v1474_v25  ;;  %v1479_v56 = vsel %vm1467_vm12, %v1461_v6, %v1478_v17  ;;  %v1472_v26 = vsel %vm1466_vm11, %v1469_v55, %v1471_v62  ;;  %v1350_v34 = vshrl.u32 %v5759_v63, %v1344_v11 }
 0x247   : > { %v1476_v29 = vsel %vm1466_vm11, %v1473_v13, %v1475_v21  ;;  %v1480_v33 = vsel %vm1466_vm11, %v1477_v61, %v1479_v56  ;;  %v1348_v4 = vor.u32 %v1347_v47, %v1346_v18  ;;  %v1352_v19 = vshll.u32 %v5759_v63, %v1343_v57 }
 0x248   : > { %v6366_v32 = vmul.u32.u64.low %v6332_v45, %v1480_v33  ;;  %v6367_v51 = vmul.u32.u64.high %v6332_v45, %v1480_v33, %v6366_v32  ;;  %v6370_v43 = vmul.u32.u64.low %v6332_v45, %v1476_v29  ;;  %v6371_v49 = vmul.u32.u64.high %v6332_v45, %v1476_v29, %v6370_v43 }
 0x249   : > { %v1351_v36 = vor.u32 %v1350_v34, %v1349_v20  ;;  %v1353_v44 = vshrl.u32 %v5760_v1, %v1344_v11  ;;  %v1345_v46 = vshrl.u32 %v5757_v58, %v1344_v11  ;;  %v1355_v40 = vshll.u32 %v5760_v1, %v1343_v57 }
 0x24a   : > { %v1356_v37 = vshrl.u32 %v5761_v3, %v1344_v11  ;;  %v1359_v52 = vshrl.u32 %v5762_v10, %v1344_v11  ;;  %v1488_v54 = vmul.u32 %v6332_v45, %v1472_v26  ;;  %v1358_v7 = vshll.u32 %v5761_v3, %v1343_v57 }
 0x24b   : > { %v1354_v23 = vor.u32 %v1353_v44, %v1352_v19  ;;  %vm1361_vm14 = vcmp.lt.s32.totalorder %v6334_v31, 1  ;;  %vm1490_vm0 = vc.u32 %v6367_v51, %v6370_v43  ;;  %v1491_v41 = vadd.s32 1, %v6371_v49 }
 0x24c   : > { %v1357_v38 = vor.u32 %v1356_v37, %v1355_v40  ;;  %vm1362_vm1 = vcmp.lt.s32.totalorder %v6334_v31, 2  ;;  %v1360_v0 = vor.u32 %v1359_v52, %v1358_v7  ;;  %vm1363_vm2 = vcmp.lt.s32.totalorder %v6334_v31, 3 }
 0x24d   : > { %vm1364_vm3 = vcmp.lt.s32.totalorder %v6334_v31, 4  ;;  %v1369_v2 = vsel %vm1361_vm14, %v1348_v4, %v1351_v36  ;;  %v1492_v45 = vsel %vm1490_vm0, %v1491_v41, %v6371_v49  ;;  %v1373_v57 = vsel %vm1361_vm14, %v1351_v36, %v1354_v23 }
 0x24e   : > { %v1366_v42 = vsel %vm1364_vm3, %v1354_v23, 2102212464  ;;  %v1370_v39 = vsel %vm1364_vm3, %v1357_v38, 920167782  ;;  %v1493_v30 = vadd.s32 %v1492_v45, %v1488_v54  ;;  %v1365_v27 = vsel %vm1361_vm14, %v1345_v46, %v1348_v4 }
 0x24f   : > { %v1371_v5 = vsel %vm1363_vm2, %v1354_v23, %v1370_v39  ;;  %v1374_v8 = vsel %vm1364_vm3, %v1360_v0, 1326507024  ;;  %v1367_v11 = vsel %vm1363_vm2, %v1351_v36, %v1366_v42  ;;  %vm1652_vm4 = vcmp.gt.s32.totalorder %v6343_v59, 0 }
 0x250   : > { %v1372_v6 = vsel %vm1362_vm1, %v1369_v2, %v1371_v5  ;;  %v1375_v50 = vsel %vm1363_vm2, %v1357_v38, %v1374_v8  ;;  %v1494_v55 = vadd.s32 536870912, %v1493_v30  ;;  %v1653_v17 = vsel %vm1652_vm4, %v6343_v59, 0 }
 0x251   : > { %v1376_v12 = vsel %vm1362_vm1, %v1373_v57, %v1375_v50  ;;  %v6394_v13 = vmul.u32.u64.low %v6336_v53, %v1372_v6  ;;  %v6395_v61 = vmul.u32.u64.high %v6336_v53, %v1372_v6, %v6394_v13  ;;  %v1368_v21 = vsel %vm1362_vm1, %v1365_v27, %v1367_v11 }
 0x252   : > { %v6399_v62 = vmul.u32.u64.low %v6336_v53, %v1376_v12  ;;  %v6400_v25 = vmul.u32.u64.high %v6336_v53, %v1376_v12, %v6399_v62  ;;  %v6403_v18 = vshrl.u32 %v1494_v55, 30  ;;  %v1655_v56 = vand.u32 31, %v1653_v17 }
 0x253   : > { %v1540_v47 = vand.u32 2139095040, %v6330_v48  ;;  %v1387_v26 = vadd.s32 1, %v6395_v61  ;;  %v1649_v29 = vor.u32 8388608, %v6340_v28  ;;  %v1384_v33 = vmul.u32 %v6336_v53, %v1368_v21 }
 0x254   : > { %v1496_v20 = vshll.u32 %v6403_v18, 30  ;;  %vm1386_vm5 = vc.u32 %v6400_v25, %v6394_v13  ;;  %v1656_v59 = vsub.s32 32, %v1655_v56  ;;  %v1537_v19 = vand.u32 2147483647, %v6330_v48 }
 0x255   : > { %v1388_v31 = vsel %vm1386_vm5, %v1387_v26, %v6395_v61  ;;  %v1541_v49 = vshrl.u32 %v1540_v47, 23  ;;  %v6418_v36 = vshll.u32 %v1649_v29, 8  ;;  %v1489_v28 = vadd.s32 %v6370_v43, %v6367_v51 }
 0x256   : > { %v6414_v34 = vsub.s32 %v1493_v30, %v1496_v20  ;;  %v1389_v32 = vadd.s32 %v1388_v31, %v1384_v33  ;;  %v1659_v53 = vshrl.u32 %v5758_v60, %v1656_v59  ;;  %v1662_v46 = vshrl.u32 %v5759_v63, %v1656_v59 }
 0x257   : > { %v1654_v37 = vshrl.u32 %v1653_v17, 5  ;;  %v1665_v52 = vshrl.u32 %v5760_v1, %v1656_v59  ;;  %v1668_v54 = vshrl.u32 %v5761_v3, %v1656_v59  ;;  %v1658_v7 = vshll.u32 %v5757_v58, %v1655_v56 }
 0x258   : > { %v1499_v4 = vsub.s32 0, %v6414_v34  ;;  %v1390_v44 = vadd.s32 536870912, %v1389_v32  ;;  %v1661_v41 = vshll.u32 %v5758_v60, %v1655_v56  ;;  %v4638_v38 = vadd.s32 4294967169, %v1541_v49 }
 0x259   : > { %v1664_v43 = vshll.u32 %v5759_v63, %v1655_v56  ;;  %v1667_v0 = vshll.u32 %v5760_v1, %v1655_v56  ;;  %v1671_v2 = vshrl.u32 %v5762_v10, %v1656_v59  ;;  %v1519_v45 = vsub.s32 4, %v6403_v18 }
 0x25a   : > { %v4635_v40 = vmin.u32 %v1499_v4, %v6414_v34  ;;  %v1391_v23 = vshrl.u32 %v1390_v44, 30  ;;  %v1660_v39 = vor.u32 %v1659_v53, %v1658_v7  ;;  %v1663_v57 = vor.u32 %v1662_v46, %v1661_v41 }
 0x25b   : > { %v1666_v27 = vor.u32 %v1665_v52, %v1664_v43  ;;  %v1669_v5 = vor.u32 %v1668_v54, %v1667_v0  ;;  %v1670_v8 = vshll.u32 %v5761_v3, %v1655_v56  ;;  %v1657_v50 = vshrl.u32 %v5757_v58, %v1656_v59 }
 0x25c   : > { %v1501_v51 = vclz %v4635_v40  ;;  %v1392_v42 = vshll.u32 %v1391_v23, 30  ;;  %v1415_v6 = vsub.s32 4, %v1391_v23  ;;  %vm1673_vm8 = vcmp.lt.s32.totalorder %v1654_v37, 1 }
 0x25d   : > { %v1672_v12 = vor.u32 %v1671_v2, %v1670_v8  ;;  %vm1674_vm11 = vcmp.lt.s32.totalorder %v1654_v37, 2  ;;  %vm1675_vm12 = vcmp.lt.s32.totalorder %v1654_v37, 3  ;;  %vm6447_vm13 = vcmp.le.f32.partialorder %v1329_v9, 0.7853982 }
 0x25e   : > { %v4636_v30 = vadd.s32 4294967294, %v1501_v51  ;;  %v6436_v11 = vsub.s32 %v1389_v32, %v1392_v42  ;;  %vm1676_vm14 = vcmp.lt.s32.totalorder %v1654_v37, 4  ;;  %v1681_v21 = vsel %vm1673_vm8, %v1660_v39, %v1663_v57 }
 0x25f   : > { %v1678_v47 = vsel %vm1676_vm14, %v1666_v27, 2102212464  ;;  %v1682_v20 = vsel %vm1676_vm14, %v1669_v5, 920167782  ;;  %v1685_v9 = vsel %vm1673_vm8, %v1663_v57, %v1666_v27  ;;  %v1686_v49 = vsel %vm1676_vm14, %v1672_v12, 1326507024 }
 0x260   : > { %vm4637_vm10 = vcmp.lt.s32.totalorder %v4636_v30, 0  ;;  %v1395_v17 = vsub.s32 0, %v6436_v11  ;;  %v1683_v33 = vsel %vm1675_vm12, %v1666_v27, %v1682_v20  ;;  %v1520_v4 = vsel %vm1435_vm6, %v1519_v45, %v6403_v18 }
 0x261   : > { %v1504_v61 = vsel %vm4637_vm10, 0, %v4636_v30  ;;  %v1684_v32 = vsel %vm1674_vm11, %v1681_v21, %v1683_v33  ;;  %v1677_v53 = vsel %vm1673_vm8, %v1657_v50, %v1660_v39  ;;  %v1416_v52 = vsel %vm1331_vm7, %v1415_v6, %v1391_v23 }
 0x262   : > { %v1505_v15 = vsub.s32 32, %v1504_v61  ;;  %v1509_v56 = vsub.s32 4294967266, %v1504_v61  ;;  %v1506_v26 = vshll.u32 %v6414_v34, %v1504_v61  ;;  %v4631_v29 = vmin.u32 %v1395_v17, %v6436_v11 }
 0x263   : > { %v1679_v34 = vsel %vm1675_vm12, %v1663_v57, %v1678_v47  ;;  %v6468_v41 = vmul.u32.u64.low %v6418_v36, %v1684_v32  ;;  %v6469_v51 = vmul.u32.u64.high %v6418_v36, %v1684_v32, %v6468_v41  ;;  %v1522_v23 = vsel %vm6441_vm9, 0, %v1520_v4 }
 0x264   : > { %v1507_v59 = vshrl.u32 %v1489_v28, %v1505_v15  ;;  %v1510_v31 = vadd.s32 127, %v1509_v56  ;;  %v1397_v44 = vclz %v4631_v29  ;;  %v1687_v28 = vsel %vm1675_vm12, %v1669_v5, %v1686_v49 }
 0x265   : > { %v1688_v7 = vsel %vm1674_vm11, %v1685_v9, %v1687_v28  ;;  %v1680_v43 = vsel %vm1674_vm11, %v1677_v53, %v1679_v34  ;;  %v1385_v45 = vadd.s32 %v6394_v13, %v6400_v25  ;;  %v1547_v42 = vadd.s32 1, %v4638_v38  ;;  %v4646_v9 = vld [vmem:[%s7573_s1 + $0x40] sm:$0xff] }
 0x266   : > { %v1508_v46 = vor.u32 %v1507_v59, %v1506_v26  ;;  %v1511_v40 = vshll.u32 %v1510_v31, 23  ;;  %v4632_v54 = vadd.s32 4294967294, %v1397_v44  ;;  %v1418_v27 = vsel %vm6447_vm13, 0, %v1416_v52 }
 0x267   : > { %v6474_v0 = vmul.u32.u64.low %v6418_v36, %v1688_v7  ;;  %v6475_v2 = vmul.u32.u64.high %v6418_v36, %v1688_v7, %v6474_v0  ;;  %v1696_v8 = vmul.u32 %v6418_v36, %v1680_v43  ;;  %v1699_v6 = vadd.s32 1, %v6469_v51 }
 0x268   : > { %v1512_v18 = vor.u32 4788187, %v1511_v40  ;;  %vm4633_vm0 = vcmp.lt.s32.totalorder %v4632_v54, 0  ;;  %v1515_v57 = vcvt.s32.f32 %v1508_v46  ;;  %vm1548_vm2 = vcmp.gt.s32.totalorder %v1547_v42, 0 }
 0x269   : > { %v1400_v30 = vsel %vm4633_vm0, 0, %v4632_v54  ;;  %vm1698_vm1 = vc.u32 %v6475_v2, %v6468_v41  ;;  %v1549_v61 = vsel %vm1548_vm2, %v1547_v42, 0  ;;  %v1526_v21 = vadd.s32 3, %v1522_v23 }
 0x26a   : > { %v1513_v39 = vand.u32 2147483647, %v1512_v18  ;;  %v1401_v37 = vsub.s32 32, %v1400_v30  ;;  %v1405_v5 = vsub.s32 4294967266, %v1400_v30  ;;  %v1402_v12 = vshll.u32 %v6436_v11, %v1400_v30 }
 0x26b   : > { %v1700_v38 = vsel %vm1698_vm1, %v1699_v6, %v6469_v51  ;;  %v1551_v56 = vand.u32 31, %v1549_v61  ;;  %v1544_v20 = vand.u32 8388607, %v1537_v19  ;;  %v1422_v26 = vadd.s32 3, %v1418_v27 }
 0x26c   : > { %v1516_v50 = vmul.f32 %v1515_v57, %v1513_v39  ;;  %v1403_v13 = vshrl.u32 %v1385_v45, %v1401_v37  ;;  %v1406_v25 = vadd.s32 127, %v1405_v5  ;;  %v1701_v15 = vadd.s32 %v1700_v38, %v1696_v8 }
 0x26d   : > { %v1552_v33 = vsub.s32 32, %v1551_v56  ;;  %v6499_v32 = vand.u32 3, %v1526_v21  ;;  %v1780_v53 = vsel %vm702_vm15, %v4646_v9, 0  ;;  %v6504_v34 = vand.u32 3, %v1422_v26 }
 0x26e   : > { %v1517_v17 = vxor.u32 2147483648, %v1516_v50  ;;  %v1404_v47 = vor.u32 %v1403_v13, %v1402_v12  ;;  %v1407_v36 = vshll.u32 %v1406_v25, 23  ;;  %v1702_v29 = vadd.s32 536870912, %v1701_v15 }
 0x26f   : > { %v1545_v40 = vor.u32 8388608, %v1544_v20  ;;  %v1555_v52 = vshrl.u32 %v5758_v60, %v1552_v33  ;;  %v1558_v28 = vshrl.u32 %v5759_v63, %v1552_v33  ;;  %v1563_v54 = vshll.u32 %v5760_v1, %v1551_v56 }
 0x270   : > { %v1518_v11 = vsel %vm1435_vm6, %v1517_v17, %v1516_v50  ;;  %v1408_v31 = vor.u32 4788187, %v1407_v36  ;;  %v6501_v49 = vshrl.u32 %v1702_v29, 30  ;;  %v1411_v44 = vcvt.s32.f32 %v1404_v47 }
 0x271   : > { %v1521_v59 = vsel %vm6441_vm9, %v6314_v22, %v1518_v11  ;;  %v1564_v7 = vshrl.u32 %v5761_v3, %v1552_v33  ;;  %vm1532_vm3 = vcmp.eq.s32.totalorder %v6499_v32, 2  ;;  %v6514_v18 = vshrl.u32 %v1549_v61, 5 }
 0x272   : > { %5643 = vcosq.f32 %v1521_v59  ;;  %v1409_v4 = vand.u32 2147483647, %v1408_v31  ;;  %v1704_v46 = vshll.u32 %v6501_v49, 30  ;;  %v1554_v43 = vshll.u32 %v5757_v58, %v1551_v56 }
 0x273   : > { %5645 = vsinq.f32 %v1521_v59  ;;  %v1561_v0 = vshrl.u32 %v5760_v1, %v1552_v33  ;;  %vm1529_vm4 = vcmp.eq.s32.totalorder %v6499_v32, 0  ;;  %v1557_v45 = vshll.u32 %v5758_v60, %v1551_v56 }
 0x274   : > { %v1412_v55 = vmul.f32 %v1411_v44, %v1409_v4  ;;  %v6512_v51 = vsub.s32 %v1701_v15, %v1704_v46  ;;  %v1565_v42 = vor.u32 %v1564_v7, %v1563_v54  ;;  %v1567_v39 = vshrl.u32 %v5762_v10, %v1552_v33 }
 0x275   : > { %vm1528_vm5 = vcmp.lt.s32.totalorder %v6499_v32, 2  ;;  %v1697_v57 = vadd.s32 %v6468_v41, %v6475_v2  ;;  %v1560_v27 = vshll.u32 %v5759_v63, %v1551_v56  ;;  %v6526_v37 = vand.u32 4294901760, %v1780_v53 }
 0x276   : > { %v1413_v23 = vxor.u32 2147483648, %v1412_v55  ;;  %v1707_v30 = vsub.s32 0, %v6512_v51  ;;  %vm1525_vm6 = vweird.f32 %v6314_v22  ;;  %v1556_v8 = vor.u32 %v1555_v52, %v1554_v43 }
 0x277   : > { %v1559_v6 = vor.u32 %v1558_v28, %v1557_v45  ;;  %v1566_v50 = vshll.u32 %v5761_v3, %v1551_v56  ;;  %v1562_v2 = vor.u32 %v1561_v0, %v1560_v27  ;;  %vm1572_vm8 = vcmp.lt.s32.totalorder %v6514_v18, 4 }
 0x278   : > { %v1414_v5 = vsel %vm1331_vm7, %v1413_v23, %v1412_v55  ;;  %v4643_v41 = vmin.u32 %v1707_v30, %v6512_v51  ;;  %v1578_v25 = vsel %vm1572_vm8, %v1565_v42, 920167782  ;;  %v6539_v38 = vshll.u32 %v1545_v40, 8 }
 0x279   : > { %v1417_v12 = vsel %vm6447_vm13, %v6316_v14, %v1414_v5  ;;  %v1568_v13 = vor.u32 %v1567_v39, %v1566_v50  ;;  %v1553_v21 = vshrl.u32 %v5757_v58, %v1552_v33  ;;  %v6543_v62 = vsub.f32 %v1780_v53, %v6526_v37 }
 0x27a   : > { %5647 = vcosq.f32 %v1417_v12  ;;  %v1709_v17 = vclz %v4643_v41  ;;  %vm1569_vm7 = vcmp.lt.s32.totalorder %v6514_v18, 1  ;;  %vm1570_vm9 = vcmp.lt.s32.totalorder %v6514_v18, 2 }
 0x27b   : > { %5649 = vsinq.f32 %v1417_v12  ;;  %vm1571_vm10 = vcmp.lt.s32.totalorder %v6514_v18, 3  ;;  %v1577_v20 = vsel %vm1569_vm7, %v1556_v8, %v1559_v6  ;;  %v1574_v29 = vsel %vm1572_vm8, %v1562_v2, 2102212464 }
 0x27c   : > { %v5644_v61 = vpop.eup %5643  ;;  %v4644_v36 = vadd.s32 4294967294, %v1709_v17  ;;  %v1579_v11 = vsel %vm1571_vm10, %v1562_v2, %v1578_v25  ;;  %v1581_v33 = vsel %vm1569_vm7, %v1559_v6, %v1562_v2  ;;  %v1582_v9 = vsel %vm1572_vm8, %v1568_v13, 1326507024 }
 0x27d   : > { %v5646_v15 = vpop.eup %5645  ;;  %v1533_v56 = vxor.u32 2147483648, %v5644_v61  ;;  %v1583_v31 = vsel %vm1571_vm10, %v1565_v42, %v1582_v9  ;;  %v1862_v4 = vand.u32 4294901760, %v6543_v62  ;;  %v1580_v46 = vsel %vm1570_vm9, %v1577_v20, %v1579_v11 }
 0x27e   : > { %v1530_v47 = vxor.u32 2147483648, %v5646_v15  ;;  %vm4645_vm11 = vcmp.lt.s32.totalorder %v4644_v36, 0  ;;  %v1584_v40 = vsel %vm1570_vm9, %v1581_v33, %v1583_v31  ;;  %v1573_v54 = vsel %vm1569_vm7, %v1553_v21, %v1556_v8 }
 0x27f   : > { %v1534_v26 = vsel %vm1532_vm3, %v1533_v56, %v5646_v15  ;;  %v1712_v53 = vsel %vm4645_vm11, 0, %v4644_v36  ;;  %v1575_v32 = vsel %vm1571_vm10, %v1559_v6, %v1574_v29  ;;  %v1863_v0 = vsub.f32 %v6543_v62, %v1862_v4 }
 0x280   : > { %v1531_v59 = vsel %vm1529_vm4, %v5644_v61, %v1530_v47  ;;  %v1713_v55 = vsub.s32 32, %v1712_v53  ;;  %v1717_v28 = vsub.s32 4294967266, %v1712_v53  ;;  %v1714_v30 = vshll.u32 %v6512_v51, %v1712_v53 }
 0x281   : > { %v1535_v44 = vsel %vm1528_vm5, %v1531_v59, %v1534_v26  ;;  %v6580_v7 = vmul.u32.u64.low %v6539_v38, %v1584_v40  ;;  %v6581_v43 = vmul.u32.u64.high %v6539_v38, %v1584_v40, %v6580_v7  ;;  %v1864_v27 = vand.u32 4294901760, %v1863_v0 }
 0x282   : > { %v6573_v52 = vsel %vm1525_vm6, nan, %v1535_v44  ;;  %v1715_v23 = vshrl.u32 %v1697_v57, %v1713_v55  ;;  %v1718_v22 = vadd.s32 127, %v1717_v28  ;;  %v1576_v50 = vsel %vm1570_vm9, %v1573_v54, %v1575_v32 }
 0x283   : > { %v6587_v45 = vmul.u32.u64.low %v6539_v38, %v1580_v46  ;;  %v6588_v42 = vmul.u32.u64.high %v6539_v38, %v1580_v46, %v6587_v45  ;;  %vm1428_vm12 = vcmp.eq.s32.totalorder %v6504_v34, 2  ;;  %4989 = vmatprep.mubr.f32.mxu1 %v1864_v27  ;;  %vm1425_vm14 = vcmp.eq.s32.totalorder %v6504_v34, 0 }
 0x284   : > { %v5648_v39 = vpop.eup %5647  ;;  %v1719_v6 = vshll.u32 %v1718_v22, 23  ;;  %v1716_v41 = vor.u32 %v1715_v23, %v1714_v30  ;;  %vm1424_vm0 = vcmp.lt.s32.totalorder %v6504_v34, 2  ;;  %v1592_v25 = vmul.u32 %v6539_v38, %v1576_v50 }
 0x285   : > { %v5650_v5 = vpop.eup %5649  ;;  %v1429_v8 = vxor.u32 2147483648, %v5648_v39  ;;  %vm1594_vm13 = vc.u32 %v6581_v43, %v6587_v45  ;;  %v1595_v51 = vadd.s32 1, %v6588_v42  ;;  %vm1421_vm1 = vweird.f32 %v6316_v14 }
 0x286   : > { %v1426_v12 = vxor.u32 2147483648, %v5650_v5  ;;  %v1720_v2 = vor.u32 4788187, %v1719_v6  ;;  %v1723_v15 = vcvt.s32.f32 %v1716_v41  ;;  %v1795_v11 = vand.u32 4294901760, %v6573_v52 }
 0x287   : > { %v1430_v57 = vsel %vm1428_vm12, %v1429_v8, %v5650_v5  ;;  %v1596_v17 = vsel %vm1594_vm13, %v1595_v51, %v6588_v42  ;;  %vm1643_vm2 = vcmp.lt.s32.totalorder %v6324_v24, 0  ;;  %vm6615_vm3 = vcmp.le.f32.partialorder %v1641_v35, 0.7853982 }
 0x288   : > { %v1427_v13 = vsel %vm1425_vm14, %v5648_v39, %v1426_v12  ;;  %v1721_v61 = vand.u32 2147483647, %v1720_v2  ;;  %v1597_v56 = vadd.s32 %v1596_v17, %v1592_v25  ;;  %v1727_v46 = vsub.s32 4, %v6501_v49 }
 0x289   : > { %v1431_v18 = vsel %vm1424_vm0, %v1427_v13, %v1430_v57  ;;  %v1593_v35 = vadd.s32 %v6587_v45, %v6581_v43  ;;  %vm6629_vm8 = vcmp.le.f32.partialorder %v1537_v19, 0.7853982  ;;  %vm1539_vm7 = vcmp.lt.s32.totalorder %v6330_v48, 0  ;;  %v4648_v19 = vld [vmem:[%s7573_s1 + $0x50] sm:$0xff] }
 0x28a   : > { %v1432_v21 = vsel %vm1421_vm1, nan, %v1431_v18  ;;  %v1724_v36 = vmul.f32 %v1723_v15, %v1721_v61  ;;  %v1598_v20 = vadd.s32 536870912, %v1597_v56  ;;  %v1728_v55 = vsel %vm1643_vm2, %v1727_v46, %v6501_v49  ;;  %v4647_v61 = vld [vmem:[%s7573_s1 + $0x48] sm:$0xff] }
 0x28b   : > { %v6602_v47 = vadd.f32 %v1432_v21, %v5861_v16  ;;  %v1730_v7 = vsel %vm6615_vm3, 0, %v1728_v55  ;;  %vm1733_vm10 = vweird.f32 %v6324_v24  ;;  %vm1629_vm14 = vweird.f32 %v6330_v48 }
 0x28c   : > { %v1599_v26 = vshrl.u32 %v1598_v20, 30  ;;  %v1725_v38 = vxor.u32 2147483648, %v1724_v36  ;;  %v1734_v30 = vadd.s32 3, %v1730_v7  ;;  %v1786_v20 = vsel %vm702_vm15, %v4648_v19, 0 }
 0x28d   : > { %v1792_v34 = vand.u32 4294901760, %v6602_v47 }
 0x28e   : > { %v1600_v29 = vshll.u32 %v1599_v26, 30  ;;  %v1726_v16 = vsel %vm1643_vm2, %v1725_v38, %v1724_v36  ;;  %v1735_v49 = vand.u32 3, %v1734_v30  ;;  %v1623_v45 = vsub.s32 4, %v1599_v26 }
 0x28f   : > { %v6608_v14 = vpack.c.bf16 %v1795_v11, %v1792_v34  ;;  %v1729_v44 = vsel %vm6615_vm3, %v6324_v24, %v1726_v16  ;;  %v6648_v36 = vsub.f32 %v6602_v47, %v1792_v34  ;;  %v6661_v16 = vsub.f32 %v6573_v52, %v1795_v11 }
 0x290   : > { %v1601_v33 = vsub.s32 %v1597_v56, %v1600_v29  ;;  %5651 = vcosq.f32 %v1729_v44  ;;  %vm1737_vm5 = vcmp.eq.s32.totalorder %v1735_v49, 0  ;;  %vm1740_vm6 = vcmp.eq.s32.totalorder %v1735_v49, 2 }
 0x291   : > { %5282 = vmatprep.subr.bf16.mxu1 %v6608_v14  ;;  %5653 = vsinq.f32 %v1729_v44  ;;  %v1624_v18 = vsel %vm1539_vm7, %v1623_v45, %v1599_v26  ;;  %vm1736_vm9 = vcmp.lt.s32.totalorder %v1735_v49, 2  ;;  %v1783_v56 = vsel %vm702_vm15, %v4647_v61, 0  ;;  %v4649_v26 = vld [vmem:[%s7573_s1 + $0x58] sm:$0xff] }
 0x292   : > { %5284 = vmatpush3.bf16.msra.mxu1 %v6608_v14  ;;  %v1603_v9 = vsub.s32 0, %v1601_v33  ;;  %v1626_v15 = vsel %vm6629_vm8, 0, %v1624_v18  ;;  %v6663_v24 = vand.u32 4294901760, %v1786_v20  ;;  %v1789_v34 = vsel %vm702_vm15, %v4649_v26, 0 }
 0x293   : > { %v1630_v29 = vadd.s32 3, %v1626_v15  ;;  %v1903_v59 = vand.u32 4294901760, %v6648_v36  ;;  %v6672_v46 = vand.u32 4294901760, %v1789_v34  ;;  %v5297_v15 = vpack.c.bf16 %v6661_v16, %v6648_v36 }
 0x294   : > { %v4639_v31 = vmin.u32 %v1603_v9, %v1601_v33  ;;  %v6675_v11 = vsub.f32 %v1786_v20, %v6663_v24 }
 0x296   : > { %v1605_v53 = vclz %v4639_v31  ;;  %v1631_v31 = vand.u32 3, %v1630_v29 }
 0x298   : > { %v4640_v40 = vadd.s32 4294967294, %v1605_v53  ;;  %v1910_v53 = vand.u32 4294901760, %v6661_v16  ;;  %vm1636_vm11 = vcmp.eq.s32.totalorder %v1631_v31, 2  ;;  %vm1633_vm12 = vcmp.eq.s32.totalorder %v1631_v31, 0 }
 0x299   : > { %vm1632_vm13 = vcmp.lt.s32.totalorder %v1631_v31, 2 }
 0x29a   : > { %vm4641_vm4 = vcmp.lt.s32.totalorder %v4640_v40, 0  ;;  %v5652_v27 = vpop.eup %5651  ;;  %v5313_v20 = vpack.c.bf16 %v1910_v53, %v1903_v59 }
 0x29b   : > { %v1608_v28 = vsel %vm4641_vm4, 0, %v4640_v40  ;;  %v5654_v8 = vpop.eup %5653  ;;  %v1741_v41 = vxor.u32 2147483648, %v5652_v27 }
 0x29c   : > { %v1609_v54 = vsub.s32 32, %v1608_v28  ;;  %v1613_v32 = vsub.s32 4294967266, %v1608_v28  ;;  %v1610_v0 = vshll.u32 %v1601_v33, %v1608_v28  ;;  %v1738_v12 = vxor.u32 2147483648, %v5654_v8 }
 0x29d   : > { %v1742_v13 = vsel %vm1740_vm6, %v1741_v41, %v5654_v8  ;;  %v6656_v33 = vand.u32 4294901760, %v1783_v56 }
 0x29e   : > { %v1611_v23 = vshrl.u32 %v1593_v35, %v1609_v54  ;;  %v1614_v22 = vadd.s32 127, %v1613_v32  ;;  %v1739_v51 = vsel %vm1737_vm5, %v5652_v27, %v1738_v12  ;;  %v1904_v35 = vsub.f32 %v6648_v36, %v1903_v59  ;;  %v1762_v36 = vpop.permute.xlu0 %1761 }
 0x29f   : > { %v1743_v21 = vsel %vm1736_vm9, %v1739_v51, %v1742_v13  ;;  %v6669_v44 = vsub.f32 %v1783_v56, %v6656_v33 }
 0x2a0   : > { %v1612_v42 = vor.u32 %v1611_v23, %v1610_v0  ;;  %v1615_v39 = vshll.u32 %v1614_v22, 23  ;;  %v6654_v38 = vsel %vm1733_vm10, nan, %v1743_v21  ;;  %v1911_v23 = vsub.f32 %v6661_v16, %v1910_v53 }
 0x2a1   : > { %v1801_v9 = vand.u32 4294901760, %v6654_v38  ;;  %v1872_v7 = vand.u32 4294901760, %v6669_v44  ;;  %v1891_v22 = vsub.f32 %v1789_v34, %v6672_v46  ;;  %v1905_v27 = vand.u32 4294901760, %v1904_v35 }
 0x2a2   : > { %v1616_v5 = vor.u32 4788187, %v1615_v39  ;;  %v1619_v50 = vcvt.s32.f32 %v1612_v42  ;;  %v1882_v39 = vand.u32 4294901760, %v6675_v11  ;;  %v1912_v49 = vand.u32 4294901760, %v1911_v23 }
 0x2a3   : > { %v6681_v54 = vsub.f32 %v6654_v38, %v1801_v9  ;;  %v1892_v12 = vand.u32 4294901760, %v1891_v22 }
 0x2a4   : > { %v1617_v6 = vand.u32 2147483647, %v1616_v5  ;;  %v1883_v41 = vsub.f32 %v6675_v11, %v1882_v39  ;;  %v5289_v45 = vpack.c.bf16 %v1912_v49, %v1905_v27 }
 0x2a5   : > { %v1924_v5 = vand.u32 4294901760, %v6681_v54  ;;  %v1893_v13 = vsub.f32 %v1891_v22, %v1892_v12 }
 0x2a6   : > { %v1620_v43 = vmul.f32 %v1619_v50, %v1617_v6  ;;  %v1873_v50 = vsub.f32 %v6669_v44, %v1872_v7 }
 0x2a7   : > { %v1894_v19 = vand.u32 4294901760, %v1893_v13 }
 0x2a8   : > { %v1621_v57 = vxor.u32 2147483648, %v1620_v43  ;;  %v1874_v2 = vand.u32 4294901760, %v1873_v50 }
 0x2aa   : > { %v1622_v25 = vsel %vm1539_vm7, %v1621_v57, %v1620_v43 }
 0x2ab   : > { %v1625_v17 = vsel %vm6629_vm8, %v6330_v48, %v1622_v25  ;;  %v1925_v48 = vsub.f32 %v6681_v54, %v1924_v5  ;;  %v1884_v25 = vand.u32 4294901760, %v1883_v41 }
 0x2ac   : > { %5655 = vcosq.f32 %v1625_v17 }
 0x2ad   : > { %5657 = vsinq.f32 %v1625_v17  ;;  %v1926_v61 = vand.u32 4294901760, %v1925_v48 }
 0x2b6   : > { %v5656_v40 = vpop.eup %5655 }
 0x2b7   : > { %v5658_v55 = vpop.eup %5657  ;;  %v1637_v28 = vxor.u32 2147483648, %v5656_v40 }
 0x2b8   : > { %v1634_v32 = vxor.u32 2147483648, %v5658_v55 }
 0x2b9   : > { %v1638_v0 = vsel %vm1636_vm11, %v1637_v28, %v5658_v55 }
 0x2ba   : > { %v1635_v42 = vsel %vm1633_vm12, %v5656_v40, %v1634_v32 }
 0x2bb   : > { %v1639_v30 = vsel %vm1632_vm13, %v1635_v42, %v1638_v0  ;;  %v1772_v42 = vpop.permute.xlu0 %1771 }
 0x2bc   : > { %v6691_v8 = vsel %vm1629_vm14, nan, %v1639_v30 }
 0x2bd   : > { %v1798_v6 = vand.u32 4294901760, %v6691_v8 }
 0x2bf   : > { %v5285_v43 = vpack.c.bf16 %v1801_v9, %v1798_v6  ;;  %v1916_v57 = vsub.f32 %v6691_v8, %v1798_v6 }
 0x2c1   : > { %5286 = vmatprep.subr.bf16.mxu1 %v5285_v43  ;;  %v1917_v51 = vand.u32 4294901760, %v1916_v57  ;;  %v5301_v56 = vpack.c.bf16 %v6681_v54, %v1916_v57 }
 0x2c2   : > { %5288 = vmatpush3.bf16.msra.mxu1 %v5285_v43 }
 0x2c3   : > { %5290 = vmatprep.subr.bf16.mxu1 %v5289_v45  ;;  %v1918_v18 = vsub.f32 %v1916_v57, %v1917_v51  ;;  %v5317_v26 = vpack.c.bf16 %v1924_v5, %v1917_v51 }
 0x2c5   : > { %4990 = vmatmul.mubr.f32.vlgmr.msra.gmra.mrb[0].mxu1 %v1874_v2  ;;  %v1919_v17 = vand.u32 4294901760, %v1918_v18 }
 0x2c6   : > { %5292 = vmatpush3.bf16.msra.mxu1 %v5289_v45  ;;  %4992 = vmatprep.mubr.f32.mxu1 %v1884_v25 }
 0x2c7   : > { %v5293_v21 = vpack.c.bf16 %v1926_v61, %v1919_v17 }
 0x2c9   : > { %5294 = vmatprep.subr.bf16.mxu1 %v5293_v21  ;;  %4993 = vmatmul.mubr.f32.gmra.mrb[2].mxu1 %v1894_v19 }
 0x2ca   : > { %5296 = vmatpush3.bf16.msra.mxu1 %v5293_v21  ;;  %5003 = vmatprep.mubr.f32.mxu1 %v6526_v37 }
 0x2cb   : > { %5298 = vmatprep.subr.bf16.mxu1 %v5297_v15 }
 0x2cd   : > { %5004 = vmatmul.mubr.f32.vlgmr.msra.gmra.mrb[0].mxu1 %v6656_v33 }
 0x2ce   : > { %5300 = vmatpush3.bf16.msra.mxu1 %v5297_v15  ;;  %5006 = vmatprep.mubr.f32.mxu1 %v6663_v24 }
 0x2cf   : > { %5302 = vmatprep.subr.bf16.mxu1 %v5301_v56 }
 0x2d1   : > { %5007 = vmatmul.mubr.f32.gmra.mrb[2].mxu1 %v6672_v46 }
 0x2d2   : > { %5304 = vmatpush3.bf16.msra.mxu1 %v5301_v56  ;;  %5017 = vmatprep.mubr.f32.mxu1 %v6543_v62  ;;  %v1767_v62 = vpop.permute.xlu1 %1766 }
 0x2d3   : > { %5306 = vmatprep.subr.bf16.mxu1 %v6608_v14 }
 0x2d5   : > { %5018 = vmatmul.mubr.f32.vlgmr.msra.gmra.mrb[0].mxu1 %v6669_v44 }
 0x2d6   : > { %5308 = vmatpush3.bf16.msra.mxu1 %v6608_v14  ;;  %5020 = vmatprep.mubr.f32.mxu1 %v6675_v11  ;;  %v1777_v59 = vpop.permute.xlu1 %1776 }
 0x2d7   : > { %5310 = vmatprep.subr.bf16.mxu1 %v5285_v43 }
 0x2d9   : > { %5021 = vmatmul.mubr.f32.gmra.mrb[2].mxu1 %v1891_v22 }
 0x2da   : > { %5312 = vmatpush3.bf16.msra.mxu1 %v5285_v43  ;;  %5031 = vmatprep.mubr.f32.mxu1 %v1862_v4 }
 0x2db   : > { %5314 = vmatprep.subr.bf16.mxu1 %v5313_v20 }
 0x2dd   : > { %5032 = vmatmul.mubr.f32.vlgmr.msra.gmra.mrb[0].mxu1 %v1872_v7 }
 0x2de   : > { %5316 = vmatpush3.bf16.msra.mxu1 %v5313_v20  ;;  %5034 = vmatprep.mubr.f32.mxu1 %v1882_v39 }
 0x2df   : > { %5318 = vmatprep.subr.bf16.mxu1 %v5317_v26 }
 0x2e1   : > { %5035 = vmatmul.mubr.f32.gmra.mrb[2].mxu1 %v1892_v12 }
 0x2e2   : > { %5320 = vmatpush3.bf16.msra.mxu1 %v5317_v26  ;;  %5045 = vmatprep.mubr.f32.mxu1 %v6526_v37 }
 0x2e3   : > { %5322 = vmatprep.subr.bf16.mxu1 %v6608_v14 }
 0x2e5   : > { %5046 = vmatmul.mubr.f32.vlgmr.msra.gmra.mrb[0].mxu1 %v6656_v33 }
 0x2e6   : > { %5324 = vmatpush3.bf16.msra.mxu1 %v6608_v14  ;;  %5048 = vmatprep.mubr.f32.mxu1 %v6663_v24 }
 0x2e7   : > { %5326 = vmatprep.subr.bf16.mxu1 %v5285_v43 }
 0x2e9   : > { %5049 = vmatmul.mubr.f32.gmra.mrb[2].mxu1 %v6672_v46 }
 0x2ea   : > { %5328 = vmatpush3.bf16.msra.mxu1 %v5285_v43  ;;  %5059 = vmatprep.mubr.f32.mxu1 %v6526_v37 }
 0x2ed   : > { %5060 = vmatmul.mubr.f32.vlgmr.msra.gmra.mrb[0].mxu1 %v6656_v33 }
 0x2ee   : > { %5062 = vmatprep.mubr.f32.mxu1 %v6663_v24 }
 0x2f1   : > { %5063 = vmatmul.mubr.f32.gmra.mrb[2].mxu1 %v6672_v46 }
 0x3c0   : > { %v5061_v4 = vpop.f32.mrb[0].mxu1 }
 0x3c1   : > { %v6726_v29 = vadd.f32 %v5061_v4, %v1767_v62  ;;  %v2383_v14 = vpop.f32.mrb[1].mxu1 }
 0x3c2   : > { %v6728_v16 = vadd.f32 %v2383_v14, %v1762_v36 }
 0x3c3   : > { %v2509_v34 = vand.u32 2147483647, %v6726_v29  ;;  %v2512_v9 = vand.u32 2139095040, %v6726_v29  ;;  %vm2511_vm13 = vcmp.lt.s32.totalorder %v6726_v29, 0 }
 0x3c4   : > { %v2405_v37 = vand.u32 2147483647, %v6728_v16  ;;  %v2408_v33 = vand.u32 2139095040, %v6728_v16  ;;  %v5064_v24 = vpop.f32.mrb[2].mxu1  ;;  %vm2407_vm14 = vcmp.lt.s32.totalorder %v6728_v16, 0 }
 0x3c5   : > { %v2513_v31 = vshrl.u32 %v2512_v9, 23  ;;  %v2516_v44 = vand.u32 8388607, %v2509_v34  ;;  %v6736_v53 = vadd.f32 %v5064_v24, %v1777_v59  ;;  %v2395_v46 = vpop.f32.mrb[3].mxu1 }
 0x3c6   : > { %v2409_v40 = vshrl.u32 %v2408_v33, 23  ;;  %v2412_v11 = vand.u32 8388607, %v2405_v37  ;;  %v6742_v50 = vadd.f32 %v2395_v46, %v1772_v42 }
 0x3c7   : > { %v4658_v55 = vadd.s32 4294967169, %v2513_v31  ;;  %v2720_v35 = vand.u32 2139095040, %v6736_v53  ;;  %v2517_v54 = vor.u32 8388608, %v2516_v44  ;;  %v2717_v23 = vand.u32 2147483647, %v6736_v53 }
 0x3c8   : > { %v4654_v28 = vadd.s32 4294967169, %v2409_v40  ;;  %v2413_v7 = vor.u32 8388608, %v2412_v11 }
 0x3c9   : > { %v2519_v32 = vadd.s32 1, %v4658_v55  ;;  %v2721_v22 = vshrl.u32 %v2720_v35, 23  ;;  %v6744_v49 = vshll.u32 %v2517_v54, 8  ;;  %v6752_v43 = vand.u32 8388607, %v2717_v23 }
 0x3ca   : > { %v2415_v0 = vadd.s32 1, %v4654_v28  ;;  %v6748_v41 = vshll.u32 %v2413_v7, 8 }
 0x3cb   : > { %vm2520_vm0 = vcmp.gt.s32.totalorder %v2519_v32, 0  ;;  %v4666_v30 = vadd.s32 4294967169, %v2721_v22 }
 0x3cc   : > { %v2521_v39 = vsel %vm2520_vm0, %v2519_v32, 0  ;;  %vm2416_vm1 = vcmp.gt.s32.totalorder %v2415_v0, 0 }
 0x3cd   : > { %v2522_v27 = vshrl.u32 %v2521_v39, 5  ;;  %v2523_v5 = vand.u32 31, %v2521_v39  ;;  %v2417_v6 = vsel %vm2416_vm1, %v2415_v0, 0  ;;  %v6755_v2 = vadd.s32 1, %v4666_v30 }
 0x3ce   : > { %v6746_v12 = vshrl.u32 %v2417_v6, 5  ;;  %v2419_v48 = vand.u32 31, %v2417_v6  ;;  %vm6853_vm1 = vcmp.le.f32.partialorder %v2509_v34, 0.7853982 }
 0x3cf   : > { %v2524_v45 = vsub.s32 32, %v2523_v5  ;;  %v2526_v57 = vshll.u32 %v5757_v58, %v2523_v5  ;;  %v2529_v51 = vshll.u32 %v5758_v60, %v2523_v5  ;;  %v2532_v13 = vshll.u32 %v5759_v63, %v2523_v5 }
 0x3d0   : > { %v2535_v25 = vshll.u32 %v5760_v1, %v2523_v5  ;;  %v2538_v18 = vshll.u32 %v5761_v3, %v2523_v5  ;;  %vm2541_vm2 = vcmp.lt.s32.totalorder %v2522_v27, 1  ;;  %vm2542_vm3 = vcmp.lt.s32.totalorder %v2522_v27, 2 }
 0x3d1   : > { %v2527_v61 = vshrl.u32 %v5758_v60, %v2524_v45  ;;  %v2530_v17 = vshrl.u32 %v5759_v63, %v2524_v45  ;;  %v2533_v19 = vshrl.u32 %v5760_v1, %v2524_v45  ;;  %v2525_v21 = vshrl.u32 %v5757_v58, %v2524_v45 }
 0x3d2   : > { %v2536_v15 = vshrl.u32 %v5761_v3, %v2524_v45  ;;  %v2539_v56 = vshrl.u32 %v5762_v10, %v2524_v45  ;;  %v2420_v4 = vsub.s32 32, %v2419_v48  ;;  %vm2543_vm4 = vcmp.lt.s32.totalorder %v2522_v27, 3 }
 0x3d3   : > { %v2528_v20 = vor.u32 %v2527_v61, %v2526_v57  ;;  %v2531_v26 = vor.u32 %v2530_v17, %v2529_v51  ;;  %v2534_v62 = vor.u32 %v2533_v19, %v2532_v13  ;;  %vm2544_vm5 = vcmp.lt.s32.totalorder %v2522_v27, 4 }
 0x3d4   : > { %v2537_v36 = vor.u32 %v2536_v15, %v2535_v25  ;;  %v2540_v14 = vor.u32 %v2539_v56, %v2538_v18  ;;  %v2422_v40 = vshll.u32 %v5757_v58, %v2419_v48  ;;  %v2423_v28 = vshrl.u32 %v5758_v60, %v2420_v4 }
 0x3d5   : > { %v2545_v9 = vsel %vm2541_vm2, %v2525_v21, %v2528_v20  ;;  %v2546_v59 = vsel %vm2544_vm5, %v2534_v62, 2102212464  ;;  %v2549_v33 = vsel %vm2541_vm2, %v2528_v20, %v2531_v26  ;;  %v2553_v24 = vsel %vm2541_vm2, %v2531_v26, %v2534_v62 }
 0x3d6   : > { %v2547_v31 = vsel %vm2543_vm4, %v2531_v26, %v2546_v59  ;;  %v2550_v44 = vsel %vm2544_vm5, %v2537_v36, 920167782  ;;  %v2554_v46 = vsel %vm2544_vm5, %v2540_v14, 1326507024  ;;  %v2425_v35 = vshll.u32 %v5758_v60, %v2419_v48 }
 0x3d7   : > { %v2551_v11 = vsel %vm2543_vm4, %v2534_v62, %v2550_v44  ;;  %v2555_v55 = vsel %vm2543_vm4, %v2537_v36, %v2554_v46  ;;  %v2548_v54 = vsel %vm2542_vm3, %v2545_v9, %v2547_v31  ;;  %v2426_v0 = vshrl.u32 %v5759_v63, %v2420_v4 }
 0x3d8   : > { %v2552_v32 = vsel %vm2542_vm3, %v2549_v33, %v2551_v11  ;;  %v2556_v7 = vsel %vm2542_vm3, %v2553_v24, %v2555_v55  ;;  %v2424_v5 = vor.u32 %v2423_v28, %v2422_v40  ;;  %v2428_v45 = vshll.u32 %v5759_v63, %v2419_v48 }
 0x3d9   : > { %v6778_v22 = vmul.u32.u64.low %v6744_v49, %v2556_v7  ;;  %v6779_v42 = vmul.u32.u64.high %v6744_v49, %v2556_v7, %v6778_v22  ;;  %v6782_v39 = vmul.u32.u64.low %v6744_v49, %v2552_v32  ;;  %v6783_v30 = vmul.u32.u64.high %v6744_v49, %v2552_v32, %v6782_v39 }
 0x3da   : > { %v2427_v6 = vor.u32 %v2426_v0, %v2425_v35  ;;  %v2429_v57 = vshrl.u32 %v5760_v1, %v2420_v4  ;;  %v2421_v51 = vshrl.u32 %v5757_v58, %v2420_v4  ;;  %v2431_v27 = vshll.u32 %v5760_v1, %v2419_v48 }
 0x3db   : > { %v2432_v13 = vshrl.u32 %v5761_v3, %v2420_v4  ;;  %v2435_v25 = vshrl.u32 %v5762_v10, %v2420_v4  ;;  %v2564_v18 = vmul.u32 %v6744_v49, %v2548_v54  ;;  %v2434_v17 = vshll.u32 %v5761_v3, %v2419_v48 }
 0x3dc   : > { %v2430_v61 = vor.u32 %v2429_v57, %v2428_v45  ;;  %vm2437_vm6 = vcmp.lt.s32.totalorder %v6746_v12, 1  ;;  %vm2566_vm8 = vc.u32 %v6779_v42, %v6782_v39  ;;  %v2567_v19 = vadd.s32 1, %v6783_v30 }
 0x3dd   : > { %v2433_v21 = vor.u32 %v2432_v13, %v2431_v27  ;;  %vm2438_vm7 = vcmp.lt.s32.totalorder %v6746_v12, 2  ;;  %v2436_v15 = vor.u32 %v2435_v25, %v2434_v17  ;;  %vm2439_vm9 = vcmp.lt.s32.totalorder %v6746_v12, 3 }
 0x3de   : > { %vm2440_vm10 = vcmp.lt.s32.totalorder %v6746_v12, 4  ;;  %v2445_v56 = vsel %vm2437_vm6, %v2424_v5, %v2427_v6  ;;  %v2568_v49 = vsel %vm2566_vm8, %v2567_v19, %v6783_v30  ;;  %v2449_v48 = vsel %vm2437_vm6, %v2427_v6, %v2430_v61 }
 0x3df   : > { %v2442_v20 = vsel %vm2440_vm10, %v2430_v61, 2102212464  ;;  %v2446_v26 = vsel %vm2440_vm10, %v2433_v21, 920167782  ;;  %v2569_v62 = vadd.s32 %v2568_v49, %v2564_v18  ;;  %v2441_v4 = vsel %vm2437_vm6, %v2421_v51, %v2424_v5 }
 0x3e0   : > { %v2447_v36 = vsel %vm2439_vm9, %v2430_v61, %v2446_v26  ;;  %v2450_v14 = vsel %vm2440_vm10, %v2436_v15, 1326507024  ;;  %v2443_v9 = vsel %vm2439_vm9, %v2427_v6, %v2442_v20  ;;  %vm2728_vm11 = vcmp.gt.s32.totalorder %v6755_v2, 0 }
 0x3e1   : > { %v2448_v59 = vsel %vm2438_vm7, %v2445_v56, %v2447_v36  ;;  %v2451_v33 = vsel %vm2439_vm9, %v2433_v21, %v2450_v14  ;;  %v2570_v24 = vadd.s32 536870912, %v2569_v62  ;;  %v2729_v55 = vsel %vm2728_vm11, %v6755_v2, 0 }
 0x3e2   : > { %v2452_v31 = vsel %vm2438_vm7, %v2449_v48, %v2451_v33  ;;  %v6806_v44 = vmul.u32.u64.low %v6748_v41, %v2448_v59  ;;  %v6807_v46 = vmul.u32.u64.high %v6748_v41, %v2448_v59, %v6806_v44  ;;  %v2444_v35 = vsel %vm2438_vm7, %v2441_v4, %v2443_v9 }
 0x3e3   : > { %v6811_v40 = vmul.u32.u64.low %v6748_v41, %v2452_v31  ;;  %v6812_v11 = vmul.u32.u64.high %v6748_v41, %v2452_v31, %v6811_v40  ;;  %v6815_v28 = vshrl.u32 %v2570_v24, 30  ;;  %v2731_v54 = vand.u32 31, %v2729_v55 }
 0x3e4   : > { %v2616_v32 = vand.u32 2139095040, %v6742_v50  ;;  %v2463_v0 = vadd.s32 1, %v6807_v46  ;;  %v2725_v22 = vor.u32 8388608, %v6752_v43  ;;  %v2460_v30 = vmul.u32 %v6748_v41, %v2444_v35 }
 0x3e5   : > { %v2572_v7 = vshll.u32 %v6815_v28, 30  ;;  %vm2462_vm12 = vc.u32 %v6812_v11, %v6806_v44  ;;  %v2732_v2 = vsub.s32 32, %v2731_v54  ;;  %v2613_v27 = vand.u32 2147483647, %v6742_v50 }
 0x3e6   : > { %v2464_v12 = vsel %vm2462_vm12, %v2463_v0, %v6807_v46  ;;  %v2617_v45 = vshrl.u32 %v2616_v32, 23  ;;  %v6830_v51 = vshll.u32 %v2725_v22, 8  ;;  %v2565_v43 = vadd.s32 %v6782_v39, %v6779_v42 }
 0x3e7   : > { %v6826_v5 = vsub.s32 %v2569_v62, %v2572_v7  ;;  %v2465_v6 = vadd.s32 %v2464_v12, %v2460_v30  ;;  %v2735_v41 = vshrl.u32 %v5758_v60, %v2732_v2  ;;  %v2738_v25 = vshrl.u32 %v5759_v63, %v2732_v2 }
 0x3e8   : > { %v2730_v61 = vshrl.u32 %v2729_v55, 5  ;;  %v2741_v17 = vshrl.u32 %v5760_v1, %v2732_v2  ;;  %v2744_v19 = vshrl.u32 %v5761_v3, %v2732_v2  ;;  %v2734_v15 = vshll.u32 %v5757_v58, %v2731_v54 }
 0x3e9   : > { %v2575_v57 = vsub.s32 0, %v6826_v5  ;;  %v2466_v13 = vadd.s32 536870912, %v2465_v6  ;;  %v2737_v56 = vshll.u32 %v5758_v60, %v2731_v54  ;;  %v4662_v49 = vadd.s32 4294967169, %v2617_v45 }
 0x3ea   : > { %v2740_v39 = vshll.u32 %v5759_v63, %v2731_v54  ;;  %v2743_v20 = vshll.u32 %v5760_v1, %v2731_v54  ;;  %v2747_v26 = vshrl.u32 %v5762_v10, %v2732_v2  ;;  %v2595_v48 = vsub.s32 4, %v6815_v28 }
 0x3eb   : > { %v4659_v18 = vmin.u32 %v2575_v57, %v6826_v5  ;;  %v2467_v21 = vshrl.u32 %v2466_v13, 30  ;;  %v2736_v4 = vor.u32 %v2735_v41, %v2734_v15  ;;  %v2739_v36 = vor.u32 %v2738_v25, %v2737_v56 }
 0x3ec   : > { %v2742_v9 = vor.u32 %v2741_v17, %v2740_v39  ;;  %v2745_v59 = vor.u32 %v2744_v19, %v2743_v20  ;;  %v2746_v33 = vshll.u32 %v5761_v3, %v2731_v54  ;;  %v2733_v46 = vshrl.u32 %v5757_v58, %v2732_v2 }
 0x3ed   : > { %v2577_v42 = vclz %v4659_v18  ;;  %v2468_v62 = vshll.u32 %v2467_v21, 30  ;;  %v2491_v31 = vsub.s32 4, %v2467_v21  ;;  %vm2749_vm0 = vcmp.lt.s32.totalorder %v2730_v61, 1 }
 0x3ee   : > { %v2748_v55 = vor.u32 %v2747_v26, %v2746_v33  ;;  %vm2750_vm3 = vcmp.lt.s32.totalorder %v2730_v61, 2  ;;  %vm2751_vm4 = vcmp.lt.s32.totalorder %v2730_v61, 3  ;;  %vm6859_vm5 = vcmp.le.f32.partialorder %v2405_v37, 0.7853982 }
 0x3ef   : > { %v4660_v14 = vadd.s32 4294967294, %v2577_v42  ;;  %v6848_v24 = vsub.s32 %v2465_v6, %v2468_v62  ;;  %vm2752_vm6 = vcmp.lt.s32.totalorder %v2730_v61, 4  ;;  %v2757_v7 = vsel %vm2749_vm0, %v2736_v4, %v2739_v36 }
 0x3f0   : > { %v2754_v22 = vsel %vm2752_vm6, %v2742_v9, 2102212464  ;;  %v2758_v30 = vsel %vm2752_vm6, %v2745_v59, 920167782  ;;  %v2761_v37 = vsel %vm2749_vm0, %v2739_v36, %v2742_v9  ;;  %v2762_v41 = vsel %vm2752_vm6, %v2748_v55, 1326507024 }
 0x3f1   : > { %vm4661_vm2 = vcmp.lt.s32.totalorder %v4660_v14, 0  ;;  %v2471_v32 = vsub.s32 0, %v6848_v24  ;;  %v2759_v6 = vsel %vm2751_vm4, %v2742_v9, %v2758_v30  ;;  %v2596_v25 = vsel %vm2511_vm13, %v2595_v48, %v6815_v28 }
 0x3f2   : > { %v2580_v35 = vsel %vm4661_vm2, 0, %v4660_v14  ;;  %v2760_v13 = vsel %vm2750_vm3, %v2757_v7, %v2759_v6  ;;  %v2753_v17 = vsel %vm2749_vm0, %v2733_v46, %v2736_v4  ;;  %v2492_v56 = vsel %vm2407_vm14, %v2491_v31, %v2467_v21 }
 0x3f3   : > { %v2581_v34 = vsub.s32 32, %v2580_v35  ;;  %v2585_v0 = vsub.s32 4294967266, %v2580_v35  ;;  %v2582_v2 = vshll.u32 %v6826_v5, %v2580_v35  ;;  %v4655_v12 = vmin.u32 %v2471_v32, %v6848_v24 }
 0x3f4   : > { %v2755_v5 = vsel %vm2751_vm4, %v2739_v36, %v2754_v22  ;;  %v6880_v20 = vmul.u32.u64.low %v6830_v51, %v2760_v13  ;;  %v6881_v26 = vmul.u32.u64.high %v6830_v51, %v2760_v13, %v6880_v20  ;;  %v2598_v21 = vsel %vm6853_vm1, 0, %v2596_v25  ;;  %v4670_v13 = vld [vmem:[%s7573_s1 + $0x60] sm:$0xff] }
 0x3f5   : > { %v2583_v45 = vshrl.u32 %v2565_v43, %v2581_v34  ;;  %v2586_v57 = vadd.s32 127, %v2585_v0  ;;  %v2473_v18 = vclz %v4655_v12  ;;  %v2763_v43 = vsel %vm2751_vm4, %v2745_v59, %v2762_v41 }
 0x3f6   : > { %v2764_v39 = vsel %vm2750_vm3, %v2761_v37, %v2763_v43  ;;  %v2756_v48 = vsel %vm2750_vm3, %v2753_v17, %v2755_v5  ;;  %v2461_v36 = vadd.s32 %v6806_v44, %v6812_v11  ;;  %v2623_v14 = vadd.s32 1, %v4662_v49 }
 0x3f7   : > { %v2584_v19 = vor.u32 %v2583_v45, %v2582_v2  ;;  %v2587_v15 = vshll.u32 %v2586_v57, 23  ;;  %v4656_v42 = vadd.s32 4294967294, %v2473_v18  ;;  %v2494_v31 = vsel %vm6859_vm5, 0, %v2492_v56 }
 0x3f8   : > { %v6886_v62 = vmul.u32.u64.low %v6830_v51, %v2764_v39  ;;  %v6887_v4 = vmul.u32.u64.high %v6830_v51, %v2764_v39, %v6886_v62  ;;  %v2772_v55 = vmul.u32 %v6830_v51, %v2756_v48  ;;  %v2775_v35 = vadd.s32 1, %v6881_v26 }
 0x3f9   : > { %v2588_v28 = vor.u32 4788187, %v2587_v15  ;;  %vm4657_vm8 = vcmp.lt.s32.totalorder %v4656_v42, 0  ;;  %v2591_v59 = vcvt.s32.f32 %v2584_v19  ;;  %vm2624_vm9 = vcmp.gt.s32.totalorder %v2623_v14, 0 }
 0x3fa   : > { %v2476_v33 = vsel %vm4657_vm8, 0, %v4656_v42  ;;  %vm2774_vm7 = vc.u32 %v6887_v4, %v6880_v20  ;;  %v2625_v34 = vsel %vm2624_vm9, %v2623_v14, 0  ;;  %v2602_v22 = vadd.s32 3, %v2598_v21 }
 0x3fb   : > { %v2589_v9 = vand.u32 2147483647, %v2588_v28  ;;  %v2477_v61 = vsub.s32 32, %v2476_v33  ;;  %v2481_v46 = vsub.s32 4294967266, %v2476_v33  ;;  %v2478_v7 = vshll.u32 %v6848_v24, %v2476_v33 }
 0x3fc   : > { %v2776_v49 = vsel %vm2774_vm7, %v2775_v35, %v6881_v26  ;;  %v2627_v2 = vand.u32 31, %v2625_v34  ;;  %v2620_v6 = vand.u32 8388607, %v2613_v27  ;;  %v2498_v37 = vadd.s32 3, %v2494_v31 }
 0x3fd   : > { %v2592_v32 = vmul.f32 %v2591_v59, %v2589_v9  ;;  %v2479_v44 = vshrl.u32 %v2461_v36, %v2477_v61  ;;  %v2482_v11 = vadd.s32 127, %v2481_v46  ;;  %v2777_v30 = vadd.s32 %v2776_v49, %v2772_v55 }
 0x3fe   : > { %v2628_v57 = vsub.s32 32, %v2627_v2  ;;  %v6911_v18 = vand.u32 3, %v2602_v22  ;;  %v2852_v15 = vsel %vm702_vm15, %v4670_v13, 0  ;;  %v6916_v56 = vand.u32 3, %v2498_v37 }
 0x3ff   : > { %v2593_v0 = vxor.u32 2147483648, %v2592_v32  ;;  %v2480_v12 = vor.u32 %v2479_v44, %v2478_v7  ;;  %v2483_v51 = vshll.u32 %v2482_v11, 23  ;;  %v2778_v45 = vadd.s32 536870912, %v2777_v30 }
 0x400   : > { %v2621_v42 = vor.u32 8388608, %v2620_v6  ;;  %v2631_v39 = vshrl.u32 %v5758_v60, %v2628_v57  ;;  %v2634_v26 = vshrl.u32 %v5759_v63, %v2628_v57  ;;  %v2639_v28 = vshll.u32 %v5760_v1, %v2627_v2 }
 0x401   : > { %v2594_v24 = vsel %vm2511_vm13, %v2593_v0, %v2592_v32  ;;  %v2484_v25 = vor.u32 4788187, %v2483_v51  ;;  %v6913_v17 = vshrl.u32 %v2778_v45, 30  ;;  %v2487_v19 = vcvt.s32.f32 %v2480_v12 }
 0x402   : > { %v2597_v41 = vsel %vm6853_vm1, %v6726_v29, %v2594_v24  ;;  %v2640_v48 = vshrl.u32 %v5761_v3, %v2628_v57  ;;  %vm2608_vm10 = vcmp.eq.s32.totalorder %v6911_v18, 2  ;;  %v6926_v21 = vshrl.u32 %v2625_v34, 5 }
 0x403   : > { %5659 = vcosq.f32 %v2597_v41  ;;  %v2485_v5 = vand.u32 2147483647, %v2484_v25  ;;  %v2780_v43 = vshll.u32 %v6913_v17, 30  ;;  %v2630_v36 = vshll.u32 %v5757_v58, %v2627_v2 }
 0x404   : > { %5661 = vsinq.f32 %v2597_v41  ;;  %v2637_v14 = vshrl.u32 %v5760_v1, %v2628_v57  ;;  %vm2605_vm11 = vcmp.eq.s32.totalorder %v6911_v18, 0  ;;  %v2633_v59 = vshll.u32 %v5758_v60, %v2627_v2 }
 0x405   : > { %v2488_v40 = vmul.f32 %v2487_v19, %v2485_v5  ;;  %v6924_v62 = vsub.s32 %v2777_v30, %v2780_v43  ;;  %v2641_v33 = vor.u32 %v2640_v48, %v2639_v28  ;;  %v2643_v31 = vshrl.u32 %v5762_v10, %v2628_v57 }
 0x406   : > { %vm2604_vm12 = vcmp.lt.s32.totalorder %v6911_v18, 2  ;;  %v2773_v61 = vadd.s32 %v6880_v20, %v6887_v4  ;;  %v2636_v55 = vshll.u32 %v5759_v63, %v2627_v2  ;;  %v6938_v35 = vand.u32 4294901760, %v2852_v15 }
 0x407   : > { %v2489_v9 = vxor.u32 2147483648, %v2488_v40  ;;  %v2783_v46 = vsub.s32 0, %v6924_v62  ;;  %vm2601_vm13 = vweird.f32 %v6726_v29  ;;  %v2632_v7 = vor.u32 %v2631_v39, %v2630_v36 }
 0x408   : > { %v2635_v44 = vor.u32 %v2634_v26, %v2633_v59  ;;  %v2642_v11 = vshll.u32 %v5761_v3, %v2627_v2  ;;  %v2638_v4 = vor.u32 %v2637_v14, %v2636_v55  ;;  %vm2648_vm0 = vcmp.lt.s32.totalorder %v6926_v21, 4 }
 0x409   : > { %v2490_v32 = vsel %vm2407_vm14, %v2489_v9, %v2488_v40  ;;  %v4667_v20 = vmin.u32 %v2783_v46, %v6924_v62  ;;  %v2654_v0 = vsel %vm2648_vm0, %v2641_v33, 920167782  ;;  %v6951_v22 = vshll.u32 %v2621_v42, 8 }
 0x40a   : > { %v2493_v49 = vsel %vm6859_vm5, %v6728_v16, %v2490_v32  ;;  %v2644_v34 = vor.u32 %v2643_v31, %v2642_v11  ;;  %v2629_v2 = vshrl.u32 %v5757_v58, %v2628_v57  ;;  %v6955_v54 = vsub.f32 %v2852_v15, %v6938_v35 }
 0x40b   : > { %5663 = vcosq.f32 %v2493_v49  ;;  %v2785_v12 = vclz %v4667_v20  ;;  %vm2645_vm14 = vcmp.lt.s32.totalorder %v6926_v21, 1  ;;  %vm2646_vm1 = vcmp.lt.s32.totalorder %v6926_v21, 2 }
 0x40c   : > { %5665 = vsinq.f32 %v2493_v49  ;;  %vm2647_vm2 = vcmp.lt.s32.totalorder %v6926_v21, 3  ;;  %v2653_v45 = vsel %vm2645_vm14, %v2632_v7, %v2635_v44  ;;  %v2650_v41 = vsel %vm2648_vm0, %v2638_v4, 2102212464 }
 0x40d   : > { %v5660_v30 = vpop.eup %5659  ;;  %v4668_v37 = vadd.s32 4294967294, %v2785_v12  ;;  %v2655_v13 = vsel %vm2647_vm2, %v2638_v4, %v2654_v0  ;;  %v2657_v25 = vsel %vm2645_vm14, %v2635_v44, %v2638_v4  ;;  %v2658_v5 = vsel %vm2648_vm0, %v2644_v34, 1326507024 }
 0x40e   : > { %v5662_v51 = vpop.eup %5661  ;;  %v2609_v6 = vxor.u32 2147483648, %v5660_v30  ;;  %v2659_v15 = vsel %vm2647_vm2, %v2641_v33, %v2658_v5  ;;  %v2934_v43 = vand.u32 4294901760, %v6955_v54  ;;  %v2656_v40 = vsel %vm2646_vm1, %v2653_v45, %v2655_v13 }
 0x40f   : > { %v2606_v24 = vxor.u32 2147483648, %v5662_v51  ;;  %vm4669_vm3 = vcmp.lt.s32.totalorder %v4668_v37, 0  ;;  %v2660_v26 = vsel %vm2646_vm1, %v2657_v25, %v2659_v15  ;;  %v2649_v14 = vsel %vm2645_vm14, %v2629_v2, %v2632_v7 }
 0x410   : > { %v2610_v57 = vsel %vm2608_vm10, %v2609_v6, %v5662_v51  ;;  %v2788_v39 = vsel %vm4669_vm3, 0, %v4668_v37  ;;  %v2651_v18 = vsel %vm2647_vm2, %v2635_v44, %v2650_v41  ;;  %v2935_v33 = vsub.f32 %v6955_v54, %v2934_v43 }
 0x411   : > { %v2607_v19 = vsel %vm2605_vm11, %v5660_v30, %v2606_v24  ;;  %v2789_v48 = vsub.s32 32, %v2788_v39  ;;  %v2793_v36 = vsub.s32 4294967266, %v2788_v39  ;;  %v2790_v7 = vshll.u32 %v6924_v62, %v2788_v39 }
 0x412   : > { %v2611_v42 = vsel %vm2604_vm12, %v2607_v19, %v2610_v57  ;;  %v6992_v9 = vmul.u32.u64.low %v6951_v22, %v2660_v26  ;;  %v6993_v59 = vmul.u32.u64.high %v6951_v22, %v2660_v26, %v6992_v9  ;;  %v2936_v11 = vand.u32 4294901760, %v2935_v33 }
 0x413   : > { %v6985_v28 = vsel %vm2601_vm13, nan, %v2611_v42  ;;  %v2791_v31 = vshrl.u32 %v2773_v61, %v2789_v48  ;;  %v2794_v29 = vadd.s32 127, %v2793_v36  ;;  %v2652_v4 = vsel %vm2646_vm1, %v2649_v14, %v2651_v18 }
 0x414   : > { %v6999_v46 = vmul.u32.u64.low %v6951_v22, %v2656_v40  ;;  %v7000_v55 = vmul.u32.u64.high %v6951_v22, %v2656_v40, %v6999_v46  ;;  %vm2504_vm4 = vcmp.eq.s32.totalorder %v6916_v56, 2  ;;  %5073 = vmatprep.mubr.f32.mxu0 %v2936_v11  ;;  %vm2501_vm6 = vcmp.eq.s32.totalorder %v6916_v56, 0 }
 0x415   : > { %v5664_v32 = vpop.eup %5663  ;;  %v2795_v20 = vshll.u32 %v2794_v29, 23  ;;  %v2792_v0 = vor.u32 %v2791_v31, %v2790_v7  ;;  %vm2497_vm8 = vweird.f32 %v6728_v16  ;;  %vm2500_vm7 = vcmp.lt.s32.totalorder %v6916_v56, 2 }
 0x416   : > { %v5666_v49 = vpop.eup %5665  ;;  %v2505_v44 = vxor.u32 2147483648, %v5664_v32  ;;  %vm2670_vm5 = vc.u32 %v6993_v59, %v6999_v46  ;;  %v2671_v62 = vadd.s32 1, %v7000_v55  ;;  %v2668_v21 = vmul.u32 %v6951_v22, %v2652_v4 }
 0x417   : > { %v2502_v34 = vxor.u32 2147483648, %v5666_v49  ;;  %v2796_v30 = vor.u32 4788187, %v2795_v20  ;;  %v2867_v2 = vand.u32 4294901760, %v6985_v28  ;;  %v2799_v45 = vcvt.s32.f32 %v2792_v0 }
 0x418   : > { %v2506_v61 = vsel %vm2504_vm4, %v2505_v44, %v5666_v49  ;;  %v2672_v24 = vsel %vm2670_vm5, %v2671_v62, %v7000_v55  ;;  %vm2719_vm9 = vcmp.lt.s32.totalorder %v6736_v53, 0  ;;  %vm7028_vm10 = vcmp.le.f32.partialorder %v2717_v23, 0.7853982 }
 0x419   : > { %v2503_v12 = vsel %vm2501_vm6, %v5664_v32, %v2502_v34  ;;  %v2797_v6 = vand.u32 2147483647, %v2796_v30  ;;  %v2673_v13 = vadd.s32 %v2672_v24, %v2668_v21  ;;  %v2803_v36 = vsub.s32 4, %v6913_v17 }
 0x41a   : > { %v2507_v51 = vsel %vm2500_vm7, %v2503_v12, %v2506_v61  ;;  %v2669_v23 = vadd.s32 %v6999_v46, %v6993_v59  ;;  %vm7042_vm0 = vcmp.le.f32.partialorder %v2613_v27, 0.7853982  ;;  %vm2615_vm14 = vcmp.lt.s32.totalorder %v6742_v50, 0  ;;  %v4672_v27 = vld [vmem:[%s7573_s1 + $0x70] sm:$0xff] }
 0x41b   : > { %v7014_v37 = vsel %vm2497_vm8, nan, %v2507_v51  ;;  %v2800_v41 = vmul.f32 %v2799_v45, %v2797_v6  ;;  %v2674_v25 = vadd.s32 536870912, %v2673_v13  ;;  %v2804_v18 = vsel %vm2719_vm9, %v2803_v36, %v6913_v17 }
 0x41c   : > { %v2864_v57 = vand.u32 4294901760, %v7014_v37  ;;  %v2806_v29 = vsel %vm7028_vm10, 0, %v2804_v18  ;;  %vm2809_vm2 = vweird.f32 %v6736_v53  ;;  %vm2705_vm5 = vweird.f32 %v6742_v50 }
 0x41d   : > { %v2675_v56 = vshrl.u32 %v2674_v25, 30  ;;  %v2801_v22 = vxor.u32 2147483648, %v2800_v41  ;;  %v2810_v44 = vadd.s32 3, %v2806_v29 }
 0x41e   : > { %v7021_v16 = vpack.c.bf16 %v2867_v2, %v2864_v57 }
 0x41f   : > { %v2676_v5 = vshll.u32 %v2675_v56, 30  ;;  %v2802_v15 = vsel %vm2719_vm9, %v2801_v22, %v2800_v41  ;;  %v2811_v17 = vand.u32 3, %v2810_v44  ;;  %v2699_v46 = vsub.s32 4, %v2675_v56  ;;  %v4671_v41 = vld [vmem:[%s7573_s1 + $0x68] sm:$0xff] }
 0x420   : > { %5330 = vmatprep.subr.bf16.mxu0 %v7021_v16  ;;  %v2805_v26 = vsel %vm7028_vm10, %v6736_v53, %v2802_v15  ;;  %v2858_v15 = vsel %vm702_vm15, %v4672_v27, 0 }
 0x421   : > { %5332 = vmatpush3.bf16.msra.mxu0 %v7021_v16  ;;  %v2677_v19 = vsub.s32 %v2673_v13, %v2676_v5  ;;  %5667 = vcosq.f32 %v2805_v26  ;;  %vm2813_vm12 = vcmp.eq.s32.totalorder %v2811_v17, 0  ;;  %vm2816_vm13 = vcmp.eq.s32.totalorder %v2811_v17, 2 }
 0x422   : > { %5669 = vsinq.f32 %v2805_v26  ;;  %v2700_v45 = vsel %vm2615_vm14, %v2699_v46, %v2675_v56  ;;  %vm2812_vm1 = vcmp.lt.s32.totalorder %v2811_v17, 2  ;;  %v2855_v56 = vsel %vm702_vm15, %v4671_v41, 0 }
 0x423   : > { %v2679_v42 = vsub.s32 0, %v2677_v19  ;;  %v2702_v22 = vsel %vm7042_vm0, 0, %v2700_v45  ;;  %v7063_v5 = vsub.f32 %v7014_v37, %v2864_v57  ;;  %v7074_v26 = vand.u32 4294901760, %v2855_v56 }
 0x424   : > { %v7076_v53 = vand.u32 4294901760, %v2858_v15 }
 0x425   : > { %v4663_v40 = vmin.u32 %v2679_v42, %v2677_v19  ;;  %v4673_v42 = vld [vmem:[%s7573_s1 + $0x78] sm:$0xff]  ;;  %v7082_v36 = vsub.f32 %v2855_v56, %v7074_v26 }
 0x426   : > { %v2861_v37 = vsel %vm702_vm15, %v4673_v42, 0 }
 0x427   : > { %v2681_v48 = vclz %v4663_v40  ;;  %v2706_v40 = vadd.s32 3, %v2702_v22 }
 0x429   : > { %v4664_v14 = vadd.s32 4294967294, %v2681_v48  ;;  %v2975_v48 = vand.u32 4294901760, %v7063_v5 }
 0x42b   : > { %vm4665_vm11 = vcmp.lt.s32.totalorder %v4664_v14, 0  ;;  %v5668_v20 = vpop.eup %5667 }
 0x42c   : > { %v2684_v9 = vsel %vm4665_vm11, 0, %v4664_v14  ;;  %v5670_v34 = vpop.eup %5669  ;;  %v2817_v62 = vxor.u32 2147483648, %v5668_v20  ;;  %v7084_v14 = vand.u32 4294901760, %v2861_v37 }
 0x42d   : > { %v2685_v33 = vsub.s32 32, %v2684_v9  ;;  %v2689_v31 = vsub.s32 4294967266, %v2684_v9  ;;  %v2686_v55 = vshll.u32 %v2677_v19, %v2684_v9  ;;  %v2814_v30 = vxor.u32 2147483648, %v5670_v34 }
 0x42e   : > { %v2818_v6 = vsel %vm2816_vm13, %v2817_v62, %v5670_v34  ;;  %v7068_v19 = vsub.f32 %v6985_v28, %v2867_v2  ;;  %v2707_v2 = vand.u32 3, %v2706_v40  ;;  %v7087_v9 = vsub.f32 %v2858_v15, %v7076_v53 }
 0x42f   : > { %v2687_v32 = vshrl.u32 %v2669_v23, %v2685_v33  ;;  %v2690_v7 = vadd.s32 127, %v2689_v31  ;;  %v2815_v51 = vsel %vm2813_vm12, %v5668_v20, %v2814_v30  ;;  %v2976_v31 = vsub.f32 %v7063_v5, %v2975_v48 }
 0x430   : > { %v2819_v25 = vsel %vm2812_vm1, %v2815_v51, %v2818_v6  ;;  %v2982_v28 = vand.u32 4294901760, %v7068_v19  ;;  %vm2712_vm3 = vcmp.eq.s32.totalorder %v2707_v2, 2  ;;  %vm2709_vm4 = vcmp.eq.s32.totalorder %v2707_v2, 0 }
 0x431   : > { %v2688_v11 = vor.u32 %v2687_v32, %v2686_v55  ;;  %v2691_v49 = vshll.u32 %v2690_v7, 23  ;;  %v2820_v39 = vsel %vm2809_vm2, nan, %v2819_v25  ;;  %vm2708_vm6 = vcmp.lt.s32.totalorder %v2707_v2, 2 }
 0x432   : > { %v2873_v57 = vand.u32 4294901760, %v2820_v39  ;;  %v2983_v29 = vsub.f32 %v7068_v19, %v2982_v28  ;;  %v2954_v20 = vand.u32 4294901760, %v7087_v9  ;;  %v2977_v34 = vand.u32 4294901760, %v2976_v31 }
 0x433   : > { %v2692_v4 = vor.u32 4788187, %v2691_v49  ;;  %v2695_v61 = vcvt.s32.f32 %v2688_v11  ;;  %v2944_v11 = vand.u32 4294901760, %v7082_v36  ;;  %v2963_v49 = vsub.f32 %v2861_v37, %v7084_v14 }
 0x434   : > { %v7095_v55 = vsub.f32 %v2820_v39, %v2873_v57  ;;  %v2955_v46 = vsub.f32 %v7087_v9, %v2954_v20  ;;  %v5345_v15 = vpack.c.bf16 %v7068_v19, %v7063_v5  ;;  %v5361_v39 = vpack.c.bf16 %v2982_v28, %v2975_v48  ;;  %v2834_v5 = vpop.permute.xlu0 %2833 }
 0x435   : > { %v2693_v0 = vand.u32 2147483647, %v2692_v4  ;;  %v2945_v62 = vsub.f32 %v7082_v36, %v2944_v11 }
 0x437   : > { %v2696_v59 = vmul.f32 %v2695_v61, %v2693_v0  ;;  %v2984_v0 = vand.u32 4294901760, %v2983_v29  ;;  %v2996_v61 = vand.u32 4294901760, %v7095_v55  ;;  %v2946_v6 = vand.u32 4294901760, %v2945_v62 }
 0x439   : > { %v2697_v12 = vxor.u32 2147483648, %v2696_v59  ;;  %v5337_v21 = vpack.c.bf16 %v2984_v0, %v2977_v34 }
 0x43b   : > { %v2698_v24 = vsel %vm2615_vm14, %v2697_v12, %v2696_v59  ;;  %v2964_v59 = vand.u32 4294901760, %v2963_v49 }
 0x43c   : > { %v2701_v13 = vsel %vm7042_vm0, %v6742_v50, %v2698_v24  ;;  %v2997_v50 = vsub.f32 %v7095_v55, %v2996_v61 }
 0x43d   : > { %5671 = vcosq.f32 %v2701_v13  ;;  %v2965_v24 = vsub.f32 %v2963_v49, %v2964_v59 }
 0x43e   : > { %5673 = vsinq.f32 %v2701_v13  ;;  %v2956_v13 = vand.u32 4294901760, %v2955_v46  ;;  %v2998_v27 = vand.u32 4294901760, %v2997_v50 }
 0x43f   : > { %v2966_v25 = vand.u32 4294901760, %v2965_v24 }
 0x447   : > { %v5672_v18 = vpop.eup %5671 }
 0x448   : > { %v5674_v23 = vpop.eup %5673  ;;  %v2713_v33 = vxor.u32 2147483648, %v5672_v18 }
 0x449   : > { %v2710_v32 = vxor.u32 2147483648, %v5674_v23 }
 0x44a   : > { %v2714_v7 = vsel %vm2712_vm3, %v2713_v33, %v5674_v23 }
 0x44b   : > { %v2711_v44 = vsel %vm2709_vm4, %v5672_v18, %v2710_v32 }
 0x44c   : > { %v2715_v4 = vsel %vm2708_vm6, %v2711_v44, %v2714_v7 }
 0x44d   : > { %v2716_v17 = vsel %vm2705_vm5, nan, %v2715_v4 }
 0x44e   : > { %v2870_v30 = vand.u32 4294901760, %v2716_v17 }
 0x450   : > { %v5333_v12 = vpack.c.bf16 %v2873_v57, %v2870_v30  ;;  %v2988_v51 = vsub.f32 %v2716_v17, %v2870_v30 }
 0x452   : > { %5334 = vmatprep.subr.bf16.mxu0 %v5333_v12  ;;  %v2989_v45 = vand.u32 4294901760, %v2988_v51  ;;  %v5349_v42 = vpack.c.bf16 %v7095_v55, %v2988_v51 }
 0x453   : > { %5336 = vmatpush3.bf16.msra.mxu0 %v5333_v12 }
 0x454   : > { %5338 = vmatprep.subr.bf16.mxu0 %v5337_v21  ;;  %v2990_v41 = vsub.f32 %v2988_v51, %v2989_v45  ;;  %v5365_v40 = vpack.c.bf16 %v2996_v61, %v2989_v45 }
 0x456   : > { %5074 = vmatmul.mubr.f32.vlgmr.msra.gmra.mrb[4].mxu0 %v2946_v6  ;;  %v2991_v22 = vand.u32 4294901760, %v2990_v41 }
 0x457   : > { %5340 = vmatpush3.bf16.msra.mxu0 %v5337_v21  ;;  %5076 = vmatprep.mubr.f32.mxu0 %v2956_v13 }
 0x458   : > { %v5341_v56 = vpack.c.bf16 %v2998_v27, %v2991_v22 }
 0x45a   : > { %5077 = vmatmul.mubr.f32.gmra.mrb[6].mxu0 %v2966_v25  ;;  %5342 = vmatprep.subr.bf16.mxu0 %v5341_v56 }
 0x45b   : > { %5344 = vmatpush3.bf16.msra.mxu0 %v5341_v56  ;;  %5087 = vmatprep.mubr.f32.mxu0 %v6938_v35 }
 0x45c   : > { %5346 = vmatprep.subr.bf16.mxu0 %v5345_v15 }
 0x45e   : > { %5088 = vmatmul.mubr.f32.vlgmr.msra.gmra.mrb[4].mxu0 %v7074_v26 }
 0x45f   : > { %5348 = vmatpush3.bf16.msra.mxu0 %v5345_v15  ;;  %5090 = vmatprep.mubr.f32.mxu0 %v7076_v53 }
 0x460   : > { %5350 = vmatprep.subr.bf16.mxu0 %v5349_v42 }
 0x462   : > { %5091 = vmatmul.mubr.f32.gmra.mrb[6].mxu0 %v7084_v14 }
 0x463   : > { %5352 = vmatpush3.bf16.msra.mxu0 %v5349_v42  ;;  %5101 = vmatprep.mubr.f32.mxu0 %v6955_v54  ;;  %v2839_v54 = vpop.permute.xlu1 %2838 }
 0x464   : > { %5354 = vmatprep.subr.bf16.mxu0 %v7021_v16 }
 0x466   : > { %5102 = vmatmul.mubr.f32.vlgmr.msra.gmra.mrb[4].mxu0 %v7082_v36 }
 0x467   : > { %5356 = vmatpush3.bf16.msra.mxu0 %v7021_v16  ;;  %5104 = vmatprep.mubr.f32.mxu0 %v7087_v9  ;;  %v2849_v28 = vpop.permute.xlu1 %2848 }
 0x468   : > { %5358 = vmatprep.subr.bf16.mxu0 %v5333_v12 }
 0x46a   : > { %5105 = vmatmul.mubr.f32.gmra.mrb[6].mxu0 %v2963_v49 }
 0x46b   : > { %5360 = vmatpush3.bf16.msra.mxu0 %v5333_v12  ;;  %5115 = vmatprep.mubr.f32.mxu0 %v2934_v43 }
 0x46c   : > { %5362 = vmatprep.subr.bf16.mxu0 %v5361_v39 }
 0x46e   : > { %5116 = vmatmul.mubr.f32.vlgmr.msra.gmra.mrb[4].mxu0 %v2944_v11 }
 0x46f   : > { %5364 = vmatpush3.bf16.msra.mxu0 %v5361_v39  ;;  %5118 = vmatprep.mubr.f32.mxu0 %v2954_v20  ;;  %v2844_v20 = vpop.permute.xlu0 %2843 }
 0x470   : > { %5366 = vmatprep.subr.bf16.mxu0 %v5365_v40 }
 0x472   : > { %5119 = vmatmul.mubr.f32.gmra.mrb[6].mxu0 %v2964_v59 }
 0x473   : > { %5368 = vmatpush3.bf16.msra.mxu0 %v5365_v40  ;;  %5129 = vmatprep.mubr.f32.mxu0 %v6938_v35 }
 0x474   : > { %5370 = vmatprep.subr.bf16.mxu0 %v7021_v16 }
 0x476   : > { %5130 = vmatmul.mubr.f32.vlgmr.msra.gmra.mrb[4].mxu0 %v7074_v26 }
 0x477   : > { %5372 = vmatpush3.bf16.msra.mxu0 %v7021_v16  ;;  %5132 = vmatprep.mubr.f32.mxu0 %v7076_v53 }
 0x478   : > { %5374 = vmatprep.subr.bf16.mxu0 %v5333_v12 }
 0x47a   : > { %5133 = vmatmul.mubr.f32.gmra.mrb[6].mxu0 %v7084_v14 }
 0x47b   : > { %5376 = vmatpush3.bf16.msra.mxu0 %v5333_v12  ;;  %5143 = vmatprep.mubr.f32.mxu0 %v6938_v35 }
 0x47e   : > { %5144 = vmatmul.mubr.f32.vlgmr.msra.gmra.mrb[4].mxu0 %v7074_v26 }
 0x47f   : > { %5146 = vmatprep.mubr.f32.mxu0 %v7076_v53 }
 0x482   : > { %5147 = vmatmul.mubr.f32.gmra.mrb[6].mxu0 %v7084_v14 }
 0x551   : > { %v5145_v43 = vpop.f32.mrb[4].mxu0 }
 0x552   : > { %v7133_v19 = vadd.f32 %v5145_v43, %v2839_v54  ;;  %v3455_v16 = vpop.f32.mrb[5].mxu0 }
 0x553   : > { %v7135_v37 = vadd.f32 %v3455_v16, %v2834_v5 }
 0x554   : > { %v3581_v57 = vand.u32 2147483647, %v7133_v19  ;;  %v3584_v48 = vand.u32 2139095040, %v7133_v19  ;;  %vm3583_vm5 = vcmp.lt.s32.totalorder %v7133_v19, 0 }
 0x555   : > { %v3477_v35 = vand.u32 2147483647, %v7135_v37  ;;  %v3480_v26 = vand.u32 2139095040, %v7135_v37  ;;  %v5148_v53 = vpop.f32.mrb[6].mxu0  ;;  %vm3479_vm6 = vcmp.lt.s32.totalorder %v7135_v37, 0 }
 0x556   : > { %v3585_v2 = vshrl.u32 %v3584_v48, 23  ;;  %v3588_v36 = vand.u32 8388607, %v3581_v57  ;;  %v7143_v14 = vadd.f32 %v5148_v53, %v2849_v28  ;;  %v3467_v18 = vpop.f32.mrb[7].mxu0 }
 0x557   : > { %v3481_v9 = vshrl.u32 %v3480_v26, 23  ;;  %v3484_v23 = vand.u32 8388607, %v3477_v35  ;;  %v7149_v30 = vadd.f32 %v3467_v18, %v2844_v20 }
 0x558   : > { %v4682_v33 = vadd.s32 4294967169, %v3585_v2  ;;  %v3792_v29 = vand.u32 2139095040, %v7143_v14  ;;  %v3589_v55 = vor.u32 8388608, %v3588_v36  ;;  %v3789_v49 = vand.u32 2147483647, %v7143_v14 }
 0x559   : > { %v4678_v31 = vadd.s32 4294967169, %v3481_v9  ;;  %v3485_v7 = vor.u32 8388608, %v3484_v23 }
 0x55a   : > { %v3591_v32 = vadd.s32 1, %v4682_v33  ;;  %v3793_v44 = vshrl.u32 %v3792_v29, 23  ;;  %v7151_v62 = vshll.u32 %v3589_v55, 8  ;;  %v7159_v12 = vand.u32 8388607, %v3789_v49 }
 0x55b   : > { %v3487_v11 = vadd.s32 1, %v4678_v31  ;;  %v7155_v46 = vshll.u32 %v3485_v7, 8 }
 0x55c   : > { %vm3592_vm8 = vcmp.gt.s32.totalorder %v3591_v32, 0  ;;  %v4690_v34 = vadd.s32 4294967169, %v3793_v44 }
 0x55d   : > { %v3593_v4 = vsel %vm3592_vm8, %v3591_v32, 0  ;;  %vm3488_vm7 = vcmp.gt.s32.totalorder %v3487_v11, 0 }
 0x55e   : > { %v3594_v0 = vshrl.u32 %v3593_v4, 5  ;;  %v3595_v61 = vand.u32 31, %v3593_v4  ;;  %v3489_v17 = vsel %vm3488_vm7, %v3487_v11, 0  ;;  %v7162_v6 = vadd.s32 1, %v4690_v34 }
 0x55f   : > { %v7153_v59 = vshrl.u32 %v3489_v17, 5  ;;  %v3491_v50 = vand.u32 31, %v3489_v17  ;;  %vm7260_vm7 = vcmp.le.f32.partialorder %v3581_v57, 0.7853982 }
 0x560   : > { %v3596_v21 = vsub.s32 32, %v3595_v61  ;;  %v3598_v51 = vshll.u32 %v5757_v58, %v3595_v61  ;;  %v3601_v24 = vshll.u32 %v5758_v60, %v3595_v61  ;;  %v3604_v45 = vshll.u32 %v5759_v63, %v3595_v61 }
 0x561   : > { %v3607_v13 = vshll.u32 %v5760_v1, %v3595_v61  ;;  %v3610_v41 = vshll.u32 %v5761_v3, %v3595_v61  ;;  %vm3613_vm9 = vcmp.lt.s32.totalorder %v3594_v0, 1  ;;  %vm3614_vm10 = vcmp.lt.s32.totalorder %v3594_v0, 2 }
 0x562   : > { %v3599_v27 = vshrl.u32 %v5758_v60, %v3596_v21  ;;  %v3602_v25 = vshrl.u32 %v5759_v63, %v3596_v21  ;;  %v3605_v22 = vshrl.u32 %v5760_v1, %v3596_v21  ;;  %v3597_v56 = vshrl.u32 %v5757_v58, %v3596_v21 }
 0x563   : > { %v3608_v15 = vshrl.u32 %v5761_v3, %v3596_v21  ;;  %v3611_v42 = vshrl.u32 %v5762_v10, %v3596_v21  ;;  %v3492_v43 = vsub.s32 32, %v3491_v50  ;;  %vm3615_vm11 = vcmp.lt.s32.totalorder %v3594_v0, 3 }
 0x564   : > { %v3600_v39 = vor.u32 %v3599_v27, %v3598_v51  ;;  %v3603_v40 = vor.u32 %v3602_v25, %v3601_v24  ;;  %v3606_v54 = vor.u32 %v3605_v22, %v3604_v45  ;;  %vm3616_vm12 = vcmp.lt.s32.totalorder %v3594_v0, 4 }
 0x565   : > { %v3609_v5 = vor.u32 %v3608_v15, %v3607_v13  ;;  %v3612_v16 = vor.u32 %v3611_v42, %v3610_v41  ;;  %v3494_v9 = vshll.u32 %v5757_v58, %v3491_v50  ;;  %v3495_v31 = vshrl.u32 %v5758_v60, %v3492_v43 }
 0x566   : > { %v3617_v48 = vsel %vm3613_vm9, %v3597_v56, %v3600_v39  ;;  %v3618_v28 = vsel %vm3616_vm12, %v3606_v54, 2102212464  ;;  %v3621_v26 = vsel %vm3613_vm9, %v3600_v39, %v3603_v40  ;;  %v3625_v53 = vsel %vm3613_vm9, %v3603_v40, %v3606_v54 }
 0x567   : > { %v3619_v2 = vsel %vm3615_vm11, %v3603_v40, %v3618_v28  ;;  %v3622_v36 = vsel %vm3616_vm12, %v3609_v5, 920167782  ;;  %v3626_v18 = vsel %vm3616_vm12, %v3612_v16, 1326507024  ;;  %v3497_v29 = vshll.u32 %v5758_v60, %v3491_v50 }
 0x568   : > { %v3623_v23 = vsel %vm3615_vm11, %v3606_v54, %v3622_v36  ;;  %v3627_v33 = vsel %vm3615_vm11, %v3609_v5, %v3626_v18  ;;  %v3620_v55 = vsel %vm3614_vm10, %v3617_v48, %v3619_v2  ;;  %v3498_v11 = vshrl.u32 %v5759_v63, %v3492_v43 }
 0x569   : > { %v3624_v32 = vsel %vm3614_vm10, %v3621_v26, %v3623_v23  ;;  %v3628_v7 = vsel %vm3614_vm10, %v3625_v53, %v3627_v33  ;;  %v3496_v61 = vor.u32 %v3495_v31, %v3494_v9  ;;  %v3500_v21 = vshll.u32 %v5759_v63, %v3491_v50 }
 0x56a   : > { %v7185_v44 = vmul.u32.u64.low %v7151_v62, %v3628_v7  ;;  %v7186_v20 = vmul.u32.u64.high %v7151_v62, %v3628_v7, %v7185_v44  ;;  %v7189_v4 = vmul.u32.u64.low %v7151_v62, %v3624_v32  ;;  %v7190_v34 = vmul.u32.u64.high %v7151_v62, %v3624_v32, %v7189_v4 }
 0x56b   : > { %v3499_v17 = vor.u32 %v3498_v11, %v3497_v29  ;;  %v3501_v51 = vshrl.u32 %v5760_v1, %v3492_v43  ;;  %v3493_v24 = vshrl.u32 %v5757_v58, %v3492_v43  ;;  %v3503_v0 = vshll.u32 %v5760_v1, %v3491_v50 }
 0x56c   : > { %v3504_v45 = vshrl.u32 %v5761_v3, %v3492_v43  ;;  %v3507_v13 = vshrl.u32 %v5762_v10, %v3492_v43  ;;  %v3636_v41 = vmul.u32 %v7151_v62, %v3620_v55  ;;  %v3506_v25 = vshll.u32 %v5761_v3, %v3491_v50 }
 0x56d   : > { %v3502_v27 = vor.u32 %v3501_v51, %v3500_v21  ;;  %vm3509_vm13 = vcmp.lt.s32.totalorder %v7153_v59, 1  ;;  %vm3638_vm0 = vc.u32 %v7186_v20, %v7189_v4  ;;  %v3639_v22 = vadd.s32 1, %v7190_v34 }
 0x56e   : > { %v3505_v56 = vor.u32 %v3504_v45, %v3503_v0  ;;  %vm3510_vm14 = vcmp.lt.s32.totalorder %v7153_v59, 2  ;;  %v3508_v15 = vor.u32 %v3507_v13, %v3506_v25  ;;  %vm3511_vm1 = vcmp.lt.s32.totalorder %v7153_v59, 3 }
 0x56f   : > { %vm3512_vm2 = vcmp.lt.s32.totalorder %v7153_v59, 4  ;;  %v3517_v42 = vsel %vm3509_vm13, %v3496_v61, %v3499_v17  ;;  %v3640_v62 = vsel %vm3638_vm0, %v3639_v22, %v7190_v34  ;;  %v3521_v50 = vsel %vm3509_vm13, %v3499_v17, %v3502_v27 }
 0x570   : > { %v3514_v39 = vsel %vm3512_vm2, %v3502_v27, 2102212464  ;;  %v3518_v40 = vsel %vm3512_vm2, %v3505_v56, 920167782  ;;  %v3641_v54 = vadd.s32 %v3640_v62, %v3636_v41  ;;  %v3513_v43 = vsel %vm3509_vm13, %v3493_v24, %v3496_v61 }
 0x571   : > { %v3519_v5 = vsel %vm3511_vm1, %v3502_v27, %v3518_v40  ;;  %v3522_v16 = vsel %vm3512_vm2, %v3508_v15, 1326507024  ;;  %v3515_v48 = vsel %vm3511_vm1, %v3499_v17, %v3514_v39  ;;  %vm3800_vm3 = vcmp.gt.s32.totalorder %v7162_v6, 0 }
 0x572   : > { %v3520_v28 = vsel %vm3510_vm14, %v3517_v42, %v3519_v5  ;;  %v3523_v26 = vsel %vm3511_vm1, %v3505_v56, %v3522_v16  ;;  %v3642_v53 = vadd.s32 536870912, %v3641_v54  ;;  %v3801_v33 = vsel %vm3800_vm3, %v7162_v6, 0 }
 0x573   : > { %v3524_v2 = vsel %vm3510_vm14, %v3521_v50, %v3523_v26  ;;  %v7213_v36 = vmul.u32.u64.low %v7155_v46, %v3520_v28  ;;  %v7214_v18 = vmul.u32.u64.high %v7155_v46, %v3520_v28, %v7213_v36  ;;  %v3516_v29 = vsel %vm3510_vm14, %v3513_v43, %v3515_v48 }
 0x574   : > { %v7218_v9 = vmul.u32.u64.low %v7155_v46, %v3524_v2  ;;  %v7219_v23 = vmul.u32.u64.high %v7155_v46, %v3524_v2, %v7218_v9  ;;  %v7222_v31 = vshrl.u32 %v3642_v53, 30  ;;  %v3803_v55 = vand.u32 31, %v3801_v33 }
 0x575   : > { %v3688_v32 = vand.u32 2139095040, %v7149_v30  ;;  %v3535_v11 = vadd.s32 1, %v7214_v18  ;;  %v3797_v44 = vor.u32 8388608, %v7159_v12  ;;  %v3532_v34 = vmul.u32 %v7155_v46, %v3516_v29 }
 0x576   : > { %v3644_v7 = vshll.u32 %v7222_v31, 30  ;;  %vm3534_vm4 = vc.u32 %v7219_v23, %v7213_v36  ;;  %v3804_v6 = vsub.s32 32, %v3803_v55  ;;  %v3685_v0 = vand.u32 2147483647, %v7149_v30 }
 0x577   : > { %v3536_v59 = vsel %vm3534_vm4, %v3535_v11, %v7214_v18  ;;  %v3689_v21 = vshrl.u32 %v3688_v32, 23  ;;  %v7237_v24 = vshll.u32 %v3797_v44, 8  ;;  %v3637_v12 = vadd.s32 %v7189_v4, %v7186_v20 }
 0x578   : > { %v7233_v61 = vsub.s32 %v3641_v54, %v3644_v7  ;;  %v3537_v17 = vadd.s32 %v3536_v59, %v3532_v34  ;;  %v3807_v46 = vshrl.u32 %v5758_v60, %v3804_v6  ;;  %v3810_v13 = vshrl.u32 %v5759_v63, %v3804_v6 }
 0x579   : > { %v3802_v27 = vshrl.u32 %v3801_v33, 5  ;;  %v3813_v25 = vshrl.u32 %v5760_v1, %v3804_v6  ;;  %v3816_v22 = vshrl.u32 %v5761_v3, %v3804_v6  ;;  %v3806_v15 = vshll.u32 %v5757_v58, %v3803_v55 }
 0x57a   : > { %v3647_v51 = vsub.s32 0, %v7233_v61  ;;  %v3538_v45 = vadd.s32 536870912, %v3537_v17  ;;  %v3809_v42 = vshll.u32 %v5758_v60, %v3803_v55  ;;  %v4686_v62 = vadd.s32 4294967169, %v3689_v21 }
 0x57b   : > { %v3812_v4 = vshll.u32 %v5759_v63, %v3803_v55  ;;  %v3815_v39 = vshll.u32 %v5760_v1, %v3803_v55  ;;  %v3819_v40 = vshrl.u32 %v5762_v10, %v3804_v6  ;;  %v3667_v50 = vsub.s32 4, %v7222_v31 }
 0x57c   : > { %v4683_v41 = vmin.u32 %v3647_v51, %v7233_v61  ;;  %v3539_v56 = vshrl.u32 %v3538_v45, 30  ;;  %v3808_v43 = vor.u32 %v3807_v46, %v3806_v15  ;;  %v3811_v5 = vor.u32 %v3810_v13, %v3809_v42 }
 0x57d   : > { %v3814_v48 = vor.u32 %v3813_v25, %v3812_v4  ;;  %v3817_v28 = vor.u32 %v3816_v22, %v3815_v39  ;;  %v3818_v26 = vshll.u32 %v5761_v3, %v3803_v55  ;;  %v3805_v18 = vshrl.u32 %v5757_v58, %v3804_v6 }
 0x57e   : > { %v3649_v20 = vclz %v4683_v41  ;;  %v3540_v54 = vshll.u32 %v3539_v56, 30  ;;  %v3563_v2 = vsub.s32 4, %v3539_v56  ;;  %vm3821_vm8 = vcmp.lt.s32.totalorder %v3802_v27, 1 }
 0x57f   : > { %v3820_v33 = vor.u32 %v3819_v40, %v3818_v26  ;;  %vm3822_vm10 = vcmp.lt.s32.totalorder %v3802_v27, 2  ;;  %vm3823_vm11 = vcmp.lt.s32.totalorder %v3802_v27, 3  ;;  %vm7266_vm12 = vcmp.le.f32.partialorder %v3477_v35, 0.7853982 }
 0x580   : > { %v4684_v16 = vadd.s32 4294967294, %v3649_v20  ;;  %v7255_v53 = vsub.s32 %v3537_v17, %v3540_v54  ;;  %vm3824_vm13 = vcmp.lt.s32.totalorder %v3802_v27, 4  ;;  %v3829_v7 = vsel %vm3821_vm8, %v3808_v43, %v3811_v5 }
 0x581   : > { %v3826_v44 = vsel %vm3824_vm13, %v3814_v48, 2102212464  ;;  %v3830_v34 = vsel %vm3824_vm13, %v3817_v28, 920167782  ;;  %v3833_v35 = vsel %vm3821_vm8, %v3811_v5, %v3814_v48  ;;  %v3834_v46 = vsel %vm3824_vm13, %v3820_v33, 1326507024 }
 0x582   : > { %vm4685_vm9 = vcmp.lt.s32.totalorder %v4684_v16, 0  ;;  %v3543_v32 = vsub.s32 0, %v7255_v53  ;;  %v3831_v17 = vsel %vm3823_vm11, %v3814_v48, %v3830_v34  ;;  %v3668_v13 = vsel %vm3583_vm5, %v3667_v50, %v7222_v31 }
 0x583   : > { %v3652_v29 = vsel %vm4685_vm9, 0, %v4684_v16  ;;  %v3832_v45 = vsel %vm3822_vm10, %v3829_v7, %v3831_v17  ;;  %v3825_v25 = vsel %vm3821_vm8, %v3805_v18, %v3808_v43  ;;  %v3564_v42 = vsel %vm3479_vm6, %v3563_v2, %v3539_v56 }
 0x584   : > { %v3653_v57 = vsub.s32 32, %v3652_v29  ;;  %v3657_v11 = vsub.s32 4294967266, %v3652_v29  ;;  %v3654_v6 = vshll.u32 %v7233_v61, %v3652_v29  ;;  %v4679_v59 = vmin.u32 %v3543_v32, %v7255_v53 }
 0x585   : > { %v3827_v61 = vsel %vm3823_vm11, %v3811_v5, %v3826_v44  ;;  %v7287_v39 = vmul.u32.u64.low %v7237_v24, %v3832_v45  ;;  %v7288_v40 = vmul.u32.u64.high %v7237_v24, %v3832_v45, %v7287_v39  ;;  %v3670_v56 = vsel %vm7260_vm7, 0, %v3668_v13 }
 0x586   : > { %v3655_v21 = vshrl.u32 %v3637_v12, %v3653_v57  ;;  %v3658_v51 = vadd.s32 127, %v3657_v11  ;;  %v3545_v41 = vclz %v4679_v59  ;;  %v3835_v12 = vsel %vm3823_vm11, %v3817_v28, %v3834_v46 }
 0x587   : > { %v3836_v4 = vsel %vm3822_vm10, %v3833_v35, %v3835_v12  ;;  %v3828_v50 = vsel %vm3822_vm10, %v3825_v25, %v3827_v61  ;;  %v3533_v5 = vadd.s32 %v7213_v36, %v7219_v23  ;;  %v3695_v16 = vadd.s32 1, %v4686_v62 }
 0x588   : > { %v3656_v22 = vor.u32 %v3655_v21, %v3654_v6  ;;  %v3659_v15 = vshll.u32 %v3658_v51, 23  ;;  %v4680_v20 = vadd.s32 4294967294, %v3545_v41  ;;  %v3566_v2 = vsel %vm7266_vm12, 0, %v3564_v42 }
 0x589   : > { %v7293_v54 = vmul.u32.u64.low %v7237_v24, %v3836_v4  ;;  %v7294_v43 = vmul.u32.u64.high %v7237_v24, %v3836_v4, %v7293_v54  ;;  %v3844_v33 = vmul.u32 %v7237_v24, %v3828_v50  ;;  %v3847_v29 = vadd.s32 1, %v7288_v40  ;;  %v4694_v24 = vld [vmem:[%s7573_s1 + $0x80] sm:$0xff] }
 0x58a   : > { %v3660_v31 = vor.u32 4788187, %v3659_v15  ;;  %vm4681_vm0 = vcmp.lt.s32.totalorder %v4680_v20, 0  ;;  %v3663_v28 = vcvt.s32.f32 %v3656_v22  ;;  %vm3696_vm1 = vcmp.gt.s32.totalorder %v3695_v16, 0 }
 0x58b   : > { %v3548_v26 = vsel %vm4681_vm0, 0, %v4680_v20  ;;  %vm3846_vm14 = vc.u32 %v7294_v43, %v7287_v39  ;;  %v3697_v57 = vsel %vm3696_vm1, %v3695_v16, 0  ;;  %v3674_v44 = vadd.s32 3, %v3670_v56 }
 0x58c   : > { %v3661_v48 = vand.u32 2147483647, %v3660_v31  ;;  %v3549_v27 = vsub.s32 32, %v3548_v26  ;;  %v3553_v18 = vsub.s32 4294967266, %v3548_v26  ;;  %v3550_v7 = vshll.u32 %v7255_v53, %v3548_v26 }
 0x58d   : > { %v3848_v62 = vsel %vm3846_vm14, %v3847_v29, %v7288_v40  ;;  %v3699_v6 = vand.u32 31, %v3697_v57  ;;  %v3570_v53 = vadd.s32 3, %v3566_v2  ;;  %v3692_v51 = vand.u32 8388607, %v3685_v0 }
 0x58e   : > { %v3664_v32 = vmul.f32 %v3663_v28, %v3661_v48  ;;  %v3551_v36 = vshrl.u32 %v3533_v5, %v3549_v27  ;;  %v3554_v23 = vadd.s32 127, %v3553_v18  ;;  %v3849_v34 = vadd.s32 %v3848_v62, %v3844_v33 }
 0x58f   : > { %v3700_v45 = vsub.s32 32, %v3699_v6  ;;  %v3925_v41 = vsel %vm702_vm15, %v4694_v24, 0  ;;  %v7319_v25 = vand.u32 3, %v3674_v44  ;;  %v7323_v42 = vand.u32 3, %v3570_v53 }
 0x590   : > { %v3665_v11 = vxor.u32 2147483648, %v3664_v32  ;;  %v3552_v59 = vor.u32 %v3551_v36, %v3550_v7  ;;  %v3555_v17 = vshll.u32 %v3554_v23, 23  ;;  %v3850_v21 = vadd.s32 536870912, %v3849_v34 }
 0x591   : > { %v3693_v20 = vor.u32 8388608, %v3692_v51  ;;  %v3703_v4 = vshrl.u32 %v5758_v60, %v3700_v45  ;;  %v7327_v9 = vand.u32 4294901760, %v3925_v41  ;;  %v3706_v31 = vshrl.u32 %v5759_v63, %v3700_v45 }
 0x592   : > { %v3666_v35 = vsel %vm3583_vm5, %v3665_v11, %v3664_v32  ;;  %v3556_v13 = vor.u32 4788187, %v3555_v17  ;;  %v7321_v61 = vshrl.u32 %v3850_v21, 30  ;;  %v3559_v15 = vcvt.s32.f32 %v3552_v59 }
 0x593   : > { %v3669_v46 = vsel %vm7260_vm7, %v7133_v19, %v3666_v35  ;;  %v3711_v50 = vshll.u32 %v5760_v1, %v3699_v6  ;;  %v3712_v54 = vshrl.u32 %v5761_v3, %v3700_v45  ;;  %vm3680_vm2 = vcmp.eq.s32.totalorder %v7319_v25, 2 }
 0x594   : > { %5675 = vcosq.f32 %v3669_v46  ;;  %v3557_v22 = vand.u32 2147483647, %v3556_v13  ;;  %v3852_v12 = vshll.u32 %v7321_v61, 30  ;;  %v7335_v5 = vshrl.u32 %v3697_v57, 5 }
 0x595   : > { %5677 = vsinq.f32 %v3669_v46  ;;  %v3702_v16 = vshll.u32 %v5757_v58, %v3699_v6  ;;  %v3709_v48 = vshrl.u32 %v5760_v1, %v3700_v45  ;;  %vm3677_vm3 = vcmp.eq.s32.totalorder %v7319_v25, 0 }
 0x596   : > { %v3560_v40 = vmul.f32 %v3559_v15, %v3557_v22  ;;  %v7333_v56 = vsub.s32 %v3849_v34, %v3852_v12  ;;  %v3705_v26 = vshll.u32 %v5758_v60, %v3699_v6  ;;  %v3713_v2 = vor.u32 %v3712_v54, %v3711_v50 }
 0x597   : > { %v3715_v27 = vshrl.u32 %v5762_v10, %v3700_v45  ;;  %vm3676_vm4 = vcmp.lt.s32.totalorder %v7319_v25, 2  ;;  %v3845_v18 = vadd.s32 %v7287_v39, %v7294_v43  ;;  %v3708_v29 = vshll.u32 %v5759_v63, %v3699_v6 }
 0x598   : > { %v3561_v28 = vxor.u32 2147483648, %v3560_v40  ;;  %v3855_v33 = vsub.s32 0, %v7333_v56  ;;  %v7347_v32 = vshll.u32 %v3693_v20, 8  ;;  %vm3673_vm5 = vweird.f32 %v7133_v19 }
 0x599   : > { %v3704_v60 = vor.u32 %v3703_v4, %v3702_v16  ;;  %v3707_v7 = vor.u32 %v3706_v31, %v3705_v26  ;;  %v3714_v10 = vshll.u32 %v5761_v3, %v3699_v6  ;;  %v3710_v43 = vor.u32 %v3709_v48, %v3708_v29 }
 0x59a   : > { %v3562_v1 = vsel %vm3479_vm6, %v3561_v28, %v3560_v40  ;;  %v4691_v39 = vmin.u32 %v3855_v33, %v7333_v56  ;;  %vm3720_vm8 = vcmp.lt.s32.totalorder %v7335_v5, 4  ;;  %v3701_v63 = vshrl.u32 %v5757_v58, %v3700_v45 }
 0x59b   : > { %v3565_v36 = vsel %vm7266_vm12, %v7135_v37, %v3562_v1  ;;  %v3716_v23 = vor.u32 %v3715_v27, %v3714_v10  ;;  %v3726_v62 = vsel %vm3720_vm8, %v3713_v2, 920167782  ;;  %vm3717_vm6 = vcmp.lt.s32.totalorder %v7335_v5, 1 }
 0x59c   : > { %5679 = vcosq.f32 %v3565_v36  ;;  %v3857_v11 = vclz %v4691_v39  ;;  %v7363_v3 = vsub.f32 %v3925_v41, %v7327_v9  ;;  %vm3718_vm7 = vcmp.lt.s32.totalorder %v7335_v5, 2 }
 0x59d   : > { %5681 = vsinq.f32 %v3565_v36  ;;  %vm3719_vm9 = vcmp.lt.s32.totalorder %v7335_v5, 3  ;;  %v3721_v34 = vsel %vm3717_vm6, %v3701_v63, %v3704_v60  ;;  %v3725_v24 = vsel %vm3717_vm6, %v3704_v60, %v3707_v7 }
 0x59e   : > { %v5676_v57 = vpop.eup %5675  ;;  %v4692_v6 = vadd.s32 4294967294, %v3857_v11  ;;  %v3727_v59 = vsel %vm3719_vm9, %v3710_v43, %v3726_v62  ;;  %v3722_v53 = vsel %vm3720_vm8, %v3710_v43, 2102212464  ;;  %v3729_v35 = vsel %vm3717_vm6, %v3707_v7, %v3710_v43 }
 0x59f   : > { %v5678_v55 = vpop.eup %5677  ;;  %v3681_v44 = vxor.u32 2147483648, %v5676_v57  ;;  %v3730_v21 = vsel %vm3720_vm8, %v3716_v23, 1326507024  ;;  %v4007_v46 = vand.u32 4294901760, %v7363_v3  ;;  %v3728_v22 = vsel %vm3718_vm7, %v3725_v24, %v3727_v59 }
 0x5a0   : > { %v3678_v58 = vxor.u32 2147483648, %v5678_v55  ;;  %vm4693_vm10 = vcmp.lt.s32.totalorder %v4692_v6, 0  ;;  %v3731_v45 = vsel %vm3719_vm9, %v3713_v2, %v3730_v21  ;;  %v3723_v40 = vsel %vm3719_vm9, %v3707_v7, %v3722_v53 }
 0x5a1   : > { %v3682_v17 = vsel %vm3680_vm2, %v3681_v44, %v5678_v55  ;;  %v3860_v41 = vsel %vm4693_vm10, 0, %v4692_v6  ;;  %v3732_v15 = vsel %vm3718_vm7, %v3729_v35, %v3731_v45  ;;  %v4008_v54 = vsub.f32 %v7363_v3, %v4007_v46 }
 0x5a2   : > { %v3679_v51 = vsel %vm3677_vm3, %v5676_v57, %v3678_v58  ;;  %v3861_v20 = vsub.s32 32, %v3860_v41  ;;  %v3865_v4 = vsub.s32 4294967266, %v3860_v41  ;;  %v3862_v31 = vshll.u32 %v7333_v56, %v3860_v41 }
 0x5a3   : > { %v3683_v13 = vsel %vm3676_vm4, %v3679_v51, %v3682_v17  ;;  %v7392_v25 = vmul.u32.u64.low %v7347_v32, %v3732_v15  ;;  %v7393_v50 = vmul.u32.u64.high %v7347_v32, %v3732_v15, %v7392_v25  ;;  %v4009_v2 = vand.u32 4294901760, %v4008_v54 }
 0x5a4   : > { %v3684_v12 = vsel %vm3673_vm5, nan, %v3683_v13  ;;  %v3863_v16 = vshrl.u32 %v3845_v18, %v3861_v20  ;;  %v3866_v48 = vadd.s32 127, %v3865_v4  ;;  %v3724_v1 = vsel %vm3718_vm7, %v3721_v34, %v3723_v40 }
 0x5a5   : > { %v7399_v19 = vmul.u32.u64.low %v7347_v32, %v3728_v22  ;;  %v7400_v28 = vmul.u32.u64.high %v7347_v32, %v3728_v22, %v7399_v19  ;;  %vm3573_vm11 = vcmp.eq.s32.totalorder %v7323_v42, 0  ;;  %vm3576_vm12 = vcmp.eq.s32.totalorder %v7323_v42, 2  ;;  %5157 = vmatprep.mubr.f32.mxu1 %v4009_v2 }
 0x5a6   : > { %v5680_v26 = vpop.eup %5679  ;;  %v3864_v29 = vor.u32 %v3863_v16, %v3862_v31  ;;  %v3867_v56 = vshll.u32 %v3866_v48, 23  ;;  %v7408_v18 = vadd.f32 %v3684_v12, %v6573_v52  ;;  %vm3569_vm0 = vweird.f32 %v7135_v37 }
 0x5a7   : > { %v5682_v27 = vpop.eup %5681  ;;  %v3577_v33 = vxor.u32 2147483648, %v5680_v26  ;;  %vm3742_vm13 = vc.u32 %v7393_v50, %v7399_v19  ;;  %v3743_v36 = vadd.s32 1, %v7400_v28  ;;  %vm3572_vm14 = vcmp.lt.s32.totalorder %v7323_v42, 2 }
 0x5a8   : > { %v3574_v60 = vxor.u32 2147483648, %v5682_v27  ;;  %v3868_v10 = vor.u32 4788187, %v3867_v56  ;;  %v3740_v39 = vmul.u32 %v7347_v32, %v3724_v1  ;;  %v3871_v23 = vcvt.s32.f32 %v3864_v29 }
 0x5a9   : > { %v3578_v7 = vsel %vm3576_vm12, %v3577_v33, %v5682_v27  ;;  %v3744_v62 = vsel %vm3742_vm13, %v3743_v36, %v7400_v28  ;;  %v3940_v52 = vand.u32 4294901760, %v7408_v18  ;;  %vm3791_vm1 = vcmp.lt.s32.totalorder %v7143_v14, 0 }
 0x5aa   : > { %v3575_v5 = vsel %vm3573_vm11, %v5680_v26, %v3574_v60  ;;  %v3869_v63 = vand.u32 2147483647, %v3868_v10  ;;  %v3745_v11 = vadd.s32 %v3744_v62, %v3740_v39  ;;  %vm7431_vm2 = vcmp.le.f32.partialorder %v3789_v49, 0.7853982  ;;  %v4695_v39 = vld [vmem:[%s7573_s1 + $0x88] sm:$0xff] }
 0x5ab   : > { %v3579_v43 = vsel %vm3572_vm14, %v3575_v5, %v3578_v7  ;;  %v3875_v21 = vsub.s32 4, %v7321_v61  ;;  %v3741_v22 = vadd.s32 %v7399_v19, %v7393_v50  ;;  %vm3687_vm8 = vcmp.lt.s32.totalorder %v7149_v30, 0 }
 0x5ac   : > { %v3580_v57 = vsel %vm3569_vm0, nan, %v3579_v43  ;;  %v3872_v44 = vmul.f32 %v3871_v23, %v3869_v63  ;;  %v3746_v34 = vadd.s32 536870912, %v3745_v11  ;;  %vm3686_vm7 = vcmp.le.f32.partialorder %v3685_v0, 0.7853982  ;;  %v4696_v63 = vld [vmem:[%s7573_s1 + $0x90] sm:$0xff] }
 0x5ad   : > { %v7417_v55 = vadd.f32 %v3580_v57, %v6602_v47  ;;  %v3876_v13 = vsel %vm3791_vm1, %v3875_v21, %v7321_v61  ;;  %vm3881_vm9 = vweird.f32 %v7143_v14  ;;  %v3928_v23 = vsel %vm702_vm15, %v4695_v39, 0 }
 0x5ae   : > { %v3873_v42 = vxor.u32 2147483648, %v3872_v44  ;;  %v3747_v58 = vshrl.u32 %v3746_v34, 30  ;;  %v3878_v49 = vsel %vm7431_vm2, 0, %v3876_v13  ;;  %v7458_v62 = vsub.f32 %v7408_v18, %v3940_v52 }
 0x5af   : > { %v3937_v37 = vand.u32 4294901760, %v7417_v55  ;;  %v3882_v31 = vadd.s32 3, %v3878_v49  ;;  %v7470_v34 = vand.u32 4294901760, %v3928_v23  ;;  %vm3777_vm12 = vweird.f32 %v7149_v30 }
 0x5b0   : > { %v3748_v6 = vshll.u32 %v3747_v58, 30  ;;  %v3874_v24 = vsel %vm3791_vm1, %v3873_v42, %v3872_v44  ;;  %v3771_v56 = vsub.s32 4, %v3747_v58  ;;  %v4697_v44 = vld [vmem:[%s7573_s1 + $0x98] sm:$0xff] }
 0x5b1   : > { %v7424_v32 = vpack.c.bf16 %v3940_v52, %v3937_v37  ;;  %v3877_v53 = vsel %vm7431_vm2, %v7143_v14, %v3874_v24  ;;  %v3883_v26 = vand.u32 3, %v3882_v31  ;;  %v7464_v57 = vsub.f32 %v7417_v55, %v3937_v37 }
 0x5b2   : > { %v3749_v47 = vsub.s32 %v3745_v11, %v3748_v6  ;;  %5683 = vcosq.f32 %v3877_v53  ;;  %v3772_v7 = vsel %vm3687_vm8, %v3771_v56, %v3747_v58  ;;  %v3931_v11 = vsel %vm702_vm15, %v4696_v63, 0 }
 0x5b3   : > { %5378 = vmatprep.subr.bf16.mxu1 %v7424_v32  ;;  %5685 = vsinq.f32 %v3877_v53  ;;  %vm3885_vm4 = vcmp.eq.s32.totalorder %v3883_v26, 0  ;;  %vm3888_vm5 = vcmp.eq.s32.totalorder %v3883_v26, 2  ;;  %vm3884_vm6 = vcmp.lt.s32.totalorder %v3883_v26, 2 }
 0x5b4   : > { %5380 = vmatpush3.bf16.msra.mxu1 %v7424_v32  ;;  %v3751_v17 = vsub.s32 0, %v3749_v47  ;;  %v3774_v5 = vsel %vm3686_vm7, 0, %v3772_v7  ;;  %v4052_v58 = vand.u32 4294901760, %v7458_v62  ;;  %v7473_v18 = vand.u32 4294901760, %v3931_v11 }
 0x5b5   : > { %v3778_v0 = vadd.s32 3, %v3774_v5  ;;  %v4045_v6 = vand.u32 4294901760, %v7464_v57 }
 0x5b6   : > { %v4687_v35 = vmin.u32 %v3751_v17, %v3749_v47  ;;  %v4053_v53 = vsub.f32 %v7458_v62, %v4052_v58 }
 0x5b7   : > { %v3779_v42 = vand.u32 3, %v3778_v0 }
 0x5b8   : > { %v3753_v51 = vclz %v4687_v35  ;;  %v7486_v35 = vsub.f32 %v3931_v11, %v7473_v18 }
 0x5b9   : > { %vm3784_vm10 = vcmp.eq.s32.totalorder %v3779_v42, 2  ;;  %vm3780_vm11 = vcmp.lt.s32.totalorder %v3779_v42, 2 }
 0x5ba   : > { %v4688_v45 = vadd.s32 4294967294, %v3753_v51  ;;  %v4046_v51 = vsub.f32 %v7464_v57, %v4045_v6 }
 0x5bc   : > { %vm4689_vm3 = vcmp.lt.s32.totalorder %v4688_v45, 0  ;;  %v5684_v25 = vpop.eup %5683 }
 0x5bd   : > { %v3756_v41 = vsel %vm4689_vm3, 0, %v4688_v45  ;;  %v5686_v48 = vpop.eup %5685  ;;  %v3889_v2 = vxor.u32 2147483648, %v5684_v25 }
 0x5be   : > { %v3757_v15 = vsub.s32 32, %v3756_v41  ;;  %v3761_v12 = vsub.s32 4294967266, %v3756_v41  ;;  %v3758_v20 = vshll.u32 %v3749_v47, %v3756_v41  ;;  %v3886_v61 = vxor.u32 2147483648, %v5686_v48 }
 0x5bf   : > { %v3890_v19 = vsel %vm3888_vm5, %v3889_v2, %v5686_v48  ;;  %v7478_v47 = vsub.f32 %v3928_v23, %v7470_v34 }
 0x5c0   : > { %v3759_v4 = vshrl.u32 %v3741_v22, %v3757_v15  ;;  %v3762_v40 = vadd.s32 127, %v3761_v12  ;;  %v3887_v50 = vsel %vm3885_vm4, %v5684_v25, %v3886_v61  ;;  %v4026_v12 = vand.u32 4294901760, %v7486_v35 }
 0x5c1   : > { %v3891_v10 = vsel %vm3884_vm6, %v3887_v50, %v3890_v19  ;;  %v4017_v49 = vand.u32 4294901760, %v7478_v47 }
 0x5c2   : > { %v3760_v54 = vor.u32 %v3759_v4, %v3758_v20  ;;  %v3763_v16 = vshll.u32 %v3762_v40, 23  ;;  %v3892_v43 = vsel %vm3881_vm9, nan, %v3891_v10  ;;  %v4047_v4 = vand.u32 4294901760, %v4046_v51 }
 0x5c3   : > { %v3896_v14 = vadd.f32 %v3892_v43, %v6654_v38  ;;  %v3934_v38 = vsel %vm702_vm15, %v4697_v44, 0  ;;  %vm3781_vm15 = vcmp.eq.s32.totalorder %v3779_v42, 0  ;;  %v4054_v40 = vand.u32 4294901760, %v4053_v53 }
 0x5c4   : > { %v3764_v28 = vor.u32 4788187, %v3763_v16  ;;  %v3767_v33 = vcvt.s32.f32 %v3760_v54  ;;  %v7480_v59 = vand.u32 4294901760, %v3934_v38  ;;  %v4018_v54 = vsub.f32 %v7478_v47, %v4017_v49 }
 0x5c5   : > { %v3946_v52 = vand.u32 4294901760, %v3896_v14  ;;  %v4027_v48 = vsub.f32 %v7486_v35, %v4026_v12  ;;  %v5409_v10 = vpack.c.bf16 %v4052_v58, %v4045_v6 }
 0x5c6   : > { %v3765_v27 = vand.u32 2147483647, %v3764_v28  ;;  %v4034_v22 = vsub.f32 %v3934_v38, %v7480_v59  ;;  %v5385_v28 = vpack.c.bf16 %v4054_v40, %v4047_v4  ;;  %v4019_v2 = vand.u32 4294901760, %v4018_v54 }
 0x5c7   : > { %v4065_v45 = vsub.f32 %v3896_v14, %v3946_v52  ;;  %v3910_v14 = vpop.permute.xlu0 %3909 }
 0x5c8   : > { %v3768_v29 = vmul.f32 %v3767_v33, %v3765_v27  ;;  %v4035_v16 = vand.u32 4294901760, %v4034_v22 }
 0x5c9   : > { %v4066_v31 = vand.u32 4294901760, %v4065_v45 }
 0x5ca   : > { %v3769_v1 = vxor.u32 2147483648, %v3768_v29  ;;  %v4036_v27 = vsub.f32 %v4034_v22, %v4035_v16 }
 0x5cb   : > { %v4067_v61 = vsub.f32 %v4065_v45, %v4066_v31 }
 0x5cc   : > { %v3770_v60 = vsel %vm3687_vm8, %v3769_v1, %v3768_v29  ;;  %v4028_v29 = vand.u32 4294901760, %v4027_v48  ;;  %v4037_v50 = vand.u32 4294901760, %v4036_v27 }
 0x5cd   : > { %v3773_v36 = vsel %vm3686_vm7, %v7149_v30, %v3770_v60  ;;  %v4068_v56 = vand.u32 4294901760, %v4067_v61  ;;  %v5393_v60 = vpack.c.bf16 %v7458_v62, %v7464_v57 }
 0x5ce   : > { %5687 = vcosq.f32 %v3773_v36 }
 0x5cf   : > { %5689 = vsinq.f32 %v3773_v36 }
 0x5d8   : > { %v5688_v55 = vpop.eup %5687 }
 0x5d9   : > { %v5690_v37 = vpop.eup %5689  ;;  %v3785_v24 = vxor.u32 2147483648, %v5688_v55 }
 0x5da   : > { %v3782_v17 = vxor.u32 2147483648, %v5690_v37 }
 0x5db   : > { %v3786_v21 = vsel %vm3784_vm10, %v3785_v24, %v5690_v37 }
 0x5dc   : > { %v3783_v13 = vsel %vm3781_vm15, %v5688_v55, %v3782_v17 }
 0x5dd   : > { %v3787_v41 = vsel %vm3780_vm11, %v3783_v13, %v3786_v21 }
 0x5de   : > { %v3788_v15 = vsel %vm3777_vm12, nan, %v3787_v41 }
 0x5df   : > { %v3895_v20 = vadd.f32 %v3788_v15, %v6691_v8 }
 0x5e1   : > { %v3943_v25 = vand.u32 4294901760, %v3895_v20 }
 0x5e3   : > { %v5381_v30 = vpack.c.bf16 %v3946_v52, %v3943_v25  ;;  %v4058_v26 = vsub.f32 %v3895_v20, %v3943_v25 }
 0x5e5   : > { %5382 = vmatprep.subr.bf16.mxu1 %v5381_v30  ;;  %v4059_v33 = vand.u32 4294901760, %v4058_v26  ;;  %v5397_v7 = vpack.c.bf16 %v4065_v45, %v4058_v26 }
 0x5e6   : > { %5384 = vmatpush3.bf16.msra.mxu1 %v5381_v30 }
 0x5e7   : > { %5386 = vmatprep.subr.bf16.mxu1 %v5385_v28  ;;  %v4060_v8 = vsub.f32 %v4058_v26, %v4059_v33  ;;  %v5413_v36 = vpack.c.bf16 %v4066_v31, %v4059_v33 }
 0x5e9   : > { %5158 = vmatmul.mubr.f32.vlgmr.msra.gmra.mrb[4].mxu1 %v4019_v2  ;;  %v4061_v19 = vand.u32 4294901760, %v4060_v8 }
 0x5ea   : > { %5388 = vmatpush3.bf16.msra.mxu1 %v5385_v28  ;;  %5160 = vmatprep.mubr.f32.mxu1 %v4028_v29 }
 0x5eb   : > { %v5389_v1 = vpack.c.bf16 %v4068_v56, %v4061_v19 }
 0x5ed   : > { %5161 = vmatmul.mubr.f32.gmra.mrb[6].mxu1 %v4037_v50  ;;  %5390 = vmatprep.subr.bf16.mxu1 %v5389_v1 }
 0x5ee   : > { %5392 = vmatpush3.bf16.msra.mxu1 %v5389_v1  ;;  %5171 = vmatprep.mubr.f32.mxu1 %v7327_v9 }
 0x5ef   : > { %5394 = vmatprep.subr.bf16.mxu1 %v5393_v60 }
 0x5f1   : > { %5172 = vmatmul.mubr.f32.vlgmr.msra.gmra.mrb[4].mxu1 %v7470_v34 }
 0x5f2   : > { %5396 = vmatpush3.bf16.msra.mxu1 %v5393_v60  ;;  %5174 = vmatprep.mubr.f32.mxu1 %v7473_v18 }
 0x5f3   : > { %5398 = vmatprep.subr.bf16.mxu1 %v5397_v7 }
 0x5f5   : > { %5175 = vmatmul.mubr.f32.gmra.mrb[8].mxu1 %v7480_v59 }
 0x5f6   : > { %5400 = vmatpush3.bf16.msra.mxu1 %v5397_v7  ;;  %5185 = vmatprep.mubr.f32.mxu1 %v7363_v3 }
 0x5f7   : > { %5402 = vmatprep.subr.bf16.mxu1 %v7424_v32 }
 0x5f9   : > { %5186 = vmatmul.mubr.f32.vlgmr.msra.gmra.mrb[4].mxu1 %v7478_v47 }
 0x5fa   : > { %5404 = vmatpush3.bf16.msra.mxu1 %v7424_v32  ;;  %5188 = vmatprep.mubr.f32.mxu1 %v7486_v35 }
 0x5fb   : > { %5406 = vmatprep.subr.bf16.mxu1 %v5381_v30 }
 0x5fd   : > { %5189 = vmatmul.mubr.f32.gmra.mrb[10].mxu1 %v4034_v22 }
 0x5fe   : > { %5408 = vmatpush3.bf16.msra.mxu1 %v5381_v30  ;;  %5199 = vmatprep.mubr.f32.mxu1 %v4007_v46 }
 0x5ff   : > { %5410 = vmatprep.subr.bf16.mxu1 %v5409_v10 }
 0x601   : > { %5200 = vmatmul.mubr.f32.vlgmr.msra.gmra.mrb[4].mxu1 %v4017_v49 }
 0x602   : > { %5412 = vmatpush3.bf16.msra.mxu1 %v5409_v10  ;;  %5202 = vmatprep.mubr.f32.mxu1 %v4026_v12 }
 0x603   : > { %5414 = vmatprep.subr.bf16.mxu1 %v5413_v36 }
 0x605   : > { %5203 = vmatmul.mubr.f32.gmra.mrb[12].mxu1 %v4035_v16 }
 0x606   : > { %5416 = vmatpush3.bf16.msra.mxu1 %v5413_v36  ;;  %5213 = vmatprep.mubr.f32.mxu1 %v7327_v9 }
 0x607   : > { %5418 = vmatprep.subr.bf16.mxu1 %v7424_v32 }
 0x609   : > { %5214 = vmatmul.mubr.f32.vlgmr.msra.gmra.mrb[4].mxu1 %v7470_v34 }
 0x60a   : > { %5420 = vmatpush3.bf16.msra.mxu1 %v7424_v32  ;;  %5216 = vmatprep.mubr.f32.mxu1 %v7473_v18 }
 0x60b   : > { %5422 = vmatprep.subr.bf16.mxu1 %v5381_v30 }
 0x60d   : > { %5217 = vmatmul.mubr.f32.gmra.mrb[14].mxu1 %v7480_v59 }
 0x60e   : > { %5424 = vmatpush3.bf16.msra.mxu1 %v5381_v30  ;;  %5227 = vmatprep.mubr.f32.mxu1 %v7327_v9 }
 0x611   : > { %5228 = vmatmul.mubr.f32.vlgmr.msra.gmra.mrb[4].mxu1 %v7470_v34 }
 0x612   : > { %5230 = vmatprep.mubr.f32.mxu1 %v7473_v18 }
 0x615   : > { %5231 = vmatmul.mubr.f32.gmra.mrb[16].mxu1 %v7480_v59 }
 0x6c0   : > { %v5162_v3 = vpop.f32.mrb[6].mxu1 }
 0x6c1   : > { %v4030_v46 = vpop.f32.mrb[7].mxu1 }
 0x6c8   : > { %v5176_v5 = vpop.f32.mrb[8].mxu1 }
 0x6c9   : > { %v4140_v32 = vpop.f32.mrb[9].mxu1 }
 0x6d0   : > { %v5190_v39 = vpop.f32.mrb[10].mxu1 }
 0x6d1   : > { %v4237_v43 = vpop.f32.mrb[11].mxu1 }
 0x6d8   : > { %v5204_v63 = vpop.f32.mrb[12].mxu1 }
 0x6d9   : > { %v4334_v0 = vpop.f32.mrb[13].mxu1 }
 0x6e0   : > { %v5218_v23 = vpop.f32.mrb[14].mxu1 }
 0x6e1   : > { %v4434_v62 = vpop.f32.mrb[15].mxu1 }
 0x6e4   : > { %v5229_v9 = vpop.f32.mrb[4].mxu1 }
 0x6e5   : > { %v4513_v57 = vpop.f32.mrb[5].mxu1 }
 0x6e6   : > { %v5437_v11 = vadd.f32 %v4513_v57, %v3910_v14 }
 0x6e8   : > { %4532 = vst [vmem:[%s160_s6] sm:$0x1] %v5437_v11  ;;  %v5232_v44 = vpop.f32.mrb[16].mxu1 }
 0x6e9   : > { %v4524_v34 = vpop.f32.mrb[17].mxu1 }
 0x6ea   : > { %5704 = shalt.err (!%p5701_p3)
}
 0x6eb   : > { %s5705_s24 = scalar_lea.hbm %s7530_s10, 16  ;;  %s5709_s27 = scalar_lea.hbm %s7575_s3, 32 }
 0x6ec   : > { %p5706_p4 = scmp.ne.s32.totalorder %s7530_s10, %s5705_s24  ;;  %p5710_p9 = scmp.lt.u32.totalorder %s7530_s10, %s7575_s3 }
 0x6ed   : > { %p5711_p10 = scmp.lt.u32.totalorder %s5709_s27, %s5705_s24  ;;  %p5713_p12 = scmp.lt.u32.totalorder %s5705_s24, %s7530_s10 }
 0x6ee   : > { %p5707_p7 = pnand %p5706_p4, %p5822_p5 }
 0x6ef   : > { %p5712_p11 = por %p5711_p10, %p5710_p9 }
 0x6f0   : > { %p5708_p8 = pneg %p5707_p7 }
 0x6f1   : > { %p5714_p13 = por %p5713_p12, %p5712_p11 }
 0x6f3   : > { %p5715_p0 = pnand %p5714_p13, %p5708_p8 }
 0x6f5   : > { %5718 = shalt.err (!%p5715_p0)
}
 0x6f6   : > { %5572 = dma.vmem_to_hbm [thread:$0]  (%p5822_p5), %s7532_s7, 16, %s7530_s10, %s4534_s16  }
 0x6f7 PF: > { %p5578_p1 = scmp.ge.s32.totalorder %s5753_s15, 2  ;;  %s4558_s30 = sand.u32 1, %s5741_s12  }
 0x6f8   : > { %s4559_s4 = scalar_lea.sflag [#allocation3], %s4558_s30 }
 0x6f9   : > { %p5575_p2 = pnand %p5578_p1, %p5826_p6 }
 0x6fb   : > { %5736 = dma.done.wait (!%p5575_p2), %s4559_s4, 16  }
 0x6fc   : > { %5738 = vsyncadd (!%p5575_p2), %s4559_s4, 4294967280  ;;  %p13_p3 = scmp.ge.s32.totalorder %s5809_s18, 4   ;;  %s7608_s12 = smov %s5745_s13 }
 0x6fd   : > { %s7609_s13 = smov %s5749_s14  ;;  %s7610_s14 = smov %s5820_s21 }
 0x6fe   : > { %s7611_s15 = smov %s5809_s18  ;;  %15 = sbr.rel (!%p13_p3) target bundleno = 3 (0x3), region = 75 }
 0x705   :  { %4563 = vsyncpa [#allocation3], 1 }
 0x706   :  { %4565 = vsyncpa [#allocation3 + $0x1], 1 }

</bundles_post_ra>
